<compile_context>
chip_gen: v7x
topology: tpu7x:2x2x1
jax: 0.10.0
libtpu: 0.0.40
codegen_flags: <defaults>
</compile_context>

<pallas_src>
import functools

import numpy as np
import jax
import jax.numpy as jnp
from jax import lax
from jax.experimental import pallas as pl
from jax.experimental.pallas import tpu as pltpu

N_QUBITS = 4
DIM = 1 << N_QUBITS          # 16 basis states; wire 0 = MSB (PennyLane convention)
TS = 8                       # sublane tile (batch rows)
TL = 128                     # lane tile (batch cols)
MAX_BLOCK_ROWS = 64          # rows per grid step -> 64*128 = 8192 batch elems/block


def _bit(i, w):
    return (i >> (N_QUBITS - 1 - w)) & 1


def _cz_ring_sign(i):
    par = 0
    for w in range(N_QUBITS):
        par ^= _bit(i, w) & _bit(i, (w + 1) % N_QUBITS)
    return -1.0 if par else 1.0


def _quantum_kernel(ang_ref, x_ref, out_ref, *, n_layers, num_sub):
    """4-qubit statevector circuit on one lane-dense batch block.

    ang_ref : SMEM (8*L + 32*(L-1),) f32 scalar-prefetch table
              per layer l:        [cos(y/2) x4, sin(y/2) x4]
              per layer l < L-1:  [16 x diag-cos, 16 x diag-sin]   (RZ + CZ fused)
    x_ref   : VMEM (4, BR, 128) f32  -- inputs, wire-major, batch (row, lane)
    out_ref : VMEM (4, BR, 128) f32  -- (1 + <Z_w>)/2 per wire
    """

    def sub_tile(t, carry):
        r0 = pl.multiple_of(t * TS, TS)

        # ---- encoding: RX(pi*x_w)|0>^4 is a product state; build it directly ----
        # TODO(synk): jnp.sin/cos are not native EUP ops; for frozen-lake inputs
        # (x in [0,1] => half-angle in [0, pi/2]) a short odd/even polynomial pair
        # (cos via sqrt/rsqrt on the EUP slot) would cut the VALU expansion further.
        cw, sw = [], []
        for w in range(N_QUBITS):
            half = x_ref[w, pl.ds(r0, TS), :] * jnp.float32(0.5 * np.pi)
            cw.append(jnp.cos(half))
            sw.append(jnp.sin(half))

        zero = jnp.zeros((TS, TL), jnp.float32)
        re = [None] * DIM
        im = [None] * DIM
        for i in range(DIM):
            prod = None
            k = 0
            for w in range(N_QUBITS):
                if _bit(i, w):
                    f = sw[w]
                    k += 1
                else:
                    f = cw[w]
                prod = f if prod is None else prod * f
            k %= 4                                   # overall phase (-1j)**k
            if k == 0:
                re[i], im[i] = prod, zero
            elif k == 1:
                re[i], im[i] = zero, -prod
            elif k == 2:
                re[i], im[i] = -prod, zero
            else:
                re[i], im[i] = zero, prod

        # TODO(synk): for deep circuits (n_layers >~ 8) switch this Python unroll to
        # lax.fori_loop over layers with dynamic SMEM angle indexing (v5e spill risk).
        for l in range(n_layers):
            ry_base = 8 * l

            # ---- RY(y[l,w]): real 2x2 rotation on amplitude pairs ----
            for w in range(N_QUBITS):
                c = ang_ref[ry_base + w]
                s = ang_ref[ry_base + 4 + w]
                m = 1 << (N_QUBITS - 1 - w)
                for i0 in range(DIM):
                    if i0 & m:
                        continue
                    i1 = i0 | m
                    ra, rb = re[i0], re[i1]
                    ja, jb = im[i0], im[i1]
                    re[i0] = c * ra - s * rb
                    re[i1] = s * ra + c * rb
                    im[i0] = c * ja - s * jb
                    im[i1] = s * ja + c * jb

            # ---- fused RZ(z[l,:]) + CZ ring: one complex phase per basis state.
            #      Skipped on the last layer: a trailing diagonal phase cannot
            #      change |amp|^2, hence not the measured outputs. ----
            if l < n_layers - 1:
                dbase = 8 * n_layers + 32 * l
                for i in range(DIM):
                    dc = ang_ref[dbase + i]
                    ds = ang_ref[dbase + 16 + i]
                    r, j = re[i], im[i]
                    re[i] = dc * r - ds * j
                    im[i] = dc * j + ds * r

        # ---- measurement: out_w = (1 + <Z_w>)/2 with shared partial sums ----
        prob = [re[i] * re[i] + im[i] * im[i] for i in range(DIM)]
        pair = [prob[2 * j] + prob[2 * j + 1] for j in range(8)]     # sum over wire-3 bit
        quad = [pair[2 * k] + pair[2 * k + 1] for k in range(4)]     # + wire-2 bit
        t01 = quad[0] + quad[1]
        t23 = quad[2] + quad[3]
        total = t01 + t23
        p0 = [None] * N_QUBITS
        p0[0] = t01                                                  # wire-0 bit == 0
        p0[1] = quad[0] + quad[2]                                    # wire-1 bit == 0
        p0[2] = (pair[0] + pair[2]) + (pair[4] + pair[6])            # wire-2 bit == 0
        p0[3] = ((prob[0] + prob[2]) + (prob[4] + prob[6])) + \
                ((prob[8] + prob[10]) + (prob[12] + prob[14]))       # wire-3 bit == 0
        half_corr = 0.5 * (1.0 - total)              # == 0 up to f32 rounding
        for w in range(N_QUBITS):
            # out_w = 0.5*(1 + P0 - P1) = P0 + 0.5*(1 - total)
            out_ref[w, pl.ds(r0, TS), :] = p0[w] + half_corr
        return carry

    lax.fori_loop(0, num_sub, sub_tile, 0)


def quantum_net_forward(x, y_weights, z_weights):
    """x: (B, 4) f32; y_weights, z_weights: (n_layers, 4) f32 -> (B, 4) f32."""
    x = jnp.asarray(x, jnp.float32)
    y_weights = jnp.asarray(y_weights, jnp.float32)
    z_weights = jnp.asarray(z_weights, jnp.float32)
    B = x.shape[0]
    n_layers = y_weights.shape[0]

    # ---- parameter prep (tiny glue): one flat f32 SMEM angle table ----
    cy, sy = jnp.cos(0.5 * y_weights), jnp.sin(0.5 * y_weights)
    ry_part = jnp.concatenate([cy, sy], axis=1).reshape(-1)           # (8L,)
    if n_layers > 1:
        # RZ phase per basis state (sigma_w = -1 for bit 0, +1 for bit 1),
        # CZ-ring +-1 sign folded in; the last layer's diagonal is dropped.
        sigma = np.array([[2.0 * _bit(i, w) - 1.0 for i in range(DIM)]
                          for w in range(N_QUBITS)], np.float32)      # (4, 16)
        czs = np.array([_cz_ring_sign(i) for i in range(DIM)], np.float32)
        phi = 0.5 * (z_weights[:-1] @ sigma)                          # (L-1, 16)
        dcos = czs * jnp.cos(phi)
        dsin = czs * jnp.sin(phi)
        diag_part = jnp.concatenate([dcos, dsin], axis=1).reshape(-1)  # (32(L-1),)
        angles = jnp.concatenate([ry_part, diag_part])
    else:
        angles = ry_part

    # ---- batch tiling: lane-dense rows of 128, blocks of up to 64 rows ----
    rows = -(-B // TL)
    rows = max(TS, -(-rows // TS) * TS)
    block_rows = min(MAX_BLOCK_ROWS, rows)          # multiple of 8
    nb = -(-rows // block_rows)                     # >= 2 shards across v7x TCs
    rows = nb * block_rows
    b_pad = rows * TL
    x_pad = jnp.pad(x, ((0, b_pad - B), (0, 0)))
    xt = x_pad.T.reshape(N_QUBITS, rows, TL)        # wire-major, lane-dense batch

    kernel = functools.partial(
        _quantum_kernel, n_layers=n_layers, num_sub=block_rows // TS)
    grid_spec = pltpu.PrefetchScalarGridSpec(
        num_scalar_prefetch=1,
        grid=(nb,),
        in_specs=[pl.BlockSpec((N_QUBITS, block_rows, TL), lambda i, ang: (0, i, 0))],
        out_specs=pl.BlockSpec((N_QUBITS, block_rows, TL), lambda i, ang: (0, i, 0)),
    )
    out = pl.pallas_call(
        kernel,
        out_shape=jax.ShapeDtypeStruct((N_QUBITS, rows, TL), jnp.float32),
        grid_spec=grid_spec,
        compiler_params=pltpu.CompilerParams(
            dimension_semantics=("parallel",)),
        cost_estimate=pl.CostEstimate(
            flops=int(b_pad) * (160 + 480 * n_layers),
            transcendentals=int(b_pad) * 8,
            bytes_accessed=int(b_pad) * 32),
    )(angles, xt)

    return out.reshape(N_QUBITS, b_pad).T[:B]


# ---------------- numpy reference (exact statevector sim, float64) ----------------
def _reference(x, yw, zw):
    x = np.asarray(x, np.float64)
    yw = np.asarray(yw, np.float64)
    zw = np.asarray(zw, np.float64)
    B, L = x.shape[0], yw.shape[0]
    I2 = np.eye(2, dtype=complex)

    def RY(t):
        c, s = np.cos(t / 2), np.sin(t / 2)
        return np.array([[c, -s], [s, c]], dtype=complex)

    def RZ(t):
        return np.array([[np.exp(-1j * t / 2), 0], [0, np.exp(1j * t / 2)]])

    def op_on(U, w):
        out = np.array([[1.0 + 0j]])
        for q in range(N_QUBITS):
            out = np.kron(out, U if q == w else I2)
        return out

    def cz_mat(a, b):
        d = np.ones(DIM, dtype=complex)
        for i in range(DIM):
            if _bit(i, a) and _bit(i, b):
                d[i] = -1.0
        return np.diag(d)

    # encoding: product state  prod_w [cos(pi x_w/2)|0> - i sin(pi x_w/2)|1>]
    half = 0.5 * np.pi * x
    c, s = np.cos(half), np.sin(half)
    psi = np.ones((B, 1), dtype=complex)
    for w in range(N_QUBITS):
        qubit = np.stack([c[:, w], -1j * s[:, w]], axis=1)            # (B, 2)
        psi = (psi[:, :, None] * qubit[:, None, :]).reshape(B, -1)

    # layers: batch-independent 16x16 unitary
    U = np.eye(DIM, dtype=complex)
    for l in range(L):
        Ul = np.eye(DIM, dtype=complex)
        for w in range(N_QUBITS):
            Ul = op_on(RY(yw[l, w]), w) @ Ul
        for w in range(N_QUBITS):
            Ul = op_on(RZ(zw[l, w]), w) @ Ul
        for w in range(N_QUBITS):
            Ul = cz_mat(w, (w + 1) % N_QUBITS) @ Ul
        U = Ul @ U
    psi = psi @ U.T                                                    # (B, 16)

    probs = np.abs(psi) ** 2
    out = np.zeros((B, N_QUBITS))
    for w in range(N_QUBITS):
        sgn = np.array([1.0 if _bit(i, w) == 0 else -1.0 for i in range(DIM)])
        out[:, w] = (1.0 + probs @ sgn) / 2.0
    return out


if __name__ == "__main__":
    n_layers = 3
    key = jax.random.PRNGKey(0)
    kx, ky, kz, kx2 = jax.random.split(key, 4)

    # frozen-lake style inputs in [0, 1); weights uniform in [0, 2*pi)
    y_weights = jax.random.uniform(ky, (n_layers, N_QUBITS), dtype=jnp.float32,
                                   maxval=2 * np.pi)
    z_weights = jax.random.uniform(kz, (n_layers, N_QUBITS), dtype=jnp.float32,
                                   maxval=2 * np.pi)

    # small demo batch
    x_small = jax.random.uniform(kx, (8, N_QUBITS), dtype=jnp.float32)
    out_small = jax.block_until_ready(quantum_net_forward(x_small, y_weights, z_weights))
    ref_small = _reference(np.asarray(x_small), np.asarray(y_weights), np.asarray(z_weights))
    np.testing.assert_allclose(np.asarray(out_small), ref_small, rtol=1e-4, atol=1e-4)

    # larger batch: exercises the 64-row block, inner sub-tile loop and nb=2 grid
    x_big = jax.random.uniform(kx2, (9000, N_QUBITS), dtype=jnp.float32)
    out_big = jax.block_until_ready(quantum_net_forward(x_big, y_weights, z_weights))
    ref_big = _reference(np.asarray(x_big), np.asarray(y_weights), np.asarray(z_weights))
    np.testing.assert_allclose(np.asarray(out_big), ref_big, rtol=1e-4, atol=1e-4)

    print("KERNEL_OK")
</pallas_src>

<mosaic_0001>
module attributes {stable_mosaic.version = 11 : i64} {
  func.func @_quantum_kernel(%arg0: i32, %arg1: memref<88xf32, #tpu.memory_space<smem>>, %arg2: memref<4x8x128xf32, #tpu.memory_space<vmem>>, %arg3: memref<4x8x128xf32, #tpu.memory_space<vmem>>) attributes {dimension_semantics = [#tpu.dimension_semantics<parallel>], iteration_bounds = array<i64: 1>, scalar_prefetch = 1 : i64, scratch_operands = 0 : i64, tpu.core_type = #tpu.core_type<tc>, window_params = [{transform_indices = @transform_0, window_bounds = array<i64: 4, 8, 128>}, {transform_indices = @transform_1, window_bounds = array<i64: 4, 8, 128>}]} {
    %c0_i32 = arith.constant 0 : i32
    %c8_i32 = arith.constant 8 : i32
    %0 = arith.muli %c0_i32, %c8_i32 : i32
    %1 = tpu.assume_multiple %0, 8 : i32
    %c0 = arith.constant 0 : index
    %2 = arith.index_cast %1 : i32 to index
    %c0_0 = arith.constant 0 : index
    %3 = vector.load %arg2[%c0, %2, %c0_0] : memref<4x8x128xf32, #tpu.memory_space<vmem>>, vector<1x8x128xf32>
    %4 = vector.shape_cast %3 : vector<1x8x128xf32> to vector<8x128xf32>
    %cst = arith.constant 1.57079637 : f32
    %5 = vector.broadcast %cst : f32 to vector<8x128xf32>
    %6 = arith.mulf %4, %5 : vector<8x128xf32>
    %7 = math.cos %6 : vector<8x128xf32>
    %8 = math.sin %6 : vector<8x128xf32>
    %c1 = arith.constant 1 : index
    %9 = arith.index_cast %1 : i32 to index
    %c0_1 = arith.constant 0 : index
    %10 = vector.load %arg2[%c1, %9, %c0_1] : memref<4x8x128xf32, #tpu.memory_space<vmem>>, vector<1x8x128xf32>
    %11 = vector.shape_cast %10 : vector<1x8x128xf32> to vector<8x128xf32>
    %cst_2 = arith.constant 1.57079637 : f32
    %12 = vector.broadcast %cst_2 : f32 to vector<8x128xf32>
    %13 = arith.mulf %11, %12 : vector<8x128xf32>
    %14 = math.cos %13 : vector<8x128xf32>
    %15 = math.sin %13 : vector<8x128xf32>
    %c2 = arith.constant 2 : index
    %16 = arith.index_cast %1 : i32 to index
    %c0_3 = arith.constant 0 : index
    %17 = vector.load %arg2[%c2, %16, %c0_3] : memref<4x8x128xf32, #tpu.memory_space<vmem>>, vector<1x8x128xf32>
    %18 = vector.shape_cast %17 : vector<1x8x128xf32> to vector<8x128xf32>
    %cst_4 = arith.constant 1.57079637 : f32
    %19 = vector.broadcast %cst_4 : f32 to vector<8x128xf32>
    %20 = arith.mulf %18, %19 : vector<8x128xf32>
    %21 = math.cos %20 : vector<8x128xf32>
    %22 = math.sin %20 : vector<8x128xf32>
    %c3 = arith.constant 3 : index
    %23 = arith.index_cast %1 : i32 to index
    %c0_5 = arith.constant 0 : index
    %24 = vector.load %arg2[%c3, %23, %c0_5] : memref<4x8x128xf32, #tpu.memory_space<vmem>>, vector<1x8x128xf32>
    %25 = vector.shape_cast %24 : vector<1x8x128xf32> to vector<8x128xf32>
    %cst_6 = arith.constant 1.57079637 : f32
    %26 = vector.broadcast %cst_6 : f32 to vector<8x128xf32>
    %27 = arith.mulf %25, %26 : vector<8x128xf32>
    %28 = math.cos %27 : vector<8x128xf32>
    %29 = math.sin %27 : vector<8x128xf32>
    %cst_7 = arith.constant 0.000000e+00 : f32
    %30 = vector.broadcast %cst_7 : f32 to vector<8x128xf32>
    %31 = arith.mulf %7, %14 : vector<8x128xf32>
    %32 = arith.mulf %31, %21 : vector<8x128xf32>
    %33 = arith.mulf %32, %28 : vector<8x128xf32>
    %34 = arith.mulf %7, %14 : vector<8x128xf32>
    %35 = arith.mulf %34, %21 : vector<8x128xf32>
    %36 = arith.mulf %35, %29 : vector<8x128xf32>
    %cst_8 = arith.constant 0.000000e+00 : f32
    %37 = vector.broadcast %cst_8 : f32 to vector<8x128xf32>
    %38 = arith.subf %37, %36 : vector<8x128xf32>
    %39 = arith.mulf %7, %14 : vector<8x128xf32>
    %40 = arith.mulf %39, %22 : vector<8x128xf32>
    %41 = arith.mulf %40, %28 : vector<8x128xf32>
    %cst_9 = arith.constant 0.000000e+00 : f32
    %42 = vector.broadcast %cst_9 : f32 to vector<8x128xf32>
    %43 = arith.subf %42, %41 : vector<8x128xf32>
    %44 = arith.mulf %7, %14 : vector<8x128xf32>
    %45 = arith.mulf %44, %22 : vector<8x128xf32>
    %46 = arith.mulf %45, %29 : vector<8x128xf32>
    %cst_10 = arith.constant 0.000000e+00 : f32
    %47 = vector.broadcast %cst_10 : f32 to vector<8x128xf32>
    %48 = arith.subf %47, %46 : vector<8x128xf32>
    %49 = arith.mulf %7, %15 : vector<8x128xf32>
    %50 = arith.mulf %49, %21 : vector<8x128xf32>
    %51 = arith.mulf %50, %28 : vector<8x128xf32>
    %cst_11 = arith.constant 0.000000e+00 : f32
    %52 = vector.broadcast %cst_11 : f32 to vector<8x128xf32>
    %53 = arith.subf %52, %51 : vector<8x128xf32>
    %54 = arith.mulf %7, %15 : vector<8x128xf32>
    %55 = arith.mulf %54, %21 : vector<8x128xf32>
    %56 = arith.mulf %55, %29 : vector<8x128xf32>
    %cst_12 = arith.constant 0.000000e+00 : f32
    %57 = vector.broadcast %cst_12 : f32 to vector<8x128xf32>
    %58 = arith.subf %57, %56 : vector<8x128xf32>
    %59 = arith.mulf %7, %15 : vector<8x128xf32>
    %60 = arith.mulf %59, %22 : vector<8x128xf32>
    %61 = arith.mulf %60, %28 : vector<8x128xf32>
    %cst_13 = arith.constant 0.000000e+00 : f32
    %62 = vector.broadcast %cst_13 : f32 to vector<8x128xf32>
    %63 = arith.subf %62, %61 : vector<8x128xf32>
    %64 = arith.mulf %7, %15 : vector<8x128xf32>
    %65 = arith.mulf %64, %22 : vector<8x128xf32>
    %66 = arith.mulf %65, %29 : vector<8x128xf32>
    %67 = arith.mulf %8, %14 : vector<8x128xf32>
    %68 = arith.mulf %67, %21 : vector<8x128xf32>
    %69 = arith.mulf %68, %28 : vector<8x128xf32>
    %cst_14 = arith.constant 0.000000e+00 : f32
    %70 = vector.broadcast %cst_14 : f32 to vector<8x128xf32>
    %71 = arith.subf %70, %69 : vector<8x128xf32>
    %72 = arith.mulf %8, %14 : vector<8x128xf32>
    %73 = arith.mulf %72, %21 : vector<8x128xf32>
    %74 = arith.mulf %73, %29 : vector<8x128xf32>
    %cst_15 = arith.constant 0.000000e+00 : f32
    %75 = vector.broadcast %cst_15 : f32 to vector<8x128xf32>
    %76 = arith.subf %75, %74 : vector<8x128xf32>
    %77 = arith.mulf %8, %14 : vector<8x128xf32>
    %78 = arith.mulf %77, %22 : vector<8x128xf32>
    %79 = arith.mulf %78, %28 : vector<8x128xf32>
    %cst_16 = arith.constant 0.000000e+00 : f32
    %80 = vector.broadcast %cst_16 : f32 to vector<8x128xf32>
    %81 = arith.subf %80, %79 : vector<8x128xf32>
    %82 = arith.mulf %8, %14 : vector<8x128xf32>
    %83 = arith.mulf %82, %22 : vector<8x128xf32>
    %84 = arith.mulf %83, %29 : vector<8x128xf32>
    %85 = arith.mulf %8, %15 : vector<8x128xf32>
    %86 = arith.mulf %85, %21 : vector<8x128xf32>
    %87 = arith.mulf %86, %28 : vector<8x128xf32>
    %cst_17 = arith.constant 0.000000e+00 : f32
    %88 = vector.broadcast %cst_17 : f32 to vector<8x128xf32>
    %89 = arith.subf %88, %87 : vector<8x128xf32>
    %90 = arith.mulf %8, %15 : vector<8x128xf32>
    %91 = arith.mulf %90, %21 : vector<8x128xf32>
    %92 = arith.mulf %91, %29 : vector<8x128xf32>
    %93 = arith.mulf %8, %15 : vector<8x128xf32>
    %94 = arith.mulf %93, %22 : vector<8x128xf32>
    %95 = arith.mulf %94, %28 : vector<8x128xf32>
    %96 = arith.mulf %8, %15 : vector<8x128xf32>
    %97 = arith.mulf %96, %22 : vector<8x128xf32>
    %98 = arith.mulf %97, %29 : vector<8x128xf32>
    %c0_18 = arith.constant 0 : index
    %99 = memref.load %arg1[%c0_18] : memref<88xf32, #tpu.memory_space<smem>>
    %c4 = arith.constant 4 : index
    %100 = memref.load %arg1[%c4] : memref<88xf32, #tpu.memory_space<smem>>
    %101 = vector.broadcast %99 : f32 to vector<8x128xf32>
    %102 = arith.mulf %101, %33 : vector<8x128xf32>
    %103 = vector.broadcast %100 : f32 to vector<8x128xf32>
    %104 = arith.mulf %103, %30 : vector<8x128xf32>
    %105 = arith.subf %102, %104 : vector<8x128xf32>
    %106 = vector.broadcast %100 : f32 to vector<8x128xf32>
    %107 = arith.mulf %106, %33 : vector<8x128xf32>
    %108 = vector.broadcast %99 : f32 to vector<8x128xf32>
    %109 = arith.mulf %108, %30 : vector<8x128xf32>
    %110 = arith.addf %107, %109 : vector<8x128xf32>
    %111 = vector.broadcast %99 : f32 to vector<8x128xf32>
    %112 = arith.mulf %111, %30 : vector<8x128xf32>
    %113 = vector.broadcast %100 : f32 to vector<8x128xf32>
    %114 = arith.mulf %113, %71 : vector<8x128xf32>
    %115 = arith.subf %112, %114 : vector<8x128xf32>
    %116 = vector.broadcast %100 : f32 to vector<8x128xf32>
    %117 = arith.mulf %116, %30 : vector<8x128xf32>
    %118 = vector.broadcast %99 : f32 to vector<8x128xf32>
    %119 = arith.mulf %118, %71 : vector<8x128xf32>
    %120 = arith.addf %117, %119 : vector<8x128xf32>
    %121 = vector.broadcast %99 : f32 to vector<8x128xf32>
    %122 = arith.mulf %121, %30 : vector<8x128xf32>
    %123 = vector.broadcast %100 : f32 to vector<8x128xf32>
    %124 = arith.mulf %123, %76 : vector<8x128xf32>
    %125 = arith.subf %122, %124 : vector<8x128xf32>
    %126 = vector.broadcast %100 : f32 to vector<8x128xf32>
    %127 = arith.mulf %126, %30 : vector<8x128xf32>
    %128 = vector.broadcast %99 : f32 to vector<8x128xf32>
    %129 = arith.mulf %128, %76 : vector<8x128xf32>
    %130 = arith.addf %127, %129 : vector<8x128xf32>
    %131 = vector.broadcast %99 : f32 to vector<8x128xf32>
    %132 = arith.mulf %131, %38 : vector<8x128xf32>
    %133 = vector.broadcast %100 : f32 to vector<8x128xf32>
    %134 = arith.mulf %133, %30 : vector<8x128xf32>
    %135 = arith.subf %132, %134 : vector<8x128xf32>
    %136 = vector.broadcast %100 : f32 to vector<8x128xf32>
    %137 = arith.mulf %136, %38 : vector<8x128xf32>
    %138 = vector.broadcast %99 : f32 to vector<8x128xf32>
    %139 = arith.mulf %138, %30 : vector<8x128xf32>
    %140 = arith.addf %137, %139 : vector<8x128xf32>
    %141 = vector.broadcast %99 : f32 to vector<8x128xf32>
    %142 = arith.mulf %141, %30 : vector<8x128xf32>
    %143 = vector.broadcast %100 : f32 to vector<8x128xf32>
    %144 = arith.mulf %143, %81 : vector<8x128xf32>
    %145 = arith.subf %142, %144 : vector<8x128xf32>
    %146 = vector.broadcast %100 : f32 to vector<8x128xf32>
    %147 = arith.mulf %146, %30 : vector<8x128xf32>
    %148 = vector.broadcast %99 : f32 to vector<8x128xf32>
    %149 = arith.mulf %148, %81 : vector<8x128xf32>
    %150 = arith.addf %147, %149 : vector<8x128xf32>
    %151 = vector.broadcast %99 : f32 to vector<8x128xf32>
    %152 = arith.mulf %151, %43 : vector<8x128xf32>
    %153 = vector.broadcast %100 : f32 to vector<8x128xf32>
    %154 = arith.mulf %153, %30 : vector<8x128xf32>
    %155 = arith.subf %152, %154 : vector<8x128xf32>
    %156 = vector.broadcast %100 : f32 to vector<8x128xf32>
    %157 = arith.mulf %156, %43 : vector<8x128xf32>
    %158 = vector.broadcast %99 : f32 to vector<8x128xf32>
    %159 = arith.mulf %158, %30 : vector<8x128xf32>
    %160 = arith.addf %157, %159 : vector<8x128xf32>
    %161 = vector.broadcast %99 : f32 to vector<8x128xf32>
    %162 = arith.mulf %161, %48 : vector<8x128xf32>
    %163 = vector.broadcast %100 : f32 to vector<8x128xf32>
    %164 = arith.mulf %163, %30 : vector<8x128xf32>
    %165 = arith.subf %162, %164 : vector<8x128xf32>
    %166 = vector.broadcast %100 : f32 to vector<8x128xf32>
    %167 = arith.mulf %166, %48 : vector<8x128xf32>
    %168 = vector.broadcast %99 : f32 to vector<8x128xf32>
    %169 = arith.mulf %168, %30 : vector<8x128xf32>
    %170 = arith.addf %167, %169 : vector<8x128xf32>
    %171 = vector.broadcast %99 : f32 to vector<8x128xf32>
    %172 = arith.mulf %171, %30 : vector<8x128xf32>
    %173 = vector.broadcast %100 : f32 to vector<8x128xf32>
    %174 = arith.mulf %173, %84 : vector<8x128xf32>
    %175 = arith.subf %172, %174 : vector<8x128xf32>
    %176 = vector.broadcast %100 : f32 to vector<8x128xf32>
    %177 = arith.mulf %176, %30 : vector<8x128xf32>
    %178 = vector.broadcast %99 : f32 to vector<8x128xf32>
    %179 = arith.mulf %178, %84 : vector<8x128xf32>
    %180 = arith.addf %177, %179 : vector<8x128xf32>
    %181 = vector.broadcast %99 : f32 to vector<8x128xf32>
    %182 = arith.mulf %181, %30 : vector<8x128xf32>
    %183 = vector.broadcast %100 : f32 to vector<8x128xf32>
    %184 = arith.mulf %183, %89 : vector<8x128xf32>
    %185 = arith.subf %182, %184 : vector<8x128xf32>
    %186 = vector.broadcast %100 : f32 to vector<8x128xf32>
    %187 = arith.mulf %186, %30 : vector<8x128xf32>
    %188 = vector.broadcast %99 : f32 to vector<8x128xf32>
    %189 = arith.mulf %188, %89 : vector<8x128xf32>
    %190 = arith.addf %187, %189 : vector<8x128xf32>
    %191 = vector.broadcast %99 : f32 to vector<8x128xf32>
    %192 = arith.mulf %191, %53 : vector<8x128xf32>
    %193 = vector.broadcast %100 : f32 to vector<8x128xf32>
    %194 = arith.mulf %193, %30 : vector<8x128xf32>
    %195 = arith.subf %192, %194 : vector<8x128xf32>
    %196 = vector.broadcast %100 : f32 to vector<8x128xf32>
    %197 = arith.mulf %196, %53 : vector<8x128xf32>
    %198 = vector.broadcast %99 : f32 to vector<8x128xf32>
    %199 = arith.mulf %198, %30 : vector<8x128xf32>
    %200 = arith.addf %197, %199 : vector<8x128xf32>
    %201 = vector.broadcast %99 : f32 to vector<8x128xf32>
    %202 = arith.mulf %201, %58 : vector<8x128xf32>
    %203 = vector.broadcast %100 : f32 to vector<8x128xf32>
    %204 = arith.mulf %203, %30 : vector<8x128xf32>
    %205 = arith.subf %202, %204 : vector<8x128xf32>
    %206 = vector.broadcast %100 : f32 to vector<8x128xf32>
    %207 = arith.mulf %206, %58 : vector<8x128xf32>
    %208 = vector.broadcast %99 : f32 to vector<8x128xf32>
    %209 = arith.mulf %208, %30 : vector<8x128xf32>
    %210 = arith.addf %207, %209 : vector<8x128xf32>
    %211 = vector.broadcast %99 : f32 to vector<8x128xf32>
    %212 = arith.mulf %211, %30 : vector<8x128xf32>
    %213 = vector.broadcast %100 : f32 to vector<8x128xf32>
    %214 = arith.mulf %213, %92 : vector<8x128xf32>
    %215 = arith.subf %212, %214 : vector<8x128xf32>
    %216 = vector.broadcast %100 : f32 to vector<8x128xf32>
    %217 = arith.mulf %216, %30 : vector<8x128xf32>
    %218 = vector.broadcast %99 : f32 to vector<8x128xf32>
    %219 = arith.mulf %218, %92 : vector<8x128xf32>
    %220 = arith.addf %217, %219 : vector<8x128xf32>
    %221 = vector.broadcast %99 : f32 to vector<8x128xf32>
    %222 = arith.mulf %221, %63 : vector<8x128xf32>
    %223 = vector.broadcast %100 : f32 to vector<8x128xf32>
    %224 = arith.mulf %223, %30 : vector<8x128xf32>
    %225 = arith.subf %222, %224 : vector<8x128xf32>
    %226 = vector.broadcast %100 : f32 to vector<8x128xf32>
    %227 = arith.mulf %226, %63 : vector<8x128xf32>
    %228 = vector.broadcast %99 : f32 to vector<8x128xf32>
    %229 = arith.mulf %228, %30 : vector<8x128xf32>
    %230 = arith.addf %227, %229 : vector<8x128xf32>
    %231 = vector.broadcast %99 : f32 to vector<8x128xf32>
    %232 = arith.mulf %231, %30 : vector<8x128xf32>
    %233 = vector.broadcast %100 : f32 to vector<8x128xf32>
    %234 = arith.mulf %233, %95 : vector<8x128xf32>
    %235 = arith.subf %232, %234 : vector<8x128xf32>
    %236 = vector.broadcast %100 : f32 to vector<8x128xf32>
    %237 = arith.mulf %236, %30 : vector<8x128xf32>
    %238 = vector.broadcast %99 : f32 to vector<8x128xf32>
    %239 = arith.mulf %238, %95 : vector<8x128xf32>
    %240 = arith.addf %237, %239 : vector<8x128xf32>
    %241 = vector.broadcast %99 : f32 to vector<8x128xf32>
    %242 = arith.mulf %241, %30 : vector<8x128xf32>
    %243 = vector.broadcast %100 : f32 to vector<8x128xf32>
    %244 = arith.mulf %243, %98 : vector<8x128xf32>
    %245 = arith.subf %242, %244 : vector<8x128xf32>
    %246 = vector.broadcast %100 : f32 to vector<8x128xf32>
    %247 = arith.mulf %246, %30 : vector<8x128xf32>
    %248 = vector.broadcast %99 : f32 to vector<8x128xf32>
    %249 = arith.mulf %248, %98 : vector<8x128xf32>
    %250 = arith.addf %247, %249 : vector<8x128xf32>
    %251 = vector.broadcast %99 : f32 to vector<8x128xf32>
    %252 = arith.mulf %251, %66 : vector<8x128xf32>
    %253 = vector.broadcast %100 : f32 to vector<8x128xf32>
    %254 = arith.mulf %253, %30 : vector<8x128xf32>
    %255 = arith.subf %252, %254 : vector<8x128xf32>
    %256 = vector.broadcast %100 : f32 to vector<8x128xf32>
    %257 = arith.mulf %256, %66 : vector<8x128xf32>
    %258 = vector.broadcast %99 : f32 to vector<8x128xf32>
    %259 = arith.mulf %258, %30 : vector<8x128xf32>
    %260 = arith.addf %257, %259 : vector<8x128xf32>
    %c1_19 = arith.constant 1 : index
    %261 = memref.load %arg1[%c1_19] : memref<88xf32, #tpu.memory_space<smem>>
    %c5 = arith.constant 5 : index
    %262 = memref.load %arg1[%c5] : memref<88xf32, #tpu.memory_space<smem>>
    %263 = vector.broadcast %261 : f32 to vector<8x128xf32>
    %264 = arith.mulf %263, %105 : vector<8x128xf32>
    %265 = vector.broadcast %262 : f32 to vector<8x128xf32>
    %266 = arith.mulf %265, %185 : vector<8x128xf32>
    %267 = arith.subf %264, %266 : vector<8x128xf32>
    %268 = vector.broadcast %262 : f32 to vector<8x128xf32>
    %269 = arith.mulf %268, %105 : vector<8x128xf32>
    %270 = vector.broadcast %261 : f32 to vector<8x128xf32>
    %271 = arith.mulf %270, %185 : vector<8x128xf32>
    %272 = arith.addf %269, %271 : vector<8x128xf32>
    %273 = vector.broadcast %261 : f32 to vector<8x128xf32>
    %274 = arith.mulf %273, %115 : vector<8x128xf32>
    %275 = vector.broadcast %262 : f32 to vector<8x128xf32>
    %276 = arith.mulf %275, %195 : vector<8x128xf32>
    %277 = arith.subf %274, %276 : vector<8x128xf32>
    %278 = vector.broadcast %262 : f32 to vector<8x128xf32>
    %279 = arith.mulf %278, %115 : vector<8x128xf32>
    %280 = vector.broadcast %261 : f32 to vector<8x128xf32>
    %281 = arith.mulf %280, %195 : vector<8x128xf32>
    %282 = arith.addf %279, %281 : vector<8x128xf32>
    %283 = vector.broadcast %261 : f32 to vector<8x128xf32>
    %284 = arith.mulf %283, %125 : vector<8x128xf32>
    %285 = vector.broadcast %262 : f32 to vector<8x128xf32>
    %286 = arith.mulf %285, %205 : vector<8x128xf32>
    %287 = arith.subf %284, %286 : vector<8x128xf32>
    %288 = vector.broadcast %262 : f32 to vector<8x128xf32>
    %289 = arith.mulf %288, %125 : vector<8x128xf32>
    %290 = vector.broadcast %261 : f32 to vector<8x128xf32>
    %291 = arith.mulf %290, %205 : vector<8x128xf32>
    %292 = arith.addf %289, %291 : vector<8x128xf32>
    %293 = vector.broadcast %261 : f32 to vector<8x128xf32>
    %294 = arith.mulf %293, %135 : vector<8x128xf32>
    %295 = vector.broadcast %262 : f32 to vector<8x128xf32>
    %296 = arith.mulf %295, %215 : vector<8x128xf32>
    %297 = arith.subf %294, %296 : vector<8x128xf32>
    %298 = vector.broadcast %262 : f32 to vector<8x128xf32>
    %299 = arith.mulf %298, %135 : vector<8x128xf32>
    %300 = vector.broadcast %261 : f32 to vector<8x128xf32>
    %301 = arith.mulf %300, %215 : vector<8x128xf32>
    %302 = arith.addf %299, %301 : vector<8x128xf32>
    %303 = vector.broadcast %261 : f32 to vector<8x128xf32>
    %304 = arith.mulf %303, %145 : vector<8x128xf32>
    %305 = vector.broadcast %262 : f32 to vector<8x128xf32>
    %306 = arith.mulf %305, %225 : vector<8x128xf32>
    %307 = arith.subf %304, %306 : vector<8x128xf32>
    %308 = vector.broadcast %262 : f32 to vector<8x128xf32>
    %309 = arith.mulf %308, %145 : vector<8x128xf32>
    %310 = vector.broadcast %261 : f32 to vector<8x128xf32>
    %311 = arith.mulf %310, %225 : vector<8x128xf32>
    %312 = arith.addf %309, %311 : vector<8x128xf32>
    %313 = vector.broadcast %261 : f32 to vector<8x128xf32>
    %314 = arith.mulf %313, %155 : vector<8x128xf32>
    %315 = vector.broadcast %262 : f32 to vector<8x128xf32>
    %316 = arith.mulf %315, %235 : vector<8x128xf32>
    %317 = arith.subf %314, %316 : vector<8x128xf32>
    %318 = vector.broadcast %262 : f32 to vector<8x128xf32>
    %319 = arith.mulf %318, %155 : vector<8x128xf32>
    %320 = vector.broadcast %261 : f32 to vector<8x128xf32>
    %321 = arith.mulf %320, %235 : vector<8x128xf32>
    %322 = arith.addf %319, %321 : vector<8x128xf32>
    %323 = vector.broadcast %261 : f32 to vector<8x128xf32>
    %324 = arith.mulf %323, %165 : vector<8x128xf32>
    %325 = vector.broadcast %262 : f32 to vector<8x128xf32>
    %326 = arith.mulf %325, %245 : vector<8x128xf32>
    %327 = arith.subf %324, %326 : vector<8x128xf32>
    %328 = vector.broadcast %262 : f32 to vector<8x128xf32>
    %329 = arith.mulf %328, %165 : vector<8x128xf32>
    %330 = vector.broadcast %261 : f32 to vector<8x128xf32>
    %331 = arith.mulf %330, %245 : vector<8x128xf32>
    %332 = arith.addf %329, %331 : vector<8x128xf32>
    %333 = vector.broadcast %261 : f32 to vector<8x128xf32>
    %334 = arith.mulf %333, %175 : vector<8x128xf32>
    %335 = vector.broadcast %262 : f32 to vector<8x128xf32>
    %336 = arith.mulf %335, %255 : vector<8x128xf32>
    %337 = arith.subf %334, %336 : vector<8x128xf32>
    %338 = vector.broadcast %262 : f32 to vector<8x128xf32>
    %339 = arith.mulf %338, %175 : vector<8x128xf32>
    %340 = vector.broadcast %261 : f32 to vector<8x128xf32>
    %341 = arith.mulf %340, %255 : vector<8x128xf32>
    %342 = arith.addf %339, %341 : vector<8x128xf32>
    %343 = vector.broadcast %261 : f32 to vector<8x128xf32>
    %344 = arith.mulf %343, %110 : vector<8x128xf32>
    %345 = vector.broadcast %262 : f32 to vector<8x128xf32>
    %346 = arith.mulf %345, %190 : vector<8x128xf32>
    %347 = arith.subf %344, %346 : vector<8x128xf32>
    %348 = vector.broadcast %262 : f32 to vector<8x128xf32>
    %349 = arith.mulf %348, %110 : vector<8x128xf32>
    %350 = vector.broadcast %261 : f32 to vector<8x128xf32>
    %351 = arith.mulf %350, %190 : vector<8x128xf32>
    %352 = arith.addf %349, %351 : vector<8x128xf32>
    %353 = vector.broadcast %261 : f32 to vector<8x128xf32>
    %354 = arith.mulf %353, %120 : vector<8x128xf32>
    %355 = vector.broadcast %262 : f32 to vector<8x128xf32>
    %356 = arith.mulf %355, %200 : vector<8x128xf32>
    %357 = arith.subf %354, %356 : vector<8x128xf32>
    %358 = vector.broadcast %262 : f32 to vector<8x128xf32>
    %359 = arith.mulf %358, %120 : vector<8x128xf32>
    %360 = vector.broadcast %261 : f32 to vector<8x128xf32>
    %361 = arith.mulf %360, %200 : vector<8x128xf32>
    %362 = arith.addf %359, %361 : vector<8x128xf32>
    %363 = vector.broadcast %261 : f32 to vector<8x128xf32>
    %364 = arith.mulf %363, %130 : vector<8x128xf32>
    %365 = vector.broadcast %262 : f32 to vector<8x128xf32>
    %366 = arith.mulf %365, %210 : vector<8x128xf32>
    %367 = arith.subf %364, %366 : vector<8x128xf32>
    %368 = vector.broadcast %262 : f32 to vector<8x128xf32>
    %369 = arith.mulf %368, %130 : vector<8x128xf32>
    %370 = vector.broadcast %261 : f32 to vector<8x128xf32>
    %371 = arith.mulf %370, %210 : vector<8x128xf32>
    %372 = arith.addf %369, %371 : vector<8x128xf32>
    %373 = vector.broadcast %261 : f32 to vector<8x128xf32>
    %374 = arith.mulf %373, %140 : vector<8x128xf32>
    %375 = vector.broadcast %262 : f32 to vector<8x128xf32>
    %376 = arith.mulf %375, %220 : vector<8x128xf32>
    %377 = arith.subf %374, %376 : vector<8x128xf32>
    %378 = vector.broadcast %262 : f32 to vector<8x128xf32>
    %379 = arith.mulf %378, %140 : vector<8x128xf32>
    %380 = vector.broadcast %261 : f32 to vector<8x128xf32>
    %381 = arith.mulf %380, %220 : vector<8x128xf32>
    %382 = arith.addf %379, %381 : vector<8x128xf32>
    %383 = vector.broadcast %261 : f32 to vector<8x128xf32>
    %384 = arith.mulf %383, %150 : vector<8x128xf32>
    %385 = vector.broadcast %262 : f32 to vector<8x128xf32>
    %386 = arith.mulf %385, %230 : vector<8x128xf32>
    %387 = arith.subf %384, %386 : vector<8x128xf32>
    %388 = vector.broadcast %262 : f32 to vector<8x128xf32>
    %389 = arith.mulf %388, %150 : vector<8x128xf32>
    %390 = vector.broadcast %261 : f32 to vector<8x128xf32>
    %391 = arith.mulf %390, %230 : vector<8x128xf32>
    %392 = arith.addf %389, %391 : vector<8x128xf32>
    %393 = vector.broadcast %261 : f32 to vector<8x128xf32>
    %394 = arith.mulf %393, %160 : vector<8x128xf32>
    %395 = vector.broadcast %262 : f32 to vector<8x128xf32>
    %396 = arith.mulf %395, %240 : vector<8x128xf32>
    %397 = arith.subf %394, %396 : vector<8x128xf32>
    %398 = vector.broadcast %262 : f32 to vector<8x128xf32>
    %399 = arith.mulf %398, %160 : vector<8x128xf32>
    %400 = vector.broadcast %261 : f32 to vector<8x128xf32>
    %401 = arith.mulf %400, %240 : vector<8x128xf32>
    %402 = arith.addf %399, %401 : vector<8x128xf32>
    %403 = vector.broadcast %261 : f32 to vector<8x128xf32>
    %404 = arith.mulf %403, %170 : vector<8x128xf32>
    %405 = vector.broadcast %262 : f32 to vector<8x128xf32>
    %406 = arith.mulf %405, %250 : vector<8x128xf32>
    %407 = arith.subf %404, %406 : vector<8x128xf32>
    %408 = vector.broadcast %262 : f32 to vector<8x128xf32>
    %409 = arith.mulf %408, %170 : vector<8x128xf32>
    %410 = vector.broadcast %261 : f32 to vector<8x128xf32>
    %411 = arith.mulf %410, %250 : vector<8x128xf32>
    %412 = arith.addf %409, %411 : vector<8x128xf32>
    %413 = vector.broadcast %261 : f32 to vector<8x128xf32>
    %414 = arith.mulf %413, %180 : vector<8x128xf32>
    %415 = vector.broadcast %262 : f32 to vector<8x128xf32>
    %416 = arith.mulf %415, %260 : vector<8x128xf32>
    %417 = arith.subf %414, %416 : vector<8x128xf32>
    %418 = vector.broadcast %262 : f32 to vector<8x128xf32>
    %419 = arith.mulf %418, %180 : vector<8x128xf32>
    %420 = vector.broadcast %261 : f32 to vector<8x128xf32>
    %421 = arith.mulf %420, %260 : vector<8x128xf32>
    %422 = arith.addf %419, %421 : vector<8x128xf32>
    %c2_20 = arith.constant 2 : index
    %423 = memref.load %arg1[%c2_20] : memref<88xf32, #tpu.memory_space<smem>>
    %c6 = arith.constant 6 : index
    %424 = memref.load %arg1[%c6] : memref<88xf32, #tpu.memory_space<smem>>
    %425 = vector.broadcast %423 : f32 to vector<8x128xf32>
    %426 = arith.mulf %425, %267 : vector<8x128xf32>
    %427 = vector.broadcast %424 : f32 to vector<8x128xf32>
    %428 = arith.mulf %427, %307 : vector<8x128xf32>
    %429 = arith.subf %426, %428 : vector<8x128xf32>
    %430 = vector.broadcast %424 : f32 to vector<8x128xf32>
    %431 = arith.mulf %430, %267 : vector<8x128xf32>
    %432 = vector.broadcast %423 : f32 to vector<8x128xf32>
    %433 = arith.mulf %432, %307 : vector<8x128xf32>
    %434 = arith.addf %431, %433 : vector<8x128xf32>
    %435 = vector.broadcast %423 : f32 to vector<8x128xf32>
    %436 = arith.mulf %435, %277 : vector<8x128xf32>
    %437 = vector.broadcast %424 : f32 to vector<8x128xf32>
    %438 = arith.mulf %437, %317 : vector<8x128xf32>
    %439 = arith.subf %436, %438 : vector<8x128xf32>
    %440 = vector.broadcast %424 : f32 to vector<8x128xf32>
    %441 = arith.mulf %440, %277 : vector<8x128xf32>
    %442 = vector.broadcast %423 : f32 to vector<8x128xf32>
    %443 = arith.mulf %442, %317 : vector<8x128xf32>
    %444 = arith.addf %441, %443 : vector<8x128xf32>
    %445 = vector.broadcast %423 : f32 to vector<8x128xf32>
    %446 = arith.mulf %445, %287 : vector<8x128xf32>
    %447 = vector.broadcast %424 : f32 to vector<8x128xf32>
    %448 = arith.mulf %447, %327 : vector<8x128xf32>
    %449 = arith.subf %446, %448 : vector<8x128xf32>
    %450 = vector.broadcast %424 : f32 to vector<8x128xf32>
    %451 = arith.mulf %450, %287 : vector<8x128xf32>
    %452 = vector.broadcast %423 : f32 to vector<8x128xf32>
    %453 = arith.mulf %452, %327 : vector<8x128xf32>
    %454 = arith.addf %451, %453 : vector<8x128xf32>
    %455 = vector.broadcast %423 : f32 to vector<8x128xf32>
    %456 = arith.mulf %455, %297 : vector<8x128xf32>
    %457 = vector.broadcast %424 : f32 to vector<8x128xf32>
    %458 = arith.mulf %457, %337 : vector<8x128xf32>
    %459 = arith.subf %456, %458 : vector<8x128xf32>
    %460 = vector.broadcast %424 : f32 to vector<8x128xf32>
    %461 = arith.mulf %460, %297 : vector<8x128xf32>
    %462 = vector.broadcast %423 : f32 to vector<8x128xf32>
    %463 = arith.mulf %462, %337 : vector<8x128xf32>
    %464 = arith.addf %461, %463 : vector<8x128xf32>
    %465 = vector.broadcast %423 : f32 to vector<8x128xf32>
    %466 = arith.mulf %465, %272 : vector<8x128xf32>
    %467 = vector.broadcast %424 : f32 to vector<8x128xf32>
    %468 = arith.mulf %467, %312 : vector<8x128xf32>
    %469 = arith.subf %466, %468 : vector<8x128xf32>
    %470 = vector.broadcast %424 : f32 to vector<8x128xf32>
    %471 = arith.mulf %470, %272 : vector<8x128xf32>
    %472 = vector.broadcast %423 : f32 to vector<8x128xf32>
    %473 = arith.mulf %472, %312 : vector<8x128xf32>
    %474 = arith.addf %471, %473 : vector<8x128xf32>
    %475 = vector.broadcast %423 : f32 to vector<8x128xf32>
    %476 = arith.mulf %475, %282 : vector<8x128xf32>
    %477 = vector.broadcast %424 : f32 to vector<8x128xf32>
    %478 = arith.mulf %477, %322 : vector<8x128xf32>
    %479 = arith.subf %476, %478 : vector<8x128xf32>
    %480 = vector.broadcast %424 : f32 to vector<8x128xf32>
    %481 = arith.mulf %480, %282 : vector<8x128xf32>
    %482 = vector.broadcast %423 : f32 to vector<8x128xf32>
    %483 = arith.mulf %482, %322 : vector<8x128xf32>
    %484 = arith.addf %481, %483 : vector<8x128xf32>
    %485 = vector.broadcast %423 : f32 to vector<8x128xf32>
    %486 = arith.mulf %485, %292 : vector<8x128xf32>
    %487 = vector.broadcast %424 : f32 to vector<8x128xf32>
    %488 = arith.mulf %487, %332 : vector<8x128xf32>
    %489 = arith.subf %486, %488 : vector<8x128xf32>
    %490 = vector.broadcast %424 : f32 to vector<8x128xf32>
    %491 = arith.mulf %490, %292 : vector<8x128xf32>
    %492 = vector.broadcast %423 : f32 to vector<8x128xf32>
    %493 = arith.mulf %492, %332 : vector<8x128xf32>
    %494 = arith.addf %491, %493 : vector<8x128xf32>
    %495 = vector.broadcast %423 : f32 to vector<8x128xf32>
    %496 = arith.mulf %495, %302 : vector<8x128xf32>
    %497 = vector.broadcast %424 : f32 to vector<8x128xf32>
    %498 = arith.mulf %497, %342 : vector<8x128xf32>
    %499 = arith.subf %496, %498 : vector<8x128xf32>
    %500 = vector.broadcast %424 : f32 to vector<8x128xf32>
    %501 = arith.mulf %500, %302 : vector<8x128xf32>
    %502 = vector.broadcast %423 : f32 to vector<8x128xf32>
    %503 = arith.mulf %502, %342 : vector<8x128xf32>
    %504 = arith.addf %501, %503 : vector<8x128xf32>
    %505 = vector.broadcast %423 : f32 to vector<8x128xf32>
    %506 = arith.mulf %505, %347 : vector<8x128xf32>
    %507 = vector.broadcast %424 : f32 to vector<8x128xf32>
    %508 = arith.mulf %507, %387 : vector<8x128xf32>
    %509 = arith.subf %506, %508 : vector<8x128xf32>
    %510 = vector.broadcast %424 : f32 to vector<8x128xf32>
    %511 = arith.mulf %510, %347 : vector<8x128xf32>
    %512 = vector.broadcast %423 : f32 to vector<8x128xf32>
    %513 = arith.mulf %512, %387 : vector<8x128xf32>
    %514 = arith.addf %511, %513 : vector<8x128xf32>
    %515 = vector.broadcast %423 : f32 to vector<8x128xf32>
    %516 = arith.mulf %515, %357 : vector<8x128xf32>
    %517 = vector.broadcast %424 : f32 to vector<8x128xf32>
    %518 = arith.mulf %517, %397 : vector<8x128xf32>
    %519 = arith.subf %516, %518 : vector<8x128xf32>
    %520 = vector.broadcast %424 : f32 to vector<8x128xf32>
    %521 = arith.mulf %520, %357 : vector<8x128xf32>
    %522 = vector.broadcast %423 : f32 to vector<8x128xf32>
    %523 = arith.mulf %522, %397 : vector<8x128xf32>
    %524 = arith.addf %521, %523 : vector<8x128xf32>
    %525 = vector.broadcast %423 : f32 to vector<8x128xf32>
    %526 = arith.mulf %525, %367 : vector<8x128xf32>
    %527 = vector.broadcast %424 : f32 to vector<8x128xf32>
    %528 = arith.mulf %527, %407 : vector<8x128xf32>
    %529 = arith.subf %526, %528 : vector<8x128xf32>
    %530 = vector.broadcast %424 : f32 to vector<8x128xf32>
    %531 = arith.mulf %530, %367 : vector<8x128xf32>
    %532 = vector.broadcast %423 : f32 to vector<8x128xf32>
    %533 = arith.mulf %532, %407 : vector<8x128xf32>
    %534 = arith.addf %531, %533 : vector<8x128xf32>
    %535 = vector.broadcast %423 : f32 to vector<8x128xf32>
    %536 = arith.mulf %535, %377 : vector<8x128xf32>
    %537 = vector.broadcast %424 : f32 to vector<8x128xf32>
    %538 = arith.mulf %537, %417 : vector<8x128xf32>
    %539 = arith.subf %536, %538 : vector<8x128xf32>
    %540 = vector.broadcast %424 : f32 to vector<8x128xf32>
    %541 = arith.mulf %540, %377 : vector<8x128xf32>
    %542 = vector.broadcast %423 : f32 to vector<8x128xf32>
    %543 = arith.mulf %542, %417 : vector<8x128xf32>
    %544 = arith.addf %541, %543 : vector<8x128xf32>
    %545 = vector.broadcast %423 : f32 to vector<8x128xf32>
    %546 = arith.mulf %545, %352 : vector<8x128xf32>
    %547 = vector.broadcast %424 : f32 to vector<8x128xf32>
    %548 = arith.mulf %547, %392 : vector<8x128xf32>
    %549 = arith.subf %546, %548 : vector<8x128xf32>
    %550 = vector.broadcast %424 : f32 to vector<8x128xf32>
    %551 = arith.mulf %550, %352 : vector<8x128xf32>
    %552 = vector.broadcast %423 : f32 to vector<8x128xf32>
    %553 = arith.mulf %552, %392 : vector<8x128xf32>
    %554 = arith.addf %551, %553 : vector<8x128xf32>
    %555 = vector.broadcast %423 : f32 to vector<8x128xf32>
    %556 = arith.mulf %555, %362 : vector<8x128xf32>
    %557 = vector.broadcast %424 : f32 to vector<8x128xf32>
    %558 = arith.mulf %557, %402 : vector<8x128xf32>
    %559 = arith.subf %556, %558 : vector<8x128xf32>
    %560 = vector.broadcast %424 : f32 to vector<8x128xf32>
    %561 = arith.mulf %560, %362 : vector<8x128xf32>
    %562 = vector.broadcast %423 : f32 to vector<8x128xf32>
    %563 = arith.mulf %562, %402 : vector<8x128xf32>
    %564 = arith.addf %561, %563 : vector<8x128xf32>
    %565 = vector.broadcast %423 : f32 to vector<8x128xf32>
    %566 = arith.mulf %565, %372 : vector<8x128xf32>
    %567 = vector.broadcast %424 : f32 to vector<8x128xf32>
    %568 = arith.mulf %567, %412 : vector<8x128xf32>
    %569 = arith.subf %566, %568 : vector<8x128xf32>
    %570 = vector.broadcast %424 : f32 to vector<8x128xf32>
    %571 = arith.mulf %570, %372 : vector<8x128xf32>
    %572 = vector.broadcast %423 : f32 to vector<8x128xf32>
    %573 = arith.mulf %572, %412 : vector<8x128xf32>
    %574 = arith.addf %571, %573 : vector<8x128xf32>
    %575 = vector.broadcast %423 : f32 to vector<8x128xf32>
    %576 = arith.mulf %575, %382 : vector<8x128xf32>
    %577 = vector.broadcast %424 : f32 to vector<8x128xf32>
    %578 = arith.mulf %577, %422 : vector<8x128xf32>
    %579 = arith.subf %576, %578 : vector<8x128xf32>
    %580 = vector.broadcast %424 : f32 to vector<8x128xf32>
    %581 = arith.mulf %580, %382 : vector<8x128xf32>
    %582 = vector.broadcast %423 : f32 to vector<8x128xf32>
    %583 = arith.mulf %582, %422 : vector<8x128xf32>
    %584 = arith.addf %581, %583 : vector<8x128xf32>
    %c3_21 = arith.constant 3 : index
    %585 = memref.load %arg1[%c3_21] : memref<88xf32, #tpu.memory_space<smem>>
    %c7 = arith.constant 7 : index
    %586 = memref.load %arg1[%c7] : memref<88xf32, #tpu.memory_space<smem>>
    %587 = vector.broadcast %585 : f32 to vector<8x128xf32>
    %588 = arith.mulf %587, %429 : vector<8x128xf32>
    %589 = vector.broadcast %586 : f32 to vector<8x128xf32>
    %590 = arith.mulf %589, %449 : vector<8x128xf32>
    %591 = arith.subf %588, %590 : vector<8x128xf32>
    %592 = vector.broadcast %586 : f32 to vector<8x128xf32>
    %593 = arith.mulf %592, %429 : vector<8x128xf32>
    %594 = vector.broadcast %585 : f32 to vector<8x128xf32>
    %595 = arith.mulf %594, %449 : vector<8x128xf32>
    %596 = arith.addf %593, %595 : vector<8x128xf32>
    %597 = vector.broadcast %585 : f32 to vector<8x128xf32>
    %598 = arith.mulf %597, %439 : vector<8x128xf32>
    %599 = vector.broadcast %586 : f32 to vector<8x128xf32>
    %600 = arith.mulf %599, %459 : vector<8x128xf32>
    %601 = arith.subf %598, %600 : vector<8x128xf32>
    %602 = vector.broadcast %586 : f32 to vector<8x128xf32>
    %603 = arith.mulf %602, %439 : vector<8x128xf32>
    %604 = vector.broadcast %585 : f32 to vector<8x128xf32>
    %605 = arith.mulf %604, %459 : vector<8x128xf32>
    %606 = arith.addf %603, %605 : vector<8x128xf32>
    %607 = vector.broadcast %585 : f32 to vector<8x128xf32>
    %608 = arith.mulf %607, %434 : vector<8x128xf32>
    %609 = vector.broadcast %586 : f32 to vector<8x128xf32>
    %610 = arith.mulf %609, %454 : vector<8x128xf32>
    %611 = arith.subf %608, %610 : vector<8x128xf32>
    %612 = vector.broadcast %586 : f32 to vector<8x128xf32>
    %613 = arith.mulf %612, %434 : vector<8x128xf32>
    %614 = vector.broadcast %585 : f32 to vector<8x128xf32>
    %615 = arith.mulf %614, %454 : vector<8x128xf32>
    %616 = arith.addf %613, %615 : vector<8x128xf32>
    %617 = vector.broadcast %585 : f32 to vector<8x128xf32>
    %618 = arith.mulf %617, %444 : vector<8x128xf32>
    %619 = vector.broadcast %586 : f32 to vector<8x128xf32>
    %620 = arith.mulf %619, %464 : vector<8x128xf32>
    %621 = arith.subf %618, %620 : vector<8x128xf32>
    %622 = vector.broadcast %586 : f32 to vector<8x128xf32>
    %623 = arith.mulf %622, %444 : vector<8x128xf32>
    %624 = vector.broadcast %585 : f32 to vector<8x128xf32>
    %625 = arith.mulf %624, %464 : vector<8x128xf32>
    %626 = arith.addf %623, %625 : vector<8x128xf32>
    %627 = vector.broadcast %585 : f32 to vector<8x128xf32>
    %628 = arith.mulf %627, %469 : vector<8x128xf32>
    %629 = vector.broadcast %586 : f32 to vector<8x128xf32>
    %630 = arith.mulf %629, %489 : vector<8x128xf32>
    %631 = arith.subf %628, %630 : vector<8x128xf32>
    %632 = vector.broadcast %586 : f32 to vector<8x128xf32>
    %633 = arith.mulf %632, %469 : vector<8x128xf32>
    %634 = vector.broadcast %585 : f32 to vector<8x128xf32>
    %635 = arith.mulf %634, %489 : vector<8x128xf32>
    %636 = arith.addf %633, %635 : vector<8x128xf32>
    %637 = vector.broadcast %585 : f32 to vector<8x128xf32>
    %638 = arith.mulf %637, %479 : vector<8x128xf32>
    %639 = vector.broadcast %586 : f32 to vector<8x128xf32>
    %640 = arith.mulf %639, %499 : vector<8x128xf32>
    %641 = arith.subf %638, %640 : vector<8x128xf32>
    %642 = vector.broadcast %586 : f32 to vector<8x128xf32>
    %643 = arith.mulf %642, %479 : vector<8x128xf32>
    %644 = vector.broadcast %585 : f32 to vector<8x128xf32>
    %645 = arith.mulf %644, %499 : vector<8x128xf32>
    %646 = arith.addf %643, %645 : vector<8x128xf32>
    %647 = vector.broadcast %585 : f32 to vector<8x128xf32>
    %648 = arith.mulf %647, %474 : vector<8x128xf32>
    %649 = vector.broadcast %586 : f32 to vector<8x128xf32>
    %650 = arith.mulf %649, %494 : vector<8x128xf32>
    %651 = arith.subf %648, %650 : vector<8x128xf32>
    %652 = vector.broadcast %586 : f32 to vector<8x128xf32>
    %653 = arith.mulf %652, %474 : vector<8x128xf32>
    %654 = vector.broadcast %585 : f32 to vector<8x128xf32>
    %655 = arith.mulf %654, %494 : vector<8x128xf32>
    %656 = arith.addf %653, %655 : vector<8x128xf32>
    %657 = vector.broadcast %585 : f32 to vector<8x128xf32>
    %658 = arith.mulf %657, %484 : vector<8x128xf32>
    %659 = vector.broadcast %586 : f32 to vector<8x128xf32>
    %660 = arith.mulf %659, %504 : vector<8x128xf32>
    %661 = arith.subf %658, %660 : vector<8x128xf32>
    %662 = vector.broadcast %586 : f32 to vector<8x128xf32>
    %663 = arith.mulf %662, %484 : vector<8x128xf32>
    %664 = vector.broadcast %585 : f32 to vector<8x128xf32>
    %665 = arith.mulf %664, %504 : vector<8x128xf32>
    %666 = arith.addf %663, %665 : vector<8x128xf32>
    %667 = vector.broadcast %585 : f32 to vector<8x128xf32>
    %668 = arith.mulf %667, %509 : vector<8x128xf32>
    %669 = vector.broadcast %586 : f32 to vector<8x128xf32>
    %670 = arith.mulf %669, %529 : vector<8x128xf32>
    %671 = arith.subf %668, %670 : vector<8x128xf32>
    %672 = vector.broadcast %586 : f32 to vector<8x128xf32>
    %673 = arith.mulf %672, %509 : vector<8x128xf32>
    %674 = vector.broadcast %585 : f32 to vector<8x128xf32>
    %675 = arith.mulf %674, %529 : vector<8x128xf32>
    %676 = arith.addf %673, %675 : vector<8x128xf32>
    %677 = vector.broadcast %585 : f32 to vector<8x128xf32>
    %678 = arith.mulf %677, %519 : vector<8x128xf32>
    %679 = vector.broadcast %586 : f32 to vector<8x128xf32>
    %680 = arith.mulf %679, %539 : vector<8x128xf32>
    %681 = arith.subf %678, %680 : vector<8x128xf32>
    %682 = vector.broadcast %586 : f32 to vector<8x128xf32>
    %683 = arith.mulf %682, %519 : vector<8x128xf32>
    %684 = vector.broadcast %585 : f32 to vector<8x128xf32>
    %685 = arith.mulf %684, %539 : vector<8x128xf32>
    %686 = arith.addf %683, %685 : vector<8x128xf32>
    %687 = vector.broadcast %585 : f32 to vector<8x128xf32>
    %688 = arith.mulf %687, %514 : vector<8x128xf32>
    %689 = vector.broadcast %586 : f32 to vector<8x128xf32>
    %690 = arith.mulf %689, %534 : vector<8x128xf32>
    %691 = arith.subf %688, %690 : vector<8x128xf32>
    %692 = vector.broadcast %586 : f32 to vector<8x128xf32>
    %693 = arith.mulf %692, %514 : vector<8x128xf32>
    %694 = vector.broadcast %585 : f32 to vector<8x128xf32>
    %695 = arith.mulf %694, %534 : vector<8x128xf32>
    %696 = arith.addf %693, %695 : vector<8x128xf32>
    %697 = vector.broadcast %585 : f32 to vector<8x128xf32>
    %698 = arith.mulf %697, %524 : vector<8x128xf32>
    %699 = vector.broadcast %586 : f32 to vector<8x128xf32>
    %700 = arith.mulf %699, %544 : vector<8x128xf32>
    %701 = arith.subf %698, %700 : vector<8x128xf32>
    %702 = vector.broadcast %586 : f32 to vector<8x128xf32>
    %703 = arith.mulf %702, %524 : vector<8x128xf32>
    %704 = vector.broadcast %585 : f32 to vector<8x128xf32>
    %705 = arith.mulf %704, %544 : vector<8x128xf32>
    %706 = arith.addf %703, %705 : vector<8x128xf32>
    %707 = vector.broadcast %585 : f32 to vector<8x128xf32>
    %708 = arith.mulf %707, %549 : vector<8x128xf32>
    %709 = vector.broadcast %586 : f32 to vector<8x128xf32>
    %710 = arith.mulf %709, %569 : vector<8x128xf32>
    %711 = arith.subf %708, %710 : vector<8x128xf32>
    %712 = vector.broadcast %586 : f32 to vector<8x128xf32>
    %713 = arith.mulf %712, %549 : vector<8x128xf32>
    %714 = vector.broadcast %585 : f32 to vector<8x128xf32>
    %715 = arith.mulf %714, %569 : vector<8x128xf32>
    %716 = arith.addf %713, %715 : vector<8x128xf32>
    %717 = vector.broadcast %585 : f32 to vector<8x128xf32>
    %718 = arith.mulf %717, %559 : vector<8x128xf32>
    %719 = vector.broadcast %586 : f32 to vector<8x128xf32>
    %720 = arith.mulf %719, %579 : vector<8x128xf32>
    %721 = arith.subf %718, %720 : vector<8x128xf32>
    %722 = vector.broadcast %586 : f32 to vector<8x128xf32>
    %723 = arith.mulf %722, %559 : vector<8x128xf32>
    %724 = vector.broadcast %585 : f32 to vector<8x128xf32>
    %725 = arith.mulf %724, %579 : vector<8x128xf32>
    %726 = arith.addf %723, %725 : vector<8x128xf32>
    %727 = vector.broadcast %585 : f32 to vector<8x128xf32>
    %728 = arith.mulf %727, %554 : vector<8x128xf32>
    %729 = vector.broadcast %586 : f32 to vector<8x128xf32>
    %730 = arith.mulf %729, %574 : vector<8x128xf32>
    %731 = arith.subf %728, %730 : vector<8x128xf32>
    %732 = vector.broadcast %586 : f32 to vector<8x128xf32>
    %733 = arith.mulf %732, %554 : vector<8x128xf32>
    %734 = vector.broadcast %585 : f32 to vector<8x128xf32>
    %735 = arith.mulf %734, %574 : vector<8x128xf32>
    %736 = arith.addf %733, %735 : vector<8x128xf32>
    %737 = vector.broadcast %585 : f32 to vector<8x128xf32>
    %738 = arith.mulf %737, %564 : vector<8x128xf32>
    %739 = vector.broadcast %586 : f32 to vector<8x128xf32>
    %740 = arith.mulf %739, %584 : vector<8x128xf32>
    %741 = arith.subf %738, %740 : vector<8x128xf32>
    %742 = vector.broadcast %586 : f32 to vector<8x128xf32>
    %743 = arith.mulf %742, %564 : vector<8x128xf32>
    %744 = vector.broadcast %585 : f32 to vector<8x128xf32>
    %745 = arith.mulf %744, %584 : vector<8x128xf32>
    %746 = arith.addf %743, %745 : vector<8x128xf32>
    %c24 = arith.constant 24 : index
    %747 = memref.load %arg1[%c24] : memref<88xf32, #tpu.memory_space<smem>>
    %c40 = arith.constant 40 : index
    %748 = memref.load %arg1[%c40] : memref<88xf32, #tpu.memory_space<smem>>
    %749 = vector.broadcast %747 : f32 to vector<8x128xf32>
    %750 = arith.mulf %749, %591 : vector<8x128xf32>
    %751 = vector.broadcast %748 : f32 to vector<8x128xf32>
    %752 = arith.mulf %751, %601 : vector<8x128xf32>
    %753 = arith.subf %750, %752 : vector<8x128xf32>
    %754 = vector.broadcast %747 : f32 to vector<8x128xf32>
    %755 = arith.mulf %754, %601 : vector<8x128xf32>
    %756 = vector.broadcast %748 : f32 to vector<8x128xf32>
    %757 = arith.mulf %756, %591 : vector<8x128xf32>
    %758 = arith.addf %755, %757 : vector<8x128xf32>
    %c25 = arith.constant 25 : index
    %759 = memref.load %arg1[%c25] : memref<88xf32, #tpu.memory_space<smem>>
    %c41 = arith.constant 41 : index
    %760 = memref.load %arg1[%c41] : memref<88xf32, #tpu.memory_space<smem>>
    %761 = vector.broadcast %759 : f32 to vector<8x128xf32>
    %762 = arith.mulf %761, %596 : vector<8x128xf32>
    %763 = vector.broadcast %760 : f32 to vector<8x128xf32>
    %764 = arith.mulf %763, %606 : vector<8x128xf32>
    %765 = arith.subf %762, %764 : vector<8x128xf32>
    %766 = vector.broadcast %759 : f32 to vector<8x128xf32>
    %767 = arith.mulf %766, %606 : vector<8x128xf32>
    %768 = vector.broadcast %760 : f32 to vector<8x128xf32>
    %769 = arith.mulf %768, %596 : vector<8x128xf32>
    %770 = arith.addf %767, %769 : vector<8x128xf32>
    %c26 = arith.constant 26 : index
    %771 = memref.load %arg1[%c26] : memref<88xf32, #tpu.memory_space<smem>>
    %c42 = arith.constant 42 : index
    %772 = memref.load %arg1[%c42] : memref<88xf32, #tpu.memory_space<smem>>
    %773 = vector.broadcast %771 : f32 to vector<8x128xf32>
    %774 = arith.mulf %773, %611 : vector<8x128xf32>
    %775 = vector.broadcast %772 : f32 to vector<8x128xf32>
    %776 = arith.mulf %775, %621 : vector<8x128xf32>
    %777 = arith.subf %774, %776 : vector<8x128xf32>
    %778 = vector.broadcast %771 : f32 to vector<8x128xf32>
    %779 = arith.mulf %778, %621 : vector<8x128xf32>
    %780 = vector.broadcast %772 : f32 to vector<8x128xf32>
    %781 = arith.mulf %780, %611 : vector<8x128xf32>
    %782 = arith.addf %779, %781 : vector<8x128xf32>
    %c27 = arith.constant 27 : index
    %783 = memref.load %arg1[%c27] : memref<88xf32, #tpu.memory_space<smem>>
    %c43 = arith.constant 43 : index
    %784 = memref.load %arg1[%c43] : memref<88xf32, #tpu.memory_space<smem>>
    %785 = vector.broadcast %783 : f32 to vector<8x128xf32>
    %786 = arith.mulf %785, %616 : vector<8x128xf32>
    %787 = vector.broadcast %784 : f32 to vector<8x128xf32>
    %788 = arith.mulf %787, %626 : vector<8x128xf32>
    %789 = arith.subf %786, %788 : vector<8x128xf32>
    %790 = vector.broadcast %783 : f32 to vector<8x128xf32>
    %791 = arith.mulf %790, %626 : vector<8x128xf32>
    %792 = vector.broadcast %784 : f32 to vector<8x128xf32>
    %793 = arith.mulf %792, %616 : vector<8x128xf32>
    %794 = arith.addf %791, %793 : vector<8x128xf32>
    %c28 = arith.constant 28 : index
    %795 = memref.load %arg1[%c28] : memref<88xf32, #tpu.memory_space<smem>>
    %c44 = arith.constant 44 : index
    %796 = memref.load %arg1[%c44] : memref<88xf32, #tpu.memory_space<smem>>
    %797 = vector.broadcast %795 : f32 to vector<8x128xf32>
    %798 = arith.mulf %797, %631 : vector<8x128xf32>
    %799 = vector.broadcast %796 : f32 to vector<8x128xf32>
    %800 = arith.mulf %799, %641 : vector<8x128xf32>
    %801 = arith.subf %798, %800 : vector<8x128xf32>
    %802 = vector.broadcast %795 : f32 to vector<8x128xf32>
    %803 = arith.mulf %802, %641 : vector<8x128xf32>
    %804 = vector.broadcast %796 : f32 to vector<8x128xf32>
    %805 = arith.mulf %804, %631 : vector<8x128xf32>
    %806 = arith.addf %803, %805 : vector<8x128xf32>
    %c29 = arith.constant 29 : index
    %807 = memref.load %arg1[%c29] : memref<88xf32, #tpu.memory_space<smem>>
    %c45 = arith.constant 45 : index
    %808 = memref.load %arg1[%c45] : memref<88xf32, #tpu.memory_space<smem>>
    %809 = vector.broadcast %807 : f32 to vector<8x128xf32>
    %810 = arith.mulf %809, %636 : vector<8x128xf32>
    %811 = vector.broadcast %808 : f32 to vector<8x128xf32>
    %812 = arith.mulf %811, %646 : vector<8x128xf32>
    %813 = arith.subf %810, %812 : vector<8x128xf32>
    %814 = vector.broadcast %807 : f32 to vector<8x128xf32>
    %815 = arith.mulf %814, %646 : vector<8x128xf32>
    %816 = vector.broadcast %808 : f32 to vector<8x128xf32>
    %817 = arith.mulf %816, %636 : vector<8x128xf32>
    %818 = arith.addf %815, %817 : vector<8x128xf32>
    %c30 = arith.constant 30 : index
    %819 = memref.load %arg1[%c30] : memref<88xf32, #tpu.memory_space<smem>>
    %c46 = arith.constant 46 : index
    %820 = memref.load %arg1[%c46] : memref<88xf32, #tpu.memory_space<smem>>
    %821 = vector.broadcast %819 : f32 to vector<8x128xf32>
    %822 = arith.mulf %821, %651 : vector<8x128xf32>
    %823 = vector.broadcast %820 : f32 to vector<8x128xf32>
    %824 = arith.mulf %823, %661 : vector<8x128xf32>
    %825 = arith.subf %822, %824 : vector<8x128xf32>
    %826 = vector.broadcast %819 : f32 to vector<8x128xf32>
    %827 = arith.mulf %826, %661 : vector<8x128xf32>
    %828 = vector.broadcast %820 : f32 to vector<8x128xf32>
    %829 = arith.mulf %828, %651 : vector<8x128xf32>
    %830 = arith.addf %827, %829 : vector<8x128xf32>
    %c31 = arith.constant 31 : index
    %831 = memref.load %arg1[%c31] : memref<88xf32, #tpu.memory_space<smem>>
    %c47 = arith.constant 47 : index
    %832 = memref.load %arg1[%c47] : memref<88xf32, #tpu.memory_space<smem>>
    %833 = vector.broadcast %831 : f32 to vector<8x128xf32>
    %834 = arith.mulf %833, %656 : vector<8x128xf32>
    %835 = vector.broadcast %832 : f32 to vector<8x128xf32>
    %836 = arith.mulf %835, %666 : vector<8x128xf32>
    %837 = arith.subf %834, %836 : vector<8x128xf32>
    %838 = vector.broadcast %831 : f32 to vector<8x128xf32>
    %839 = arith.mulf %838, %666 : vector<8x128xf32>
    %840 = vector.broadcast %832 : f32 to vector<8x128xf32>
    %841 = arith.mulf %840, %656 : vector<8x128xf32>
    %842 = arith.addf %839, %841 : vector<8x128xf32>
    %c32 = arith.constant 32 : index
    %843 = memref.load %arg1[%c32] : memref<88xf32, #tpu.memory_space<smem>>
    %c48 = arith.constant 48 : index
    %844 = memref.load %arg1[%c48] : memref<88xf32, #tpu.memory_space<smem>>
    %845 = vector.broadcast %843 : f32 to vector<8x128xf32>
    %846 = arith.mulf %845, %671 : vector<8x128xf32>
    %847 = vector.broadcast %844 : f32 to vector<8x128xf32>
    %848 = arith.mulf %847, %681 : vector<8x128xf32>
    %849 = arith.subf %846, %848 : vector<8x128xf32>
    %850 = vector.broadcast %843 : f32 to vector<8x128xf32>
    %851 = arith.mulf %850, %681 : vector<8x128xf32>
    %852 = vector.broadcast %844 : f32 to vector<8x128xf32>
    %853 = arith.mulf %852, %671 : vector<8x128xf32>
    %854 = arith.addf %851, %853 : vector<8x128xf32>
    %c33 = arith.constant 33 : index
    %855 = memref.load %arg1[%c33] : memref<88xf32, #tpu.memory_space<smem>>
    %c49 = arith.constant 49 : index
    %856 = memref.load %arg1[%c49] : memref<88xf32, #tpu.memory_space<smem>>
    %857 = vector.broadcast %855 : f32 to vector<8x128xf32>
    %858 = arith.mulf %857, %676 : vector<8x128xf32>
    %859 = vector.broadcast %856 : f32 to vector<8x128xf32>
    %860 = arith.mulf %859, %686 : vector<8x128xf32>
    %861 = arith.subf %858, %860 : vector<8x128xf32>
    %862 = vector.broadcast %855 : f32 to vector<8x128xf32>
    %863 = arith.mulf %862, %686 : vector<8x128xf32>
    %864 = vector.broadcast %856 : f32 to vector<8x128xf32>
    %865 = arith.mulf %864, %676 : vector<8x128xf32>
    %866 = arith.addf %863, %865 : vector<8x128xf32>
    %c34 = arith.constant 34 : index
    %867 = memref.load %arg1[%c34] : memref<88xf32, #tpu.memory_space<smem>>
    %c50 = arith.constant 50 : index
    %868 = memref.load %arg1[%c50] : memref<88xf32, #tpu.memory_space<smem>>
    %869 = vector.broadcast %867 : f32 to vector<8x128xf32>
    %870 = arith.mulf %869, %691 : vector<8x128xf32>
    %871 = vector.broadcast %868 : f32 to vector<8x128xf32>
    %872 = arith.mulf %871, %701 : vector<8x128xf32>
    %873 = arith.subf %870, %872 : vector<8x128xf32>
    %874 = vector.broadcast %867 : f32 to vector<8x128xf32>
    %875 = arith.mulf %874, %701 : vector<8x128xf32>
    %876 = vector.broadcast %868 : f32 to vector<8x128xf32>
    %877 = arith.mulf %876, %691 : vector<8x128xf32>
    %878 = arith.addf %875, %877 : vector<8x128xf32>
    %c35 = arith.constant 35 : index
    %879 = memref.load %arg1[%c35] : memref<88xf32, #tpu.memory_space<smem>>
    %c51 = arith.constant 51 : index
    %880 = memref.load %arg1[%c51] : memref<88xf32, #tpu.memory_space<smem>>
    %881 = vector.broadcast %879 : f32 to vector<8x128xf32>
    %882 = arith.mulf %881, %696 : vector<8x128xf32>
    %883 = vector.broadcast %880 : f32 to vector<8x128xf32>
    %884 = arith.mulf %883, %706 : vector<8x128xf32>
    %885 = arith.subf %882, %884 : vector<8x128xf32>
    %886 = vector.broadcast %879 : f32 to vector<8x128xf32>
    %887 = arith.mulf %886, %706 : vector<8x128xf32>
    %888 = vector.broadcast %880 : f32 to vector<8x128xf32>
    %889 = arith.mulf %888, %696 : vector<8x128xf32>
    %890 = arith.addf %887, %889 : vector<8x128xf32>
    %c36 = arith.constant 36 : index
    %891 = memref.load %arg1[%c36] : memref<88xf32, #tpu.memory_space<smem>>
    %c52 = arith.constant 52 : index
    %892 = memref.load %arg1[%c52] : memref<88xf32, #tpu.memory_space<smem>>
    %893 = vector.broadcast %891 : f32 to vector<8x128xf32>
    %894 = arith.mulf %893, %711 : vector<8x128xf32>
    %895 = vector.broadcast %892 : f32 to vector<8x128xf32>
    %896 = arith.mulf %895, %721 : vector<8x128xf32>
    %897 = arith.subf %894, %896 : vector<8x128xf32>
    %898 = vector.broadcast %891 : f32 to vector<8x128xf32>
    %899 = arith.mulf %898, %721 : vector<8x128xf32>
    %900 = vector.broadcast %892 : f32 to vector<8x128xf32>
    %901 = arith.mulf %900, %711 : vector<8x128xf32>
    %902 = arith.addf %899, %901 : vector<8x128xf32>
    %c37 = arith.constant 37 : index
    %903 = memref.load %arg1[%c37] : memref<88xf32, #tpu.memory_space<smem>>
    %c53 = arith.constant 53 : index
    %904 = memref.load %arg1[%c53] : memref<88xf32, #tpu.memory_space<smem>>
    %905 = vector.broadcast %903 : f32 to vector<8x128xf32>
    %906 = arith.mulf %905, %716 : vector<8x128xf32>
    %907 = vector.broadcast %904 : f32 to vector<8x128xf32>
    %908 = arith.mulf %907, %726 : vector<8x128xf32>
    %909 = arith.subf %906, %908 : vector<8x128xf32>
    %910 = vector.broadcast %903 : f32 to vector<8x128xf32>
    %911 = arith.mulf %910, %726 : vector<8x128xf32>
    %912 = vector.broadcast %904 : f32 to vector<8x128xf32>
    %913 = arith.mulf %912, %716 : vector<8x128xf32>
    %914 = arith.addf %911, %913 : vector<8x128xf32>
    %c38 = arith.constant 38 : index
    %915 = memref.load %arg1[%c38] : memref<88xf32, #tpu.memory_space<smem>>
    %c54 = arith.constant 54 : index
    %916 = memref.load %arg1[%c54] : memref<88xf32, #tpu.memory_space<smem>>
    %917 = vector.broadcast %915 : f32 to vector<8x128xf32>
    %918 = arith.mulf %917, %731 : vector<8x128xf32>
    %919 = vector.broadcast %916 : f32 to vector<8x128xf32>
    %920 = arith.mulf %919, %741 : vector<8x128xf32>
    %921 = arith.subf %918, %920 : vector<8x128xf32>
    %922 = vector.broadcast %915 : f32 to vector<8x128xf32>
    %923 = arith.mulf %922, %741 : vector<8x128xf32>
    %924 = vector.broadcast %916 : f32 to vector<8x128xf32>
    %925 = arith.mulf %924, %731 : vector<8x128xf32>
    %926 = arith.addf %923, %925 : vector<8x128xf32>
    %c39 = arith.constant 39 : index
    %927 = memref.load %arg1[%c39] : memref<88xf32, #tpu.memory_space<smem>>
    %c55 = arith.constant 55 : index
    %928 = memref.load %arg1[%c55] : memref<88xf32, #tpu.memory_space<smem>>
    %929 = vector.broadcast %927 : f32 to vector<8x128xf32>
    %930 = arith.mulf %929, %736 : vector<8x128xf32>
    %931 = vector.broadcast %928 : f32 to vector<8x128xf32>
    %932 = arith.mulf %931, %746 : vector<8x128xf32>
    %933 = arith.subf %930, %932 : vector<8x128xf32>
    %934 = vector.broadcast %927 : f32 to vector<8x128xf32>
    %935 = arith.mulf %934, %746 : vector<8x128xf32>
    %936 = vector.broadcast %928 : f32 to vector<8x128xf32>
    %937 = arith.mulf %936, %736 : vector<8x128xf32>
    %938 = arith.addf %935, %937 : vector<8x128xf32>
    %c8 = arith.constant 8 : index
    %939 = memref.load %arg1[%c8] : memref<88xf32, #tpu.memory_space<smem>>
    %c12 = arith.constant 12 : index
    %940 = memref.load %arg1[%c12] : memref<88xf32, #tpu.memory_space<smem>>
    %941 = vector.broadcast %939 : f32 to vector<8x128xf32>
    %942 = arith.mulf %941, %753 : vector<8x128xf32>
    %943 = vector.broadcast %940 : f32 to vector<8x128xf32>
    %944 = arith.mulf %943, %849 : vector<8x128xf32>
    %945 = arith.subf %942, %944 : vector<8x128xf32>
    %946 = vector.broadcast %940 : f32 to vector<8x128xf32>
    %947 = arith.mulf %946, %753 : vector<8x128xf32>
    %948 = vector.broadcast %939 : f32 to vector<8x128xf32>
    %949 = arith.mulf %948, %849 : vector<8x128xf32>
    %950 = arith.addf %947, %949 : vector<8x128xf32>
    %951 = vector.broadcast %939 : f32 to vector<8x128xf32>
    %952 = arith.mulf %951, %758 : vector<8x128xf32>
    %953 = vector.broadcast %940 : f32 to vector<8x128xf32>
    %954 = arith.mulf %953, %854 : vector<8x128xf32>
    %955 = arith.subf %952, %954 : vector<8x128xf32>
    %956 = vector.broadcast %940 : f32 to vector<8x128xf32>
    %957 = arith.mulf %956, %758 : vector<8x128xf32>
    %958 = vector.broadcast %939 : f32 to vector<8x128xf32>
    %959 = arith.mulf %958, %854 : vector<8x128xf32>
    %960 = arith.addf %957, %959 : vector<8x128xf32>
    %961 = vector.broadcast %939 : f32 to vector<8x128xf32>
    %962 = arith.mulf %961, %765 : vector<8x128xf32>
    %963 = vector.broadcast %940 : f32 to vector<8x128xf32>
    %964 = arith.mulf %963, %861 : vector<8x128xf32>
    %965 = arith.subf %962, %964 : vector<8x128xf32>
    %966 = vector.broadcast %940 : f32 to vector<8x128xf32>
    %967 = arith.mulf %966, %765 : vector<8x128xf32>
    %968 = vector.broadcast %939 : f32 to vector<8x128xf32>
    %969 = arith.mulf %968, %861 : vector<8x128xf32>
    %970 = arith.addf %967, %969 : vector<8x128xf32>
    %971 = vector.broadcast %939 : f32 to vector<8x128xf32>
    %972 = arith.mulf %971, %770 : vector<8x128xf32>
    %973 = vector.broadcast %940 : f32 to vector<8x128xf32>
    %974 = arith.mulf %973, %866 : vector<8x128xf32>
    %975 = arith.subf %972, %974 : vector<8x128xf32>
    %976 = vector.broadcast %940 : f32 to vector<8x128xf32>
    %977 = arith.mulf %976, %770 : vector<8x128xf32>
    %978 = vector.broadcast %939 : f32 to vector<8x128xf32>
    %979 = arith.mulf %978, %866 : vector<8x128xf32>
    %980 = arith.addf %977, %979 : vector<8x128xf32>
    %981 = vector.broadcast %939 : f32 to vector<8x128xf32>
    %982 = arith.mulf %981, %777 : vector<8x128xf32>
    %983 = vector.broadcast %940 : f32 to vector<8x128xf32>
    %984 = arith.mulf %983, %873 : vector<8x128xf32>
    %985 = arith.subf %982, %984 : vector<8x128xf32>
    %986 = vector.broadcast %940 : f32 to vector<8x128xf32>
    %987 = arith.mulf %986, %777 : vector<8x128xf32>
    %988 = vector.broadcast %939 : f32 to vector<8x128xf32>
    %989 = arith.mulf %988, %873 : vector<8x128xf32>
    %990 = arith.addf %987, %989 : vector<8x128xf32>
    %991 = vector.broadcast %939 : f32 to vector<8x128xf32>
    %992 = arith.mulf %991, %782 : vector<8x128xf32>
    %993 = vector.broadcast %940 : f32 to vector<8x128xf32>
    %994 = arith.mulf %993, %878 : vector<8x128xf32>
    %995 = arith.subf %992, %994 : vector<8x128xf32>
    %996 = vector.broadcast %940 : f32 to vector<8x128xf32>
    %997 = arith.mulf %996, %782 : vector<8x128xf32>
    %998 = vector.broadcast %939 : f32 to vector<8x128xf32>
    %999 = arith.mulf %998, %878 : vector<8x128xf32>
    %1000 = arith.addf %997, %999 : vector<8x128xf32>
    %1001 = vector.broadcast %939 : f32 to vector<8x128xf32>
    %1002 = arith.mulf %1001, %789 : vector<8x128xf32>
    %1003 = vector.broadcast %940 : f32 to vector<8x128xf32>
    %1004 = arith.mulf %1003, %885 : vector<8x128xf32>
    %1005 = arith.subf %1002, %1004 : vector<8x128xf32>
    %1006 = vector.broadcast %940 : f32 to vector<8x128xf32>
    %1007 = arith.mulf %1006, %789 : vector<8x128xf32>
    %1008 = vector.broadcast %939 : f32 to vector<8x128xf32>
    %1009 = arith.mulf %1008, %885 : vector<8x128xf32>
    %1010 = arith.addf %1007, %1009 : vector<8x128xf32>
    %1011 = vector.broadcast %939 : f32 to vector<8x128xf32>
    %1012 = arith.mulf %1011, %794 : vector<8x128xf32>
    %1013 = vector.broadcast %940 : f32 to vector<8x128xf32>
    %1014 = arith.mulf %1013, %890 : vector<8x128xf32>
    %1015 = arith.subf %1012, %1014 : vector<8x128xf32>
    %1016 = vector.broadcast %940 : f32 to vector<8x128xf32>
    %1017 = arith.mulf %1016, %794 : vector<8x128xf32>
    %1018 = vector.broadcast %939 : f32 to vector<8x128xf32>
    %1019 = arith.mulf %1018, %890 : vector<8x128xf32>
    %1020 = arith.addf %1017, %1019 : vector<8x128xf32>
    %1021 = vector.broadcast %939 : f32 to vector<8x128xf32>
    %1022 = arith.mulf %1021, %801 : vector<8x128xf32>
    %1023 = vector.broadcast %940 : f32 to vector<8x128xf32>
    %1024 = arith.mulf %1023, %897 : vector<8x128xf32>
    %1025 = arith.subf %1022, %1024 : vector<8x128xf32>
    %1026 = vector.broadcast %940 : f32 to vector<8x128xf32>
    %1027 = arith.mulf %1026, %801 : vector<8x128xf32>
    %1028 = vector.broadcast %939 : f32 to vector<8x128xf32>
    %1029 = arith.mulf %1028, %897 : vector<8x128xf32>
    %1030 = arith.addf %1027, %1029 : vector<8x128xf32>
    %1031 = vector.broadcast %939 : f32 to vector<8x128xf32>
    %1032 = arith.mulf %1031, %806 : vector<8x128xf32>
    %1033 = vector.broadcast %940 : f32 to vector<8x128xf32>
    %1034 = arith.mulf %1033, %902 : vector<8x128xf32>
    %1035 = arith.subf %1032, %1034 : vector<8x128xf32>
    %1036 = vector.broadcast %940 : f32 to vector<8x128xf32>
    %1037 = arith.mulf %1036, %806 : vector<8x128xf32>
    %1038 = vector.broadcast %939 : f32 to vector<8x128xf32>
    %1039 = arith.mulf %1038, %902 : vector<8x128xf32>
    %1040 = arith.addf %1037, %1039 : vector<8x128xf32>
    %1041 = vector.broadcast %939 : f32 to vector<8x128xf32>
    %1042 = arith.mulf %1041, %813 : vector<8x128xf32>
    %1043 = vector.broadcast %940 : f32 to vector<8x128xf32>
    %1044 = arith.mulf %1043, %909 : vector<8x128xf32>
    %1045 = arith.subf %1042, %1044 : vector<8x128xf32>
    %1046 = vector.broadcast %940 : f32 to vector<8x128xf32>
    %1047 = arith.mulf %1046, %813 : vector<8x128xf32>
    %1048 = vector.broadcast %939 : f32 to vector<8x128xf32>
    %1049 = arith.mulf %1048, %909 : vector<8x128xf32>
    %1050 = arith.addf %1047, %1049 : vector<8x128xf32>
    %1051 = vector.broadcast %939 : f32 to vector<8x128xf32>
    %1052 = arith.mulf %1051, %818 : vector<8x128xf32>
    %1053 = vector.broadcast %940 : f32 to vector<8x128xf32>
    %1054 = arith.mulf %1053, %914 : vector<8x128xf32>
    %1055 = arith.subf %1052, %1054 : vector<8x128xf32>
    %1056 = vector.broadcast %940 : f32 to vector<8x128xf32>
    %1057 = arith.mulf %1056, %818 : vector<8x128xf32>
    %1058 = vector.broadcast %939 : f32 to vector<8x128xf32>
    %1059 = arith.mulf %1058, %914 : vector<8x128xf32>
    %1060 = arith.addf %1057, %1059 : vector<8x128xf32>
    %1061 = vector.broadcast %939 : f32 to vector<8x128xf32>
    %1062 = arith.mulf %1061, %825 : vector<8x128xf32>
    %1063 = vector.broadcast %940 : f32 to vector<8x128xf32>
    %1064 = arith.mulf %1063, %921 : vector<8x128xf32>
    %1065 = arith.subf %1062, %1064 : vector<8x128xf32>
    %1066 = vector.broadcast %940 : f32 to vector<8x128xf32>
    %1067 = arith.mulf %1066, %825 : vector<8x128xf32>
    %1068 = vector.broadcast %939 : f32 to vector<8x128xf32>
    %1069 = arith.mulf %1068, %921 : vector<8x128xf32>
    %1070 = arith.addf %1067, %1069 : vector<8x128xf32>
    %1071 = vector.broadcast %939 : f32 to vector<8x128xf32>
    %1072 = arith.mulf %1071, %830 : vector<8x128xf32>
    %1073 = vector.broadcast %940 : f32 to vector<8x128xf32>
    %1074 = arith.mulf %1073, %926 : vector<8x128xf32>
    %1075 = arith.subf %1072, %1074 : vector<8x128xf32>
    %1076 = vector.broadcast %940 : f32 to vector<8x128xf32>
    %1077 = arith.mulf %1076, %830 : vector<8x128xf32>
    %1078 = vector.broadcast %939 : f32 to vector<8x128xf32>
    %1079 = arith.mulf %1078, %926 : vector<8x128xf32>
    %1080 = arith.addf %1077, %1079 : vector<8x128xf32>
    %1081 = vector.broadcast %939 : f32 to vector<8x128xf32>
    %1082 = arith.mulf %1081, %837 : vector<8x128xf32>
    %1083 = vector.broadcast %940 : f32 to vector<8x128xf32>
    %1084 = arith.mulf %1083, %933 : vector<8x128xf32>
    %1085 = arith.subf %1082, %1084 : vector<8x128xf32>
    %1086 = vector.broadcast %940 : f32 to vector<8x128xf32>
    %1087 = arith.mulf %1086, %837 : vector<8x128xf32>
    %1088 = vector.broadcast %939 : f32 to vector<8x128xf32>
    %1089 = arith.mulf %1088, %933 : vector<8x128xf32>
    %1090 = arith.addf %1087, %1089 : vector<8x128xf32>
    %1091 = vector.broadcast %939 : f32 to vector<8x128xf32>
    %1092 = arith.mulf %1091, %842 : vector<8x128xf32>
    %1093 = vector.broadcast %940 : f32 to vector<8x128xf32>
    %1094 = arith.mulf %1093, %938 : vector<8x128xf32>
    %1095 = arith.subf %1092, %1094 : vector<8x128xf32>
    %1096 = vector.broadcast %940 : f32 to vector<8x128xf32>
    %1097 = arith.mulf %1096, %842 : vector<8x128xf32>
    %1098 = vector.broadcast %939 : f32 to vector<8x128xf32>
    %1099 = arith.mulf %1098, %938 : vector<8x128xf32>
    %1100 = arith.addf %1097, %1099 : vector<8x128xf32>
    %c9 = arith.constant 9 : index
    %1101 = memref.load %arg1[%c9] : memref<88xf32, #tpu.memory_space<smem>>
    %c13 = arith.constant 13 : index
    %1102 = memref.load %arg1[%c13] : memref<88xf32, #tpu.memory_space<smem>>
    %1103 = vector.broadcast %1101 : f32 to vector<8x128xf32>
    %1104 = arith.mulf %1103, %945 : vector<8x128xf32>
    %1105 = vector.broadcast %1102 : f32 to vector<8x128xf32>
    %1106 = arith.mulf %1105, %1025 : vector<8x128xf32>
    %1107 = arith.subf %1104, %1106 : vector<8x128xf32>
    %1108 = vector.broadcast %1102 : f32 to vector<8x128xf32>
    %1109 = arith.mulf %1108, %945 : vector<8x128xf32>
    %1110 = vector.broadcast %1101 : f32 to vector<8x128xf32>
    %1111 = arith.mulf %1110, %1025 : vector<8x128xf32>
    %1112 = arith.addf %1109, %1111 : vector<8x128xf32>
    %1113 = vector.broadcast %1101 : f32 to vector<8x128xf32>
    %1114 = arith.mulf %1113, %955 : vector<8x128xf32>
    %1115 = vector.broadcast %1102 : f32 to vector<8x128xf32>
    %1116 = arith.mulf %1115, %1035 : vector<8x128xf32>
    %1117 = arith.subf %1114, %1116 : vector<8x128xf32>
    %1118 = vector.broadcast %1102 : f32 to vector<8x128xf32>
    %1119 = arith.mulf %1118, %955 : vector<8x128xf32>
    %1120 = vector.broadcast %1101 : f32 to vector<8x128xf32>
    %1121 = arith.mulf %1120, %1035 : vector<8x128xf32>
    %1122 = arith.addf %1119, %1121 : vector<8x128xf32>
    %1123 = vector.broadcast %1101 : f32 to vector<8x128xf32>
    %1124 = arith.mulf %1123, %965 : vector<8x128xf32>
    %1125 = vector.broadcast %1102 : f32 to vector<8x128xf32>
    %1126 = arith.mulf %1125, %1045 : vector<8x128xf32>
    %1127 = arith.subf %1124, %1126 : vector<8x128xf32>
    %1128 = vector.broadcast %1102 : f32 to vector<8x128xf32>
    %1129 = arith.mulf %1128, %965 : vector<8x128xf32>
    %1130 = vector.broadcast %1101 : f32 to vector<8x128xf32>
    %1131 = arith.mulf %1130, %1045 : vector<8x128xf32>
    %1132 = arith.addf %1129, %1131 : vector<8x128xf32>
    %1133 = vector.broadcast %1101 : f32 to vector<8x128xf32>
    %1134 = arith.mulf %1133, %975 : vector<8x128xf32>
    %1135 = vector.broadcast %1102 : f32 to vector<8x128xf32>
    %1136 = arith.mulf %1135, %1055 : vector<8x128xf32>
    %1137 = arith.subf %1134, %1136 : vector<8x128xf32>
    %1138 = vector.broadcast %1102 : f32 to vector<8x128xf32>
    %1139 = arith.mulf %1138, %975 : vector<8x128xf32>
    %1140 = vector.broadcast %1101 : f32 to vector<8x128xf32>
    %1141 = arith.mulf %1140, %1055 : vector<8x128xf32>
    %1142 = arith.addf %1139, %1141 : vector<8x128xf32>
    %1143 = vector.broadcast %1101 : f32 to vector<8x128xf32>
    %1144 = arith.mulf %1143, %985 : vector<8x128xf32>
    %1145 = vector.broadcast %1102 : f32 to vector<8x128xf32>
    %1146 = arith.mulf %1145, %1065 : vector<8x128xf32>
    %1147 = arith.subf %1144, %1146 : vector<8x128xf32>
    %1148 = vector.broadcast %1102 : f32 to vector<8x128xf32>
    %1149 = arith.mulf %1148, %985 : vector<8x128xf32>
    %1150 = vector.broadcast %1101 : f32 to vector<8x128xf32>
    %1151 = arith.mulf %1150, %1065 : vector<8x128xf32>
    %1152 = arith.addf %1149, %1151 : vector<8x128xf32>
    %1153 = vector.broadcast %1101 : f32 to vector<8x128xf32>
    %1154 = arith.mulf %1153, %995 : vector<8x128xf32>
    %1155 = vector.broadcast %1102 : f32 to vector<8x128xf32>
    %1156 = arith.mulf %1155, %1075 : vector<8x128xf32>
    %1157 = arith.subf %1154, %1156 : vector<8x128xf32>
    %1158 = vector.broadcast %1102 : f32 to vector<8x128xf32>
    %1159 = arith.mulf %1158, %995 : vector<8x128xf32>
    %1160 = vector.broadcast %1101 : f32 to vector<8x128xf32>
    %1161 = arith.mulf %1160, %1075 : vector<8x128xf32>
    %1162 = arith.addf %1159, %1161 : vector<8x128xf32>
    %1163 = vector.broadcast %1101 : f32 to vector<8x128xf32>
    %1164 = arith.mulf %1163, %1005 : vector<8x128xf32>
    %1165 = vector.broadcast %1102 : f32 to vector<8x128xf32>
    %1166 = arith.mulf %1165, %1085 : vector<8x128xf32>
    %1167 = arith.subf %1164, %1166 : vector<8x128xf32>
    %1168 = vector.broadcast %1102 : f32 to vector<8x128xf32>
    %1169 = arith.mulf %1168, %1005 : vector<8x128xf32>
    %1170 = vector.broadcast %1101 : f32 to vector<8x128xf32>
    %1171 = arith.mulf %1170, %1085 : vector<8x128xf32>
    %1172 = arith.addf %1169, %1171 : vector<8x128xf32>
    %1173 = vector.broadcast %1101 : f32 to vector<8x128xf32>
    %1174 = arith.mulf %1173, %1015 : vector<8x128xf32>
    %1175 = vector.broadcast %1102 : f32 to vector<8x128xf32>
    %1176 = arith.mulf %1175, %1095 : vector<8x128xf32>
    %1177 = arith.subf %1174, %1176 : vector<8x128xf32>
    %1178 = vector.broadcast %1102 : f32 to vector<8x128xf32>
    %1179 = arith.mulf %1178, %1015 : vector<8x128xf32>
    %1180 = vector.broadcast %1101 : f32 to vector<8x128xf32>
    %1181 = arith.mulf %1180, %1095 : vector<8x128xf32>
    %1182 = arith.addf %1179, %1181 : vector<8x128xf32>
    %1183 = vector.broadcast %1101 : f32 to vector<8x128xf32>
    %1184 = arith.mulf %1183, %950 : vector<8x128xf32>
    %1185 = vector.broadcast %1102 : f32 to vector<8x128xf32>
    %1186 = arith.mulf %1185, %1030 : vector<8x128xf32>
    %1187 = arith.subf %1184, %1186 : vector<8x128xf32>
    %1188 = vector.broadcast %1102 : f32 to vector<8x128xf32>
    %1189 = arith.mulf %1188, %950 : vector<8x128xf32>
    %1190 = vector.broadcast %1101 : f32 to vector<8x128xf32>
    %1191 = arith.mulf %1190, %1030 : vector<8x128xf32>
    %1192 = arith.addf %1189, %1191 : vector<8x128xf32>
    %1193 = vector.broadcast %1101 : f32 to vector<8x128xf32>
    %1194 = arith.mulf %1193, %960 : vector<8x128xf32>
    %1195 = vector.broadcast %1102 : f32 to vector<8x128xf32>
    %1196 = arith.mulf %1195, %1040 : vector<8x128xf32>
    %1197 = arith.subf %1194, %1196 : vector<8x128xf32>
    %1198 = vector.broadcast %1102 : f32 to vector<8x128xf32>
    %1199 = arith.mulf %1198, %960 : vector<8x128xf32>
    %1200 = vector.broadcast %1101 : f32 to vector<8x128xf32>
    %1201 = arith.mulf %1200, %1040 : vector<8x128xf32>
    %1202 = arith.addf %1199, %1201 : vector<8x128xf32>
    %1203 = vector.broadcast %1101 : f32 to vector<8x128xf32>
    %1204 = arith.mulf %1203, %970 : vector<8x128xf32>
    %1205 = vector.broadcast %1102 : f32 to vector<8x128xf32>
    %1206 = arith.mulf %1205, %1050 : vector<8x128xf32>
    %1207 = arith.subf %1204, %1206 : vector<8x128xf32>
    %1208 = vector.broadcast %1102 : f32 to vector<8x128xf32>
    %1209 = arith.mulf %1208, %970 : vector<8x128xf32>
    %1210 = vector.broadcast %1101 : f32 to vector<8x128xf32>
    %1211 = arith.mulf %1210, %1050 : vector<8x128xf32>
    %1212 = arith.addf %1209, %1211 : vector<8x128xf32>
    %1213 = vector.broadcast %1101 : f32 to vector<8x128xf32>
    %1214 = arith.mulf %1213, %980 : vector<8x128xf32>
    %1215 = vector.broadcast %1102 : f32 to vector<8x128xf32>
    %1216 = arith.mulf %1215, %1060 : vector<8x128xf32>
    %1217 = arith.subf %1214, %1216 : vector<8x128xf32>
    %1218 = vector.broadcast %1102 : f32 to vector<8x128xf32>
    %1219 = arith.mulf %1218, %980 : vector<8x128xf32>
    %1220 = vector.broadcast %1101 : f32 to vector<8x128xf32>
    %1221 = arith.mulf %1220, %1060 : vector<8x128xf32>
    %1222 = arith.addf %1219, %1221 : vector<8x128xf32>
    %1223 = vector.broadcast %1101 : f32 to vector<8x128xf32>
    %1224 = arith.mulf %1223, %990 : vector<8x128xf32>
    %1225 = vector.broadcast %1102 : f32 to vector<8x128xf32>
    %1226 = arith.mulf %1225, %1070 : vector<8x128xf32>
    %1227 = arith.subf %1224, %1226 : vector<8x128xf32>
    %1228 = vector.broadcast %1102 : f32 to vector<8x128xf32>
    %1229 = arith.mulf %1228, %990 : vector<8x128xf32>
    %1230 = vector.broadcast %1101 : f32 to vector<8x128xf32>
    %1231 = arith.mulf %1230, %1070 : vector<8x128xf32>
    %1232 = arith.addf %1229, %1231 : vector<8x128xf32>
    %1233 = vector.broadcast %1101 : f32 to vector<8x128xf32>
    %1234 = arith.mulf %1233, %1000 : vector<8x128xf32>
    %1235 = vector.broadcast %1102 : f32 to vector<8x128xf32>
    %1236 = arith.mulf %1235, %1080 : vector<8x128xf32>
    %1237 = arith.subf %1234, %1236 : vector<8x128xf32>
    %1238 = vector.broadcast %1102 : f32 to vector<8x128xf32>
    %1239 = arith.mulf %1238, %1000 : vector<8x128xf32>
    %1240 = vector.broadcast %1101 : f32 to vector<8x128xf32>
    %1241 = arith.mulf %1240, %1080 : vector<8x128xf32>
    %1242 = arith.addf %1239, %1241 : vector<8x128xf32>
    %1243 = vector.broadcast %1101 : f32 to vector<8x128xf32>
    %1244 = arith.mulf %1243, %1010 : vector<8x128xf32>
    %1245 = vector.broadcast %1102 : f32 to vector<8x128xf32>
    %1246 = arith.mulf %1245, %1090 : vector<8x128xf32>
    %1247 = arith.subf %1244, %1246 : vector<8x128xf32>
    %1248 = vector.broadcast %1102 : f32 to vector<8x128xf32>
    %1249 = arith.mulf %1248, %1010 : vector<8x128xf32>
    %1250 = vector.broadcast %1101 : f32 to vector<8x128xf32>
    %1251 = arith.mulf %1250, %1090 : vector<8x128xf32>
    %1252 = arith.addf %1249, %1251 : vector<8x128xf32>
    %1253 = vector.broadcast %1101 : f32 to vector<8x128xf32>
    %1254 = arith.mulf %1253, %1020 : vector<8x128xf32>
    %1255 = vector.broadcast %1102 : f32 to vector<8x128xf32>
    %1256 = arith.mulf %1255, %1100 : vector<8x128xf32>
    %1257 = arith.subf %1254, %1256 : vector<8x128xf32>
    %1258 = vector.broadcast %1102 : f32 to vector<8x128xf32>
    %1259 = arith.mulf %1258, %1020 : vector<8x128xf32>
    %1260 = vector.broadcast %1101 : f32 to vector<8x128xf32>
    %1261 = arith.mulf %1260, %1100 : vector<8x128xf32>
    %1262 = arith.addf %1259, %1261 : vector<8x128xf32>
    %c10 = arith.constant 10 : index
    %1263 = memref.load %arg1[%c10] : memref<88xf32, #tpu.memory_space<smem>>
    %c14 = arith.constant 14 : index
    %1264 = memref.load %arg1[%c14] : memref<88xf32, #tpu.memory_space<smem>>
    %1265 = vector.broadcast %1263 : f32 to vector<8x128xf32>
    %1266 = arith.mulf %1265, %1107 : vector<8x128xf32>
    %1267 = vector.broadcast %1264 : f32 to vector<8x128xf32>
    %1268 = arith.mulf %1267, %1147 : vector<8x128xf32>
    %1269 = arith.subf %1266, %1268 : vector<8x128xf32>
    %1270 = vector.broadcast %1264 : f32 to vector<8x128xf32>
    %1271 = arith.mulf %1270, %1107 : vector<8x128xf32>
    %1272 = vector.broadcast %1263 : f32 to vector<8x128xf32>
    %1273 = arith.mulf %1272, %1147 : vector<8x128xf32>
    %1274 = arith.addf %1271, %1273 : vector<8x128xf32>
    %1275 = vector.broadcast %1263 : f32 to vector<8x128xf32>
    %1276 = arith.mulf %1275, %1117 : vector<8x128xf32>
    %1277 = vector.broadcast %1264 : f32 to vector<8x128xf32>
    %1278 = arith.mulf %1277, %1157 : vector<8x128xf32>
    %1279 = arith.subf %1276, %1278 : vector<8x128xf32>
    %1280 = vector.broadcast %1264 : f32 to vector<8x128xf32>
    %1281 = arith.mulf %1280, %1117 : vector<8x128xf32>
    %1282 = vector.broadcast %1263 : f32 to vector<8x128xf32>
    %1283 = arith.mulf %1282, %1157 : vector<8x128xf32>
    %1284 = arith.addf %1281, %1283 : vector<8x128xf32>
    %1285 = vector.broadcast %1263 : f32 to vector<8x128xf32>
    %1286 = arith.mulf %1285, %1127 : vector<8x128xf32>
    %1287 = vector.broadcast %1264 : f32 to vector<8x128xf32>
    %1288 = arith.mulf %1287, %1167 : vector<8x128xf32>
    %1289 = arith.subf %1286, %1288 : vector<8x128xf32>
    %1290 = vector.broadcast %1264 : f32 to vector<8x128xf32>
    %1291 = arith.mulf %1290, %1127 : vector<8x128xf32>
    %1292 = vector.broadcast %1263 : f32 to vector<8x128xf32>
    %1293 = arith.mulf %1292, %1167 : vector<8x128xf32>
    %1294 = arith.addf %1291, %1293 : vector<8x128xf32>
    %1295 = vector.broadcast %1263 : f32 to vector<8x128xf32>
    %1296 = arith.mulf %1295, %1137 : vector<8x128xf32>
    %1297 = vector.broadcast %1264 : f32 to vector<8x128xf32>
    %1298 = arith.mulf %1297, %1177 : vector<8x128xf32>
    %1299 = arith.subf %1296, %1298 : vector<8x128xf32>
    %1300 = vector.broadcast %1264 : f32 to vector<8x128xf32>
    %1301 = arith.mulf %1300, %1137 : vector<8x128xf32>
    %1302 = vector.broadcast %1263 : f32 to vector<8x128xf32>
    %1303 = arith.mulf %1302, %1177 : vector<8x128xf32>
    %1304 = arith.addf %1301, %1303 : vector<8x128xf32>
    %1305 = vector.broadcast %1263 : f32 to vector<8x128xf32>
    %1306 = arith.mulf %1305, %1112 : vector<8x128xf32>
    %1307 = vector.broadcast %1264 : f32 to vector<8x128xf32>
    %1308 = arith.mulf %1307, %1152 : vector<8x128xf32>
    %1309 = arith.subf %1306, %1308 : vector<8x128xf32>
    %1310 = vector.broadcast %1264 : f32 to vector<8x128xf32>
    %1311 = arith.mulf %1310, %1112 : vector<8x128xf32>
    %1312 = vector.broadcast %1263 : f32 to vector<8x128xf32>
    %1313 = arith.mulf %1312, %1152 : vector<8x128xf32>
    %1314 = arith.addf %1311, %1313 : vector<8x128xf32>
    %1315 = vector.broadcast %1263 : f32 to vector<8x128xf32>
    %1316 = arith.mulf %1315, %1122 : vector<8x128xf32>
    %1317 = vector.broadcast %1264 : f32 to vector<8x128xf32>
    %1318 = arith.mulf %1317, %1162 : vector<8x128xf32>
    %1319 = arith.subf %1316, %1318 : vector<8x128xf32>
    %1320 = vector.broadcast %1264 : f32 to vector<8x128xf32>
    %1321 = arith.mulf %1320, %1122 : vector<8x128xf32>
    %1322 = vector.broadcast %1263 : f32 to vector<8x128xf32>
    %1323 = arith.mulf %1322, %1162 : vector<8x128xf32>
    %1324 = arith.addf %1321, %1323 : vector<8x128xf32>
    %1325 = vector.broadcast %1263 : f32 to vector<8x128xf32>
    %1326 = arith.mulf %1325, %1132 : vector<8x128xf32>
    %1327 = vector.broadcast %1264 : f32 to vector<8x128xf32>
    %1328 = arith.mulf %1327, %1172 : vector<8x128xf32>
    %1329 = arith.subf %1326, %1328 : vector<8x128xf32>
    %1330 = vector.broadcast %1264 : f32 to vector<8x128xf32>
    %1331 = arith.mulf %1330, %1132 : vector<8x128xf32>
    %1332 = vector.broadcast %1263 : f32 to vector<8x128xf32>
    %1333 = arith.mulf %1332, %1172 : vector<8x128xf32>
    %1334 = arith.addf %1331, %1333 : vector<8x128xf32>
    %1335 = vector.broadcast %1263 : f32 to vector<8x128xf32>
    %1336 = arith.mulf %1335, %1142 : vector<8x128xf32>
    %1337 = vector.broadcast %1264 : f32 to vector<8x128xf32>
    %1338 = arith.mulf %1337, %1182 : vector<8x128xf32>
    %1339 = arith.subf %1336, %1338 : vector<8x128xf32>
    %1340 = vector.broadcast %1264 : f32 to vector<8x128xf32>
    %1341 = arith.mulf %1340, %1142 : vector<8x128xf32>
    %1342 = vector.broadcast %1263 : f32 to vector<8x128xf32>
    %1343 = arith.mulf %1342, %1182 : vector<8x128xf32>
    %1344 = arith.addf %1341, %1343 : vector<8x128xf32>
    %1345 = vector.broadcast %1263 : f32 to vector<8x128xf32>
    %1346 = arith.mulf %1345, %1187 : vector<8x128xf32>
    %1347 = vector.broadcast %1264 : f32 to vector<8x128xf32>
    %1348 = arith.mulf %1347, %1227 : vector<8x128xf32>
    %1349 = arith.subf %1346, %1348 : vector<8x128xf32>
    %1350 = vector.broadcast %1264 : f32 to vector<8x128xf32>
    %1351 = arith.mulf %1350, %1187 : vector<8x128xf32>
    %1352 = vector.broadcast %1263 : f32 to vector<8x128xf32>
    %1353 = arith.mulf %1352, %1227 : vector<8x128xf32>
    %1354 = arith.addf %1351, %1353 : vector<8x128xf32>
    %1355 = vector.broadcast %1263 : f32 to vector<8x128xf32>
    %1356 = arith.mulf %1355, %1197 : vector<8x128xf32>
    %1357 = vector.broadcast %1264 : f32 to vector<8x128xf32>
    %1358 = arith.mulf %1357, %1237 : vector<8x128xf32>
    %1359 = arith.subf %1356, %1358 : vector<8x128xf32>
    %1360 = vector.broadcast %1264 : f32 to vector<8x128xf32>
    %1361 = arith.mulf %1360, %1197 : vector<8x128xf32>
    %1362 = vector.broadcast %1263 : f32 to vector<8x128xf32>
    %1363 = arith.mulf %1362, %1237 : vector<8x128xf32>
    %1364 = arith.addf %1361, %1363 : vector<8x128xf32>
    %1365 = vector.broadcast %1263 : f32 to vector<8x128xf32>
    %1366 = arith.mulf %1365, %1207 : vector<8x128xf32>
    %1367 = vector.broadcast %1264 : f32 to vector<8x128xf32>
    %1368 = arith.mulf %1367, %1247 : vector<8x128xf32>
    %1369 = arith.subf %1366, %1368 : vector<8x128xf32>
    %1370 = vector.broadcast %1264 : f32 to vector<8x128xf32>
    %1371 = arith.mulf %1370, %1207 : vector<8x128xf32>
    %1372 = vector.broadcast %1263 : f32 to vector<8x128xf32>
    %1373 = arith.mulf %1372, %1247 : vector<8x128xf32>
    %1374 = arith.addf %1371, %1373 : vector<8x128xf32>
    %1375 = vector.broadcast %1263 : f32 to vector<8x128xf32>
    %1376 = arith.mulf %1375, %1217 : vector<8x128xf32>
    %1377 = vector.broadcast %1264 : f32 to vector<8x128xf32>
    %1378 = arith.mulf %1377, %1257 : vector<8x128xf32>
    %1379 = arith.subf %1376, %1378 : vector<8x128xf32>
    %1380 = vector.broadcast %1264 : f32 to vector<8x128xf32>
    %1381 = arith.mulf %1380, %1217 : vector<8x128xf32>
    %1382 = vector.broadcast %1263 : f32 to vector<8x128xf32>
    %1383 = arith.mulf %1382, %1257 : vector<8x128xf32>
    %1384 = arith.addf %1381, %1383 : vector<8x128xf32>
    %1385 = vector.broadcast %1263 : f32 to vector<8x128xf32>
    %1386 = arith.mulf %1385, %1192 : vector<8x128xf32>
    %1387 = vector.broadcast %1264 : f32 to vector<8x128xf32>
    %1388 = arith.mulf %1387, %1232 : vector<8x128xf32>
    %1389 = arith.subf %1386, %1388 : vector<8x128xf32>
    %1390 = vector.broadcast %1264 : f32 to vector<8x128xf32>
    %1391 = arith.mulf %1390, %1192 : vector<8x128xf32>
    %1392 = vector.broadcast %1263 : f32 to vector<8x128xf32>
    %1393 = arith.mulf %1392, %1232 : vector<8x128xf32>
    %1394 = arith.addf %1391, %1393 : vector<8x128xf32>
    %1395 = vector.broadcast %1263 : f32 to vector<8x128xf32>
    %1396 = arith.mulf %1395, %1202 : vector<8x128xf32>
    %1397 = vector.broadcast %1264 : f32 to vector<8x128xf32>
    %1398 = arith.mulf %1397, %1242 : vector<8x128xf32>
    %1399 = arith.subf %1396, %1398 : vector<8x128xf32>
    %1400 = vector.broadcast %1264 : f32 to vector<8x128xf32>
    %1401 = arith.mulf %1400, %1202 : vector<8x128xf32>
    %1402 = vector.broadcast %1263 : f32 to vector<8x128xf32>
    %1403 = arith.mulf %1402, %1242 : vector<8x128xf32>
    %1404 = arith.addf %1401, %1403 : vector<8x128xf32>
    %1405 = vector.broadcast %1263 : f32 to vector<8x128xf32>
    %1406 = arith.mulf %1405, %1212 : vector<8x128xf32>
    %1407 = vector.broadcast %1264 : f32 to vector<8x128xf32>
    %1408 = arith.mulf %1407, %1252 : vector<8x128xf32>
    %1409 = arith.subf %1406, %1408 : vector<8x128xf32>
    %1410 = vector.broadcast %1264 : f32 to vector<8x128xf32>
    %1411 = arith.mulf %1410, %1212 : vector<8x128xf32>
    %1412 = vector.broadcast %1263 : f32 to vector<8x128xf32>
    %1413 = arith.mulf %1412, %1252 : vector<8x128xf32>
    %1414 = arith.addf %1411, %1413 : vector<8x128xf32>
    %1415 = vector.broadcast %1263 : f32 to vector<8x128xf32>
    %1416 = arith.mulf %1415, %1222 : vector<8x128xf32>
    %1417 = vector.broadcast %1264 : f32 to vector<8x128xf32>
    %1418 = arith.mulf %1417, %1262 : vector<8x128xf32>
    %1419 = arith.subf %1416, %1418 : vector<8x128xf32>
    %1420 = vector.broadcast %1264 : f32 to vector<8x128xf32>
    %1421 = arith.mulf %1420, %1222 : vector<8x128xf32>
    %1422 = vector.broadcast %1263 : f32 to vector<8x128xf32>
    %1423 = arith.mulf %1422, %1262 : vector<8x128xf32>
    %1424 = arith.addf %1421, %1423 : vector<8x128xf32>
    %c11 = arith.constant 11 : index
    %1425 = memref.load %arg1[%c11] : memref<88xf32, #tpu.memory_space<smem>>
    %c15 = arith.constant 15 : index
    %1426 = memref.load %arg1[%c15] : memref<88xf32, #tpu.memory_space<smem>>
    %1427 = vector.broadcast %1425 : f32 to vector<8x128xf32>
    %1428 = arith.mulf %1427, %1269 : vector<8x128xf32>
    %1429 = vector.broadcast %1426 : f32 to vector<8x128xf32>
    %1430 = arith.mulf %1429, %1289 : vector<8x128xf32>
    %1431 = arith.subf %1428, %1430 : vector<8x128xf32>
    %1432 = vector.broadcast %1426 : f32 to vector<8x128xf32>
    %1433 = arith.mulf %1432, %1269 : vector<8x128xf32>
    %1434 = vector.broadcast %1425 : f32 to vector<8x128xf32>
    %1435 = arith.mulf %1434, %1289 : vector<8x128xf32>
    %1436 = arith.addf %1433, %1435 : vector<8x128xf32>
    %1437 = vector.broadcast %1425 : f32 to vector<8x128xf32>
    %1438 = arith.mulf %1437, %1279 : vector<8x128xf32>
    %1439 = vector.broadcast %1426 : f32 to vector<8x128xf32>
    %1440 = arith.mulf %1439, %1299 : vector<8x128xf32>
    %1441 = arith.subf %1438, %1440 : vector<8x128xf32>
    %1442 = vector.broadcast %1426 : f32 to vector<8x128xf32>
    %1443 = arith.mulf %1442, %1279 : vector<8x128xf32>
    %1444 = vector.broadcast %1425 : f32 to vector<8x128xf32>
    %1445 = arith.mulf %1444, %1299 : vector<8x128xf32>
    %1446 = arith.addf %1443, %1445 : vector<8x128xf32>
    %1447 = vector.broadcast %1425 : f32 to vector<8x128xf32>
    %1448 = arith.mulf %1447, %1274 : vector<8x128xf32>
    %1449 = vector.broadcast %1426 : f32 to vector<8x128xf32>
    %1450 = arith.mulf %1449, %1294 : vector<8x128xf32>
    %1451 = arith.subf %1448, %1450 : vector<8x128xf32>
    %1452 = vector.broadcast %1426 : f32 to vector<8x128xf32>
    %1453 = arith.mulf %1452, %1274 : vector<8x128xf32>
    %1454 = vector.broadcast %1425 : f32 to vector<8x128xf32>
    %1455 = arith.mulf %1454, %1294 : vector<8x128xf32>
    %1456 = arith.addf %1453, %1455 : vector<8x128xf32>
    %1457 = vector.broadcast %1425 : f32 to vector<8x128xf32>
    %1458 = arith.mulf %1457, %1284 : vector<8x128xf32>
    %1459 = vector.broadcast %1426 : f32 to vector<8x128xf32>
    %1460 = arith.mulf %1459, %1304 : vector<8x128xf32>
    %1461 = arith.subf %1458, %1460 : vector<8x128xf32>
    %1462 = vector.broadcast %1426 : f32 to vector<8x128xf32>
    %1463 = arith.mulf %1462, %1284 : vector<8x128xf32>
    %1464 = vector.broadcast %1425 : f32 to vector<8x128xf32>
    %1465 = arith.mulf %1464, %1304 : vector<8x128xf32>
    %1466 = arith.addf %1463, %1465 : vector<8x128xf32>
    %1467 = vector.broadcast %1425 : f32 to vector<8x128xf32>
    %1468 = arith.mulf %1467, %1309 : vector<8x128xf32>
    %1469 = vector.broadcast %1426 : f32 to vector<8x128xf32>
    %1470 = arith.mulf %1469, %1329 : vector<8x128xf32>
    %1471 = arith.subf %1468, %1470 : vector<8x128xf32>
    %1472 = vector.broadcast %1426 : f32 to vector<8x128xf32>
    %1473 = arith.mulf %1472, %1309 : vector<8x128xf32>
    %1474 = vector.broadcast %1425 : f32 to vector<8x128xf32>
    %1475 = arith.mulf %1474, %1329 : vector<8x128xf32>
    %1476 = arith.addf %1473, %1475 : vector<8x128xf32>
    %1477 = vector.broadcast %1425 : f32 to vector<8x128xf32>
    %1478 = arith.mulf %1477, %1319 : vector<8x128xf32>
    %1479 = vector.broadcast %1426 : f32 to vector<8x128xf32>
    %1480 = arith.mulf %1479, %1339 : vector<8x128xf32>
    %1481 = arith.subf %1478, %1480 : vector<8x128xf32>
    %1482 = vector.broadcast %1426 : f32 to vector<8x128xf32>
    %1483 = arith.mulf %1482, %1319 : vector<8x128xf32>
    %1484 = vector.broadcast %1425 : f32 to vector<8x128xf32>
    %1485 = arith.mulf %1484, %1339 : vector<8x128xf32>
    %1486 = arith.addf %1483, %1485 : vector<8x128xf32>
    %1487 = vector.broadcast %1425 : f32 to vector<8x128xf32>
    %1488 = arith.mulf %1487, %1314 : vector<8x128xf32>
    %1489 = vector.broadcast %1426 : f32 to vector<8x128xf32>
    %1490 = arith.mulf %1489, %1334 : vector<8x128xf32>
    %1491 = arith.subf %1488, %1490 : vector<8x128xf32>
    %1492 = vector.broadcast %1426 : f32 to vector<8x128xf32>
    %1493 = arith.mulf %1492, %1314 : vector<8x128xf32>
    %1494 = vector.broadcast %1425 : f32 to vector<8x128xf32>
    %1495 = arith.mulf %1494, %1334 : vector<8x128xf32>
    %1496 = arith.addf %1493, %1495 : vector<8x128xf32>
    %1497 = vector.broadcast %1425 : f32 to vector<8x128xf32>
    %1498 = arith.mulf %1497, %1324 : vector<8x128xf32>
    %1499 = vector.broadcast %1426 : f32 to vector<8x128xf32>
    %1500 = arith.mulf %1499, %1344 : vector<8x128xf32>
    %1501 = arith.subf %1498, %1500 : vector<8x128xf32>
    %1502 = vector.broadcast %1426 : f32 to vector<8x128xf32>
    %1503 = arith.mulf %1502, %1324 : vector<8x128xf32>
    %1504 = vector.broadcast %1425 : f32 to vector<8x128xf32>
    %1505 = arith.mulf %1504, %1344 : vector<8x128xf32>
    %1506 = arith.addf %1503, %1505 : vector<8x128xf32>
    %1507 = vector.broadcast %1425 : f32 to vector<8x128xf32>
    %1508 = arith.mulf %1507, %1349 : vector<8x128xf32>
    %1509 = vector.broadcast %1426 : f32 to vector<8x128xf32>
    %1510 = arith.mulf %1509, %1369 : vector<8x128xf32>
    %1511 = arith.subf %1508, %1510 : vector<8x128xf32>
    %1512 = vector.broadcast %1426 : f32 to vector<8x128xf32>
    %1513 = arith.mulf %1512, %1349 : vector<8x128xf32>
    %1514 = vector.broadcast %1425 : f32 to vector<8x128xf32>
    %1515 = arith.mulf %1514, %1369 : vector<8x128xf32>
    %1516 = arith.addf %1513, %1515 : vector<8x128xf32>
    %1517 = vector.broadcast %1425 : f32 to vector<8x128xf32>
    %1518 = arith.mulf %1517, %1359 : vector<8x128xf32>
    %1519 = vector.broadcast %1426 : f32 to vector<8x128xf32>
    %1520 = arith.mulf %1519, %1379 : vector<8x128xf32>
    %1521 = arith.subf %1518, %1520 : vector<8x128xf32>
    %1522 = vector.broadcast %1426 : f32 to vector<8x128xf32>
    %1523 = arith.mulf %1522, %1359 : vector<8x128xf32>
    %1524 = vector.broadcast %1425 : f32 to vector<8x128xf32>
    %1525 = arith.mulf %1524, %1379 : vector<8x128xf32>
    %1526 = arith.addf %1523, %1525 : vector<8x128xf32>
    %1527 = vector.broadcast %1425 : f32 to vector<8x128xf32>
    %1528 = arith.mulf %1527, %1354 : vector<8x128xf32>
    %1529 = vector.broadcast %1426 : f32 to vector<8x128xf32>
    %1530 = arith.mulf %1529, %1374 : vector<8x128xf32>
    %1531 = arith.subf %1528, %1530 : vector<8x128xf32>
    %1532 = vector.broadcast %1426 : f32 to vector<8x128xf32>
    %1533 = arith.mulf %1532, %1354 : vector<8x128xf32>
    %1534 = vector.broadcast %1425 : f32 to vector<8x128xf32>
    %1535 = arith.mulf %1534, %1374 : vector<8x128xf32>
    %1536 = arith.addf %1533, %1535 : vector<8x128xf32>
    %1537 = vector.broadcast %1425 : f32 to vector<8x128xf32>
    %1538 = arith.mulf %1537, %1364 : vector<8x128xf32>
    %1539 = vector.broadcast %1426 : f32 to vector<8x128xf32>
    %1540 = arith.mulf %1539, %1384 : vector<8x128xf32>
    %1541 = arith.subf %1538, %1540 : vector<8x128xf32>
    %1542 = vector.broadcast %1426 : f32 to vector<8x128xf32>
    %1543 = arith.mulf %1542, %1364 : vector<8x128xf32>
    %1544 = vector.broadcast %1425 : f32 to vector<8x128xf32>
    %1545 = arith.mulf %1544, %1384 : vector<8x128xf32>
    %1546 = arith.addf %1543, %1545 : vector<8x128xf32>
    %1547 = vector.broadcast %1425 : f32 to vector<8x128xf32>
    %1548 = arith.mulf %1547, %1389 : vector<8x128xf32>
    %1549 = vector.broadcast %1426 : f32 to vector<8x128xf32>
    %1550 = arith.mulf %1549, %1409 : vector<8x128xf32>
    %1551 = arith.subf %1548, %1550 : vector<8x128xf32>
    %1552 = vector.broadcast %1426 : f32 to vector<8x128xf32>
    %1553 = arith.mulf %1552, %1389 : vector<8x128xf32>
    %1554 = vector.broadcast %1425 : f32 to vector<8x128xf32>
    %1555 = arith.mulf %1554, %1409 : vector<8x128xf32>
    %1556 = arith.addf %1553, %1555 : vector<8x128xf32>
    %1557 = vector.broadcast %1425 : f32 to vector<8x128xf32>
    %1558 = arith.mulf %1557, %1399 : vector<8x128xf32>
    %1559 = vector.broadcast %1426 : f32 to vector<8x128xf32>
    %1560 = arith.mulf %1559, %1419 : vector<8x128xf32>
    %1561 = arith.subf %1558, %1560 : vector<8x128xf32>
    %1562 = vector.broadcast %1426 : f32 to vector<8x128xf32>
    %1563 = arith.mulf %1562, %1399 : vector<8x128xf32>
    %1564 = vector.broadcast %1425 : f32 to vector<8x128xf32>
    %1565 = arith.mulf %1564, %1419 : vector<8x128xf32>
    %1566 = arith.addf %1563, %1565 : vector<8x128xf32>
    %1567 = vector.broadcast %1425 : f32 to vector<8x128xf32>
    %1568 = arith.mulf %1567, %1394 : vector<8x128xf32>
    %1569 = vector.broadcast %1426 : f32 to vector<8x128xf32>
    %1570 = arith.mulf %1569, %1414 : vector<8x128xf32>
    %1571 = arith.subf %1568, %1570 : vector<8x128xf32>
    %1572 = vector.broadcast %1426 : f32 to vector<8x128xf32>
    %1573 = arith.mulf %1572, %1394 : vector<8x128xf32>
    %1574 = vector.broadcast %1425 : f32 to vector<8x128xf32>
    %1575 = arith.mulf %1574, %1414 : vector<8x128xf32>
    %1576 = arith.addf %1573, %1575 : vector<8x128xf32>
    %1577 = vector.broadcast %1425 : f32 to vector<8x128xf32>
    %1578 = arith.mulf %1577, %1404 : vector<8x128xf32>
    %1579 = vector.broadcast %1426 : f32 to vector<8x128xf32>
    %1580 = arith.mulf %1579, %1424 : vector<8x128xf32>
    %1581 = arith.subf %1578, %1580 : vector<8x128xf32>
    %1582 = vector.broadcast %1426 : f32 to vector<8x128xf32>
    %1583 = arith.mulf %1582, %1404 : vector<8x128xf32>
    %1584 = vector.broadcast %1425 : f32 to vector<8x128xf32>
    %1585 = arith.mulf %1584, %1424 : vector<8x128xf32>
    %1586 = arith.addf %1583, %1585 : vector<8x128xf32>
    %c56 = arith.constant 56 : index
    %1587 = memref.load %arg1[%c56] : memref<88xf32, #tpu.memory_space<smem>>
    %c72 = arith.constant 72 : index
    %1588 = memref.load %arg1[%c72] : memref<88xf32, #tpu.memory_space<smem>>
    %1589 = vector.broadcast %1587 : f32 to vector<8x128xf32>
    %1590 = arith.mulf %1589, %1431 : vector<8x128xf32>
    %1591 = vector.broadcast %1588 : f32 to vector<8x128xf32>
    %1592 = arith.mulf %1591, %1441 : vector<8x128xf32>
    %1593 = arith.subf %1590, %1592 : vector<8x128xf32>
    %1594 = vector.broadcast %1587 : f32 to vector<8x128xf32>
    %1595 = arith.mulf %1594, %1441 : vector<8x128xf32>
    %1596 = vector.broadcast %1588 : f32 to vector<8x128xf32>
    %1597 = arith.mulf %1596, %1431 : vector<8x128xf32>
    %1598 = arith.addf %1595, %1597 : vector<8x128xf32>
    %c57 = arith.constant 57 : index
    %1599 = memref.load %arg1[%c57] : memref<88xf32, #tpu.memory_space<smem>>
    %c73 = arith.constant 73 : index
    %1600 = memref.load %arg1[%c73] : memref<88xf32, #tpu.memory_space<smem>>
    %1601 = vector.broadcast %1599 : f32 to vector<8x128xf32>
    %1602 = arith.mulf %1601, %1436 : vector<8x128xf32>
    %1603 = vector.broadcast %1600 : f32 to vector<8x128xf32>
    %1604 = arith.mulf %1603, %1446 : vector<8x128xf32>
    %1605 = arith.subf %1602, %1604 : vector<8x128xf32>
    %1606 = vector.broadcast %1599 : f32 to vector<8x128xf32>
    %1607 = arith.mulf %1606, %1446 : vector<8x128xf32>
    %1608 = vector.broadcast %1600 : f32 to vector<8x128xf32>
    %1609 = arith.mulf %1608, %1436 : vector<8x128xf32>
    %1610 = arith.addf %1607, %1609 : vector<8x128xf32>
    %c58 = arith.constant 58 : index
    %1611 = memref.load %arg1[%c58] : memref<88xf32, #tpu.memory_space<smem>>
    %c74 = arith.constant 74 : index
    %1612 = memref.load %arg1[%c74] : memref<88xf32, #tpu.memory_space<smem>>
    %1613 = vector.broadcast %1611 : f32 to vector<8x128xf32>
    %1614 = arith.mulf %1613, %1451 : vector<8x128xf32>
    %1615 = vector.broadcast %1612 : f32 to vector<8x128xf32>
    %1616 = arith.mulf %1615, %1461 : vector<8x128xf32>
    %1617 = arith.subf %1614, %1616 : vector<8x128xf32>
    %1618 = vector.broadcast %1611 : f32 to vector<8x128xf32>
    %1619 = arith.mulf %1618, %1461 : vector<8x128xf32>
    %1620 = vector.broadcast %1612 : f32 to vector<8x128xf32>
    %1621 = arith.mulf %1620, %1451 : vector<8x128xf32>
    %1622 = arith.addf %1619, %1621 : vector<8x128xf32>
    %c59 = arith.constant 59 : index
    %1623 = memref.load %arg1[%c59] : memref<88xf32, #tpu.memory_space<smem>>
    %c75 = arith.constant 75 : index
    %1624 = memref.load %arg1[%c75] : memref<88xf32, #tpu.memory_space<smem>>
    %1625 = vector.broadcast %1623 : f32 to vector<8x128xf32>
    %1626 = arith.mulf %1625, %1456 : vector<8x128xf32>
    %1627 = vector.broadcast %1624 : f32 to vector<8x128xf32>
    %1628 = arith.mulf %1627, %1466 : vector<8x128xf32>
    %1629 = arith.subf %1626, %1628 : vector<8x128xf32>
    %1630 = vector.broadcast %1623 : f32 to vector<8x128xf32>
    %1631 = arith.mulf %1630, %1466 : vector<8x128xf32>
    %1632 = vector.broadcast %1624 : f32 to vector<8x128xf32>
    %1633 = arith.mulf %1632, %1456 : vector<8x128xf32>
    %1634 = arith.addf %1631, %1633 : vector<8x128xf32>
    %c60 = arith.constant 60 : index
    %1635 = memref.load %arg1[%c60] : memref<88xf32, #tpu.memory_space<smem>>
    %c76 = arith.constant 76 : index
    %1636 = memref.load %arg1[%c76] : memref<88xf32, #tpu.memory_space<smem>>
    %1637 = vector.broadcast %1635 : f32 to vector<8x128xf32>
    %1638 = arith.mulf %1637, %1471 : vector<8x128xf32>
    %1639 = vector.broadcast %1636 : f32 to vector<8x128xf32>
    %1640 = arith.mulf %1639, %1481 : vector<8x128xf32>
    %1641 = arith.subf %1638, %1640 : vector<8x128xf32>
    %1642 = vector.broadcast %1635 : f32 to vector<8x128xf32>
    %1643 = arith.mulf %1642, %1481 : vector<8x128xf32>
    %1644 = vector.broadcast %1636 : f32 to vector<8x128xf32>
    %1645 = arith.mulf %1644, %1471 : vector<8x128xf32>
    %1646 = arith.addf %1643, %1645 : vector<8x128xf32>
    %c61 = arith.constant 61 : index
    %1647 = memref.load %arg1[%c61] : memref<88xf32, #tpu.memory_space<smem>>
    %c77 = arith.constant 77 : index
    %1648 = memref.load %arg1[%c77] : memref<88xf32, #tpu.memory_space<smem>>
    %1649 = vector.broadcast %1647 : f32 to vector<8x128xf32>
    %1650 = arith.mulf %1649, %1476 : vector<8x128xf32>
    %1651 = vector.broadcast %1648 : f32 to vector<8x128xf32>
    %1652 = arith.mulf %1651, %1486 : vector<8x128xf32>
    %1653 = arith.subf %1650, %1652 : vector<8x128xf32>
    %1654 = vector.broadcast %1647 : f32 to vector<8x128xf32>
    %1655 = arith.mulf %1654, %1486 : vector<8x128xf32>
    %1656 = vector.broadcast %1648 : f32 to vector<8x128xf32>
    %1657 = arith.mulf %1656, %1476 : vector<8x128xf32>
    %1658 = arith.addf %1655, %1657 : vector<8x128xf32>
    %c62 = arith.constant 62 : index
    %1659 = memref.load %arg1[%c62] : memref<88xf32, #tpu.memory_space<smem>>
    %c78 = arith.constant 78 : index
    %1660 = memref.load %arg1[%c78] : memref<88xf32, #tpu.memory_space<smem>>
    %1661 = vector.broadcast %1659 : f32 to vector<8x128xf32>
    %1662 = arith.mulf %1661, %1491 : vector<8x128xf32>
    %1663 = vector.broadcast %1660 : f32 to vector<8x128xf32>
    %1664 = arith.mulf %1663, %1501 : vector<8x128xf32>
    %1665 = arith.subf %1662, %1664 : vector<8x128xf32>
    %1666 = vector.broadcast %1659 : f32 to vector<8x128xf32>
    %1667 = arith.mulf %1666, %1501 : vector<8x128xf32>
    %1668 = vector.broadcast %1660 : f32 to vector<8x128xf32>
    %1669 = arith.mulf %1668, %1491 : vector<8x128xf32>
    %1670 = arith.addf %1667, %1669 : vector<8x128xf32>
    %c63 = arith.constant 63 : index
    %1671 = memref.load %arg1[%c63] : memref<88xf32, #tpu.memory_space<smem>>
    %c79 = arith.constant 79 : index
    %1672 = memref.load %arg1[%c79] : memref<88xf32, #tpu.memory_space<smem>>
    %1673 = vector.broadcast %1671 : f32 to vector<8x128xf32>
    %1674 = arith.mulf %1673, %1496 : vector<8x128xf32>
    %1675 = vector.broadcast %1672 : f32 to vector<8x128xf32>
    %1676 = arith.mulf %1675, %1506 : vector<8x128xf32>
    %1677 = arith.subf %1674, %1676 : vector<8x128xf32>
    %1678 = vector.broadcast %1671 : f32 to vector<8x128xf32>
    %1679 = arith.mulf %1678, %1506 : vector<8x128xf32>
    %1680 = vector.broadcast %1672 : f32 to vector<8x128xf32>
    %1681 = arith.mulf %1680, %1496 : vector<8x128xf32>
    %1682 = arith.addf %1679, %1681 : vector<8x128xf32>
    %c64 = arith.constant 64 : index
    %1683 = memref.load %arg1[%c64] : memref<88xf32, #tpu.memory_space<smem>>
    %c80 = arith.constant 80 : index
    %1684 = memref.load %arg1[%c80] : memref<88xf32, #tpu.memory_space<smem>>
    %1685 = vector.broadcast %1683 : f32 to vector<8x128xf32>
    %1686 = arith.mulf %1685, %1511 : vector<8x128xf32>
    %1687 = vector.broadcast %1684 : f32 to vector<8x128xf32>
    %1688 = arith.mulf %1687, %1521 : vector<8x128xf32>
    %1689 = arith.subf %1686, %1688 : vector<8x128xf32>
    %1690 = vector.broadcast %1683 : f32 to vector<8x128xf32>
    %1691 = arith.mulf %1690, %1521 : vector<8x128xf32>
    %1692 = vector.broadcast %1684 : f32 to vector<8x128xf32>
    %1693 = arith.mulf %1692, %1511 : vector<8x128xf32>
    %1694 = arith.addf %1691, %1693 : vector<8x128xf32>
    %c65 = arith.constant 65 : index
    %1695 = memref.load %arg1[%c65] : memref<88xf32, #tpu.memory_space<smem>>
    %c81 = arith.constant 81 : index
    %1696 = memref.load %arg1[%c81] : memref<88xf32, #tpu.memory_space<smem>>
    %1697 = vector.broadcast %1695 : f32 to vector<8x128xf32>
    %1698 = arith.mulf %1697, %1516 : vector<8x128xf32>
    %1699 = vector.broadcast %1696 : f32 to vector<8x128xf32>
    %1700 = arith.mulf %1699, %1526 : vector<8x128xf32>
    %1701 = arith.subf %1698, %1700 : vector<8x128xf32>
    %1702 = vector.broadcast %1695 : f32 to vector<8x128xf32>
    %1703 = arith.mulf %1702, %1526 : vector<8x128xf32>
    %1704 = vector.broadcast %1696 : f32 to vector<8x128xf32>
    %1705 = arith.mulf %1704, %1516 : vector<8x128xf32>
    %1706 = arith.addf %1703, %1705 : vector<8x128xf32>
    %c66 = arith.constant 66 : index
    %1707 = memref.load %arg1[%c66] : memref<88xf32, #tpu.memory_space<smem>>
    %c82 = arith.constant 82 : index
    %1708 = memref.load %arg1[%c82] : memref<88xf32, #tpu.memory_space<smem>>
    %1709 = vector.broadcast %1707 : f32 to vector<8x128xf32>
    %1710 = arith.mulf %1709, %1531 : vector<8x128xf32>
    %1711 = vector.broadcast %1708 : f32 to vector<8x128xf32>
    %1712 = arith.mulf %1711, %1541 : vector<8x128xf32>
    %1713 = arith.subf %1710, %1712 : vector<8x128xf32>
    %1714 = vector.broadcast %1707 : f32 to vector<8x128xf32>
    %1715 = arith.mulf %1714, %1541 : vector<8x128xf32>
    %1716 = vector.broadcast %1708 : f32 to vector<8x128xf32>
    %1717 = arith.mulf %1716, %1531 : vector<8x128xf32>
    %1718 = arith.addf %1715, %1717 : vector<8x128xf32>
    %c67 = arith.constant 67 : index
    %1719 = memref.load %arg1[%c67] : memref<88xf32, #tpu.memory_space<smem>>
    %c83 = arith.constant 83 : index
    %1720 = memref.load %arg1[%c83] : memref<88xf32, #tpu.memory_space<smem>>
    %1721 = vector.broadcast %1719 : f32 to vector<8x128xf32>
    %1722 = arith.mulf %1721, %1536 : vector<8x128xf32>
    %1723 = vector.broadcast %1720 : f32 to vector<8x128xf32>
    %1724 = arith.mulf %1723, %1546 : vector<8x128xf32>
    %1725 = arith.subf %1722, %1724 : vector<8x128xf32>
    %1726 = vector.broadcast %1719 : f32 to vector<8x128xf32>
    %1727 = arith.mulf %1726, %1546 : vector<8x128xf32>
    %1728 = vector.broadcast %1720 : f32 to vector<8x128xf32>
    %1729 = arith.mulf %1728, %1536 : vector<8x128xf32>
    %1730 = arith.addf %1727, %1729 : vector<8x128xf32>
    %c68 = arith.constant 68 : index
    %1731 = memref.load %arg1[%c68] : memref<88xf32, #tpu.memory_space<smem>>
    %c84 = arith.constant 84 : index
    %1732 = memref.load %arg1[%c84] : memref<88xf32, #tpu.memory_space<smem>>
    %1733 = vector.broadcast %1731 : f32 to vector<8x128xf32>
    %1734 = arith.mulf %1733, %1551 : vector<8x128xf32>
    %1735 = vector.broadcast %1732 : f32 to vector<8x128xf32>
    %1736 = arith.mulf %1735, %1561 : vector<8x128xf32>
    %1737 = arith.subf %1734, %1736 : vector<8x128xf32>
    %1738 = vector.broadcast %1731 : f32 to vector<8x128xf32>
    %1739 = arith.mulf %1738, %1561 : vector<8x128xf32>
    %1740 = vector.broadcast %1732 : f32 to vector<8x128xf32>
    %1741 = arith.mulf %1740, %1551 : vector<8x128xf32>
    %1742 = arith.addf %1739, %1741 : vector<8x128xf32>
    %c69 = arith.constant 69 : index
    %1743 = memref.load %arg1[%c69] : memref<88xf32, #tpu.memory_space<smem>>
    %c85 = arith.constant 85 : index
    %1744 = memref.load %arg1[%c85] : memref<88xf32, #tpu.memory_space<smem>>
    %1745 = vector.broadcast %1743 : f32 to vector<8x128xf32>
    %1746 = arith.mulf %1745, %1556 : vector<8x128xf32>
    %1747 = vector.broadcast %1744 : f32 to vector<8x128xf32>
    %1748 = arith.mulf %1747, %1566 : vector<8x128xf32>
    %1749 = arith.subf %1746, %1748 : vector<8x128xf32>
    %1750 = vector.broadcast %1743 : f32 to vector<8x128xf32>
    %1751 = arith.mulf %1750, %1566 : vector<8x128xf32>
    %1752 = vector.broadcast %1744 : f32 to vector<8x128xf32>
    %1753 = arith.mulf %1752, %1556 : vector<8x128xf32>
    %1754 = arith.addf %1751, %1753 : vector<8x128xf32>
    %c70 = arith.constant 70 : index
    %1755 = memref.load %arg1[%c70] : memref<88xf32, #tpu.memory_space<smem>>
    %c86 = arith.constant 86 : index
    %1756 = memref.load %arg1[%c86] : memref<88xf32, #tpu.memory_space<smem>>
    %1757 = vector.broadcast %1755 : f32 to vector<8x128xf32>
    %1758 = arith.mulf %1757, %1571 : vector<8x128xf32>
    %1759 = vector.broadcast %1756 : f32 to vector<8x128xf32>
    %1760 = arith.mulf %1759, %1581 : vector<8x128xf32>
    %1761 = arith.subf %1758, %1760 : vector<8x128xf32>
    %1762 = vector.broadcast %1755 : f32 to vector<8x128xf32>
    %1763 = arith.mulf %1762, %1581 : vector<8x128xf32>
    %1764 = vector.broadcast %1756 : f32 to vector<8x128xf32>
    %1765 = arith.mulf %1764, %1571 : vector<8x128xf32>
    %1766 = arith.addf %1763, %1765 : vector<8x128xf32>
    %c71 = arith.constant 71 : index
    %1767 = memref.load %arg1[%c71] : memref<88xf32, #tpu.memory_space<smem>>
    %c87 = arith.constant 87 : index
    %1768 = memref.load %arg1[%c87] : memref<88xf32, #tpu.memory_space<smem>>
    %1769 = vector.broadcast %1767 : f32 to vector<8x128xf32>
    %1770 = arith.mulf %1769, %1576 : vector<8x128xf32>
    %1771 = vector.broadcast %1768 : f32 to vector<8x128xf32>
    %1772 = arith.mulf %1771, %1586 : vector<8x128xf32>
    %1773 = arith.subf %1770, %1772 : vector<8x128xf32>
    %1774 = vector.broadcast %1767 : f32 to vector<8x128xf32>
    %1775 = arith.mulf %1774, %1586 : vector<8x128xf32>
    %1776 = vector.broadcast %1768 : f32 to vector<8x128xf32>
    %1777 = arith.mulf %1776, %1576 : vector<8x128xf32>
    %1778 = arith.addf %1775, %1777 : vector<8x128xf32>
    %c16 = arith.constant 16 : index
    %1779 = memref.load %arg1[%c16] : memref<88xf32, #tpu.memory_space<smem>>
    %c20 = arith.constant 20 : index
    %1780 = memref.load %arg1[%c20] : memref<88xf32, #tpu.memory_space<smem>>
    %1781 = vector.broadcast %1779 : f32 to vector<8x128xf32>
    %1782 = arith.mulf %1781, %1593 : vector<8x128xf32>
    %1783 = vector.broadcast %1780 : f32 to vector<8x128xf32>
    %1784 = arith.mulf %1783, %1689 : vector<8x128xf32>
    %1785 = arith.subf %1782, %1784 : vector<8x128xf32>
    %1786 = vector.broadcast %1780 : f32 to vector<8x128xf32>
    %1787 = arith.mulf %1786, %1593 : vector<8x128xf32>
    %1788 = vector.broadcast %1779 : f32 to vector<8x128xf32>
    %1789 = arith.mulf %1788, %1689 : vector<8x128xf32>
    %1790 = arith.addf %1787, %1789 : vector<8x128xf32>
    %1791 = vector.broadcast %1779 : f32 to vector<8x128xf32>
    %1792 = arith.mulf %1791, %1598 : vector<8x128xf32>
    %1793 = vector.broadcast %1780 : f32 to vector<8x128xf32>
    %1794 = arith.mulf %1793, %1694 : vector<8x128xf32>
    %1795 = arith.subf %1792, %1794 : vector<8x128xf32>
    %1796 = vector.broadcast %1780 : f32 to vector<8x128xf32>
    %1797 = arith.mulf %1796, %1598 : vector<8x128xf32>
    %1798 = vector.broadcast %1779 : f32 to vector<8x128xf32>
    %1799 = arith.mulf %1798, %1694 : vector<8x128xf32>
    %1800 = arith.addf %1797, %1799 : vector<8x128xf32>
    %1801 = vector.broadcast %1779 : f32 to vector<8x128xf32>
    %1802 = arith.mulf %1801, %1605 : vector<8x128xf32>
    %1803 = vector.broadcast %1780 : f32 to vector<8x128xf32>
    %1804 = arith.mulf %1803, %1701 : vector<8x128xf32>
    %1805 = arith.subf %1802, %1804 : vector<8x128xf32>
    %1806 = vector.broadcast %1780 : f32 to vector<8x128xf32>
    %1807 = arith.mulf %1806, %1605 : vector<8x128xf32>
    %1808 = vector.broadcast %1779 : f32 to vector<8x128xf32>
    %1809 = arith.mulf %1808, %1701 : vector<8x128xf32>
    %1810 = arith.addf %1807, %1809 : vector<8x128xf32>
    %1811 = vector.broadcast %1779 : f32 to vector<8x128xf32>
    %1812 = arith.mulf %1811, %1610 : vector<8x128xf32>
    %1813 = vector.broadcast %1780 : f32 to vector<8x128xf32>
    %1814 = arith.mulf %1813, %1706 : vector<8x128xf32>
    %1815 = arith.subf %1812, %1814 : vector<8x128xf32>
    %1816 = vector.broadcast %1780 : f32 to vector<8x128xf32>
    %1817 = arith.mulf %1816, %1610 : vector<8x128xf32>
    %1818 = vector.broadcast %1779 : f32 to vector<8x128xf32>
    %1819 = arith.mulf %1818, %1706 : vector<8x128xf32>
    %1820 = arith.addf %1817, %1819 : vector<8x128xf32>
    %1821 = vector.broadcast %1779 : f32 to vector<8x128xf32>
    %1822 = arith.mulf %1821, %1617 : vector<8x128xf32>
    %1823 = vector.broadcast %1780 : f32 to vector<8x128xf32>
    %1824 = arith.mulf %1823, %1713 : vector<8x128xf32>
    %1825 = arith.subf %1822, %1824 : vector<8x128xf32>
    %1826 = vector.broadcast %1780 : f32 to vector<8x128xf32>
    %1827 = arith.mulf %1826, %1617 : vector<8x128xf32>
    %1828 = vector.broadcast %1779 : f32 to vector<8x128xf32>
    %1829 = arith.mulf %1828, %1713 : vector<8x128xf32>
    %1830 = arith.addf %1827, %1829 : vector<8x128xf32>
    %1831 = vector.broadcast %1779 : f32 to vector<8x128xf32>
    %1832 = arith.mulf %1831, %1622 : vector<8x128xf32>
    %1833 = vector.broadcast %1780 : f32 to vector<8x128xf32>
    %1834 = arith.mulf %1833, %1718 : vector<8x128xf32>
    %1835 = arith.subf %1832, %1834 : vector<8x128xf32>
    %1836 = vector.broadcast %1780 : f32 to vector<8x128xf32>
    %1837 = arith.mulf %1836, %1622 : vector<8x128xf32>
    %1838 = vector.broadcast %1779 : f32 to vector<8x128xf32>
    %1839 = arith.mulf %1838, %1718 : vector<8x128xf32>
    %1840 = arith.addf %1837, %1839 : vector<8x128xf32>
    %1841 = vector.broadcast %1779 : f32 to vector<8x128xf32>
    %1842 = arith.mulf %1841, %1629 : vector<8x128xf32>
    %1843 = vector.broadcast %1780 : f32 to vector<8x128xf32>
    %1844 = arith.mulf %1843, %1725 : vector<8x128xf32>
    %1845 = arith.subf %1842, %1844 : vector<8x128xf32>
    %1846 = vector.broadcast %1780 : f32 to vector<8x128xf32>
    %1847 = arith.mulf %1846, %1629 : vector<8x128xf32>
    %1848 = vector.broadcast %1779 : f32 to vector<8x128xf32>
    %1849 = arith.mulf %1848, %1725 : vector<8x128xf32>
    %1850 = arith.addf %1847, %1849 : vector<8x128xf32>
    %1851 = vector.broadcast %1779 : f32 to vector<8x128xf32>
    %1852 = arith.mulf %1851, %1634 : vector<8x128xf32>
    %1853 = vector.broadcast %1780 : f32 to vector<8x128xf32>
    %1854 = arith.mulf %1853, %1730 : vector<8x128xf32>
    %1855 = arith.subf %1852, %1854 : vector<8x128xf32>
    %1856 = vector.broadcast %1780 : f32 to vector<8x128xf32>
    %1857 = arith.mulf %1856, %1634 : vector<8x128xf32>
    %1858 = vector.broadcast %1779 : f32 to vector<8x128xf32>
    %1859 = arith.mulf %1858, %1730 : vector<8x128xf32>
    %1860 = arith.addf %1857, %1859 : vector<8x128xf32>
    %1861 = vector.broadcast %1779 : f32 to vector<8x128xf32>
    %1862 = arith.mulf %1861, %1641 : vector<8x128xf32>
    %1863 = vector.broadcast %1780 : f32 to vector<8x128xf32>
    %1864 = arith.mulf %1863, %1737 : vector<8x128xf32>
    %1865 = arith.subf %1862, %1864 : vector<8x128xf32>
    %1866 = vector.broadcast %1780 : f32 to vector<8x128xf32>
    %1867 = arith.mulf %1866, %1641 : vector<8x128xf32>
    %1868 = vector.broadcast %1779 : f32 to vector<8x128xf32>
    %1869 = arith.mulf %1868, %1737 : vector<8x128xf32>
    %1870 = arith.addf %1867, %1869 : vector<8x128xf32>
    %1871 = vector.broadcast %1779 : f32 to vector<8x128xf32>
    %1872 = arith.mulf %1871, %1646 : vector<8x128xf32>
    %1873 = vector.broadcast %1780 : f32 to vector<8x128xf32>
    %1874 = arith.mulf %1873, %1742 : vector<8x128xf32>
    %1875 = arith.subf %1872, %1874 : vector<8x128xf32>
    %1876 = vector.broadcast %1780 : f32 to vector<8x128xf32>
    %1877 = arith.mulf %1876, %1646 : vector<8x128xf32>
    %1878 = vector.broadcast %1779 : f32 to vector<8x128xf32>
    %1879 = arith.mulf %1878, %1742 : vector<8x128xf32>
    %1880 = arith.addf %1877, %1879 : vector<8x128xf32>
    %1881 = vector.broadcast %1779 : f32 to vector<8x128xf32>
    %1882 = arith.mulf %1881, %1653 : vector<8x128xf32>
    %1883 = vector.broadcast %1780 : f32 to vector<8x128xf32>
    %1884 = arith.mulf %1883, %1749 : vector<8x128xf32>
    %1885 = arith.subf %1882, %1884 : vector<8x128xf32>
    %1886 = vector.broadcast %1780 : f32 to vector<8x128xf32>
    %1887 = arith.mulf %1886, %1653 : vector<8x128xf32>
    %1888 = vector.broadcast %1779 : f32 to vector<8x128xf32>
    %1889 = arith.mulf %1888, %1749 : vector<8x128xf32>
    %1890 = arith.addf %1887, %1889 : vector<8x128xf32>
    %1891 = vector.broadcast %1779 : f32 to vector<8x128xf32>
    %1892 = arith.mulf %1891, %1658 : vector<8x128xf32>
    %1893 = vector.broadcast %1780 : f32 to vector<8x128xf32>
    %1894 = arith.mulf %1893, %1754 : vector<8x128xf32>
    %1895 = arith.subf %1892, %1894 : vector<8x128xf32>
    %1896 = vector.broadcast %1780 : f32 to vector<8x128xf32>
    %1897 = arith.mulf %1896, %1658 : vector<8x128xf32>
    %1898 = vector.broadcast %1779 : f32 to vector<8x128xf32>
    %1899 = arith.mulf %1898, %1754 : vector<8x128xf32>
    %1900 = arith.addf %1897, %1899 : vector<8x128xf32>
    %1901 = vector.broadcast %1779 : f32 to vector<8x128xf32>
    %1902 = arith.mulf %1901, %1665 : vector<8x128xf32>
    %1903 = vector.broadcast %1780 : f32 to vector<8x128xf32>
    %1904 = arith.mulf %1903, %1761 : vector<8x128xf32>
    %1905 = arith.subf %1902, %1904 : vector<8x128xf32>
    %1906 = vector.broadcast %1780 : f32 to vector<8x128xf32>
    %1907 = arith.mulf %1906, %1665 : vector<8x128xf32>
    %1908 = vector.broadcast %1779 : f32 to vector<8x128xf32>
    %1909 = arith.mulf %1908, %1761 : vector<8x128xf32>
    %1910 = arith.addf %1907, %1909 : vector<8x128xf32>
    %1911 = vector.broadcast %1779 : f32 to vector<8x128xf32>
    %1912 = arith.mulf %1911, %1670 : vector<8x128xf32>
    %1913 = vector.broadcast %1780 : f32 to vector<8x128xf32>
    %1914 = arith.mulf %1913, %1766 : vector<8x128xf32>
    %1915 = arith.subf %1912, %1914 : vector<8x128xf32>
    %1916 = vector.broadcast %1780 : f32 to vector<8x128xf32>
    %1917 = arith.mulf %1916, %1670 : vector<8x128xf32>
    %1918 = vector.broadcast %1779 : f32 to vector<8x128xf32>
    %1919 = arith.mulf %1918, %1766 : vector<8x128xf32>
    %1920 = arith.addf %1917, %1919 : vector<8x128xf32>
    %1921 = vector.broadcast %1779 : f32 to vector<8x128xf32>
    %1922 = arith.mulf %1921, %1677 : vector<8x128xf32>
    %1923 = vector.broadcast %1780 : f32 to vector<8x128xf32>
    %1924 = arith.mulf %1923, %1773 : vector<8x128xf32>
    %1925 = arith.subf %1922, %1924 : vector<8x128xf32>
    %1926 = vector.broadcast %1780 : f32 to vector<8x128xf32>
    %1927 = arith.mulf %1926, %1677 : vector<8x128xf32>
    %1928 = vector.broadcast %1779 : f32 to vector<8x128xf32>
    %1929 = arith.mulf %1928, %1773 : vector<8x128xf32>
    %1930 = arith.addf %1927, %1929 : vector<8x128xf32>
    %1931 = vector.broadcast %1779 : f32 to vector<8x128xf32>
    %1932 = arith.mulf %1931, %1682 : vector<8x128xf32>
    %1933 = vector.broadcast %1780 : f32 to vector<8x128xf32>
    %1934 = arith.mulf %1933, %1778 : vector<8x128xf32>
    %1935 = arith.subf %1932, %1934 : vector<8x128xf32>
    %1936 = vector.broadcast %1780 : f32 to vector<8x128xf32>
    %1937 = arith.mulf %1936, %1682 : vector<8x128xf32>
    %1938 = vector.broadcast %1779 : f32 to vector<8x128xf32>
    %1939 = arith.mulf %1938, %1778 : vector<8x128xf32>
    %1940 = arith.addf %1937, %1939 : vector<8x128xf32>
    %c17 = arith.constant 17 : index
    %1941 = memref.load %arg1[%c17] : memref<88xf32, #tpu.memory_space<smem>>
    %c21 = arith.constant 21 : index
    %1942 = memref.load %arg1[%c21] : memref<88xf32, #tpu.memory_space<smem>>
    %1943 = vector.broadcast %1941 : f32 to vector<8x128xf32>
    %1944 = arith.mulf %1943, %1785 : vector<8x128xf32>
    %1945 = vector.broadcast %1942 : f32 to vector<8x128xf32>
    %1946 = arith.mulf %1945, %1865 : vector<8x128xf32>
    %1947 = arith.subf %1944, %1946 : vector<8x128xf32>
    %1948 = vector.broadcast %1942 : f32 to vector<8x128xf32>
    %1949 = arith.mulf %1948, %1785 : vector<8x128xf32>
    %1950 = vector.broadcast %1941 : f32 to vector<8x128xf32>
    %1951 = arith.mulf %1950, %1865 : vector<8x128xf32>
    %1952 = arith.addf %1949, %1951 : vector<8x128xf32>
    %1953 = vector.broadcast %1941 : f32 to vector<8x128xf32>
    %1954 = arith.mulf %1953, %1795 : vector<8x128xf32>
    %1955 = vector.broadcast %1942 : f32 to vector<8x128xf32>
    %1956 = arith.mulf %1955, %1875 : vector<8x128xf32>
    %1957 = arith.subf %1954, %1956 : vector<8x128xf32>
    %1958 = vector.broadcast %1942 : f32 to vector<8x128xf32>
    %1959 = arith.mulf %1958, %1795 : vector<8x128xf32>
    %1960 = vector.broadcast %1941 : f32 to vector<8x128xf32>
    %1961 = arith.mulf %1960, %1875 : vector<8x128xf32>
    %1962 = arith.addf %1959, %1961 : vector<8x128xf32>
    %1963 = vector.broadcast %1941 : f32 to vector<8x128xf32>
    %1964 = arith.mulf %1963, %1805 : vector<8x128xf32>
    %1965 = vector.broadcast %1942 : f32 to vector<8x128xf32>
    %1966 = arith.mulf %1965, %1885 : vector<8x128xf32>
    %1967 = arith.subf %1964, %1966 : vector<8x128xf32>
    %1968 = vector.broadcast %1942 : f32 to vector<8x128xf32>
    %1969 = arith.mulf %1968, %1805 : vector<8x128xf32>
    %1970 = vector.broadcast %1941 : f32 to vector<8x128xf32>
    %1971 = arith.mulf %1970, %1885 : vector<8x128xf32>
    %1972 = arith.addf %1969, %1971 : vector<8x128xf32>
    %1973 = vector.broadcast %1941 : f32 to vector<8x128xf32>
    %1974 = arith.mulf %1973, %1815 : vector<8x128xf32>
    %1975 = vector.broadcast %1942 : f32 to vector<8x128xf32>
    %1976 = arith.mulf %1975, %1895 : vector<8x128xf32>
    %1977 = arith.subf %1974, %1976 : vector<8x128xf32>
    %1978 = vector.broadcast %1942 : f32 to vector<8x128xf32>
    %1979 = arith.mulf %1978, %1815 : vector<8x128xf32>
    %1980 = vector.broadcast %1941 : f32 to vector<8x128xf32>
    %1981 = arith.mulf %1980, %1895 : vector<8x128xf32>
    %1982 = arith.addf %1979, %1981 : vector<8x128xf32>
    %1983 = vector.broadcast %1941 : f32 to vector<8x128xf32>
    %1984 = arith.mulf %1983, %1825 : vector<8x128xf32>
    %1985 = vector.broadcast %1942 : f32 to vector<8x128xf32>
    %1986 = arith.mulf %1985, %1905 : vector<8x128xf32>
    %1987 = arith.subf %1984, %1986 : vector<8x128xf32>
    %1988 = vector.broadcast %1942 : f32 to vector<8x128xf32>
    %1989 = arith.mulf %1988, %1825 : vector<8x128xf32>
    %1990 = vector.broadcast %1941 : f32 to vector<8x128xf32>
    %1991 = arith.mulf %1990, %1905 : vector<8x128xf32>
    %1992 = arith.addf %1989, %1991 : vector<8x128xf32>
    %1993 = vector.broadcast %1941 : f32 to vector<8x128xf32>
    %1994 = arith.mulf %1993, %1835 : vector<8x128xf32>
    %1995 = vector.broadcast %1942 : f32 to vector<8x128xf32>
    %1996 = arith.mulf %1995, %1915 : vector<8x128xf32>
    %1997 = arith.subf %1994, %1996 : vector<8x128xf32>
    %1998 = vector.broadcast %1942 : f32 to vector<8x128xf32>
    %1999 = arith.mulf %1998, %1835 : vector<8x128xf32>
    %2000 = vector.broadcast %1941 : f32 to vector<8x128xf32>
    %2001 = arith.mulf %2000, %1915 : vector<8x128xf32>
    %2002 = arith.addf %1999, %2001 : vector<8x128xf32>
    %2003 = vector.broadcast %1941 : f32 to vector<8x128xf32>
    %2004 = arith.mulf %2003, %1845 : vector<8x128xf32>
    %2005 = vector.broadcast %1942 : f32 to vector<8x128xf32>
    %2006 = arith.mulf %2005, %1925 : vector<8x128xf32>
    %2007 = arith.subf %2004, %2006 : vector<8x128xf32>
    %2008 = vector.broadcast %1942 : f32 to vector<8x128xf32>
    %2009 = arith.mulf %2008, %1845 : vector<8x128xf32>
    %2010 = vector.broadcast %1941 : f32 to vector<8x128xf32>
    %2011 = arith.mulf %2010, %1925 : vector<8x128xf32>
    %2012 = arith.addf %2009, %2011 : vector<8x128xf32>
    %2013 = vector.broadcast %1941 : f32 to vector<8x128xf32>
    %2014 = arith.mulf %2013, %1855 : vector<8x128xf32>
    %2015 = vector.broadcast %1942 : f32 to vector<8x128xf32>
    %2016 = arith.mulf %2015, %1935 : vector<8x128xf32>
    %2017 = arith.subf %2014, %2016 : vector<8x128xf32>
    %2018 = vector.broadcast %1942 : f32 to vector<8x128xf32>
    %2019 = arith.mulf %2018, %1855 : vector<8x128xf32>
    %2020 = vector.broadcast %1941 : f32 to vector<8x128xf32>
    %2021 = arith.mulf %2020, %1935 : vector<8x128xf32>
    %2022 = arith.addf %2019, %2021 : vector<8x128xf32>
    %2023 = vector.broadcast %1941 : f32 to vector<8x128xf32>
    %2024 = arith.mulf %2023, %1790 : vector<8x128xf32>
    %2025 = vector.broadcast %1942 : f32 to vector<8x128xf32>
    %2026 = arith.mulf %2025, %1870 : vector<8x128xf32>
    %2027 = arith.subf %2024, %2026 : vector<8x128xf32>
    %2028 = vector.broadcast %1942 : f32 to vector<8x128xf32>
    %2029 = arith.mulf %2028, %1790 : vector<8x128xf32>
    %2030 = vector.broadcast %1941 : f32 to vector<8x128xf32>
    %2031 = arith.mulf %2030, %1870 : vector<8x128xf32>
    %2032 = arith.addf %2029, %2031 : vector<8x128xf32>
    %2033 = vector.broadcast %1941 : f32 to vector<8x128xf32>
    %2034 = arith.mulf %2033, %1800 : vector<8x128xf32>
    %2035 = vector.broadcast %1942 : f32 to vector<8x128xf32>
    %2036 = arith.mulf %2035, %1880 : vector<8x128xf32>
    %2037 = arith.subf %2034, %2036 : vector<8x128xf32>
    %2038 = vector.broadcast %1942 : f32 to vector<8x128xf32>
    %2039 = arith.mulf %2038, %1800 : vector<8x128xf32>
    %2040 = vector.broadcast %1941 : f32 to vector<8x128xf32>
    %2041 = arith.mulf %2040, %1880 : vector<8x128xf32>
    %2042 = arith.addf %2039, %2041 : vector<8x128xf32>
    %2043 = vector.broadcast %1941 : f32 to vector<8x128xf32>
    %2044 = arith.mulf %2043, %1810 : vector<8x128xf32>
    %2045 = vector.broadcast %1942 : f32 to vector<8x128xf32>
    %2046 = arith.mulf %2045, %1890 : vector<8x128xf32>
    %2047 = arith.subf %2044, %2046 : vector<8x128xf32>
    %2048 = vector.broadcast %1942 : f32 to vector<8x128xf32>
    %2049 = arith.mulf %2048, %1810 : vector<8x128xf32>
    %2050 = vector.broadcast %1941 : f32 to vector<8x128xf32>
    %2051 = arith.mulf %2050, %1890 : vector<8x128xf32>
    %2052 = arith.addf %2049, %2051 : vector<8x128xf32>
    %2053 = vector.broadcast %1941 : f32 to vector<8x128xf32>
    %2054 = arith.mulf %2053, %1820 : vector<8x128xf32>
    %2055 = vector.broadcast %1942 : f32 to vector<8x128xf32>
    %2056 = arith.mulf %2055, %1900 : vector<8x128xf32>
    %2057 = arith.subf %2054, %2056 : vector<8x128xf32>
    %2058 = vector.broadcast %1942 : f32 to vector<8x128xf32>
    %2059 = arith.mulf %2058, %1820 : vector<8x128xf32>
    %2060 = vector.broadcast %1941 : f32 to vector<8x128xf32>
    %2061 = arith.mulf %2060, %1900 : vector<8x128xf32>
    %2062 = arith.addf %2059, %2061 : vector<8x128xf32>
    %2063 = vector.broadcast %1941 : f32 to vector<8x128xf32>
    %2064 = arith.mulf %2063, %1830 : vector<8x128xf32>
    %2065 = vector.broadcast %1942 : f32 to vector<8x128xf32>
    %2066 = arith.mulf %2065, %1910 : vector<8x128xf32>
    %2067 = arith.subf %2064, %2066 : vector<8x128xf32>
    %2068 = vector.broadcast %1942 : f32 to vector<8x128xf32>
    %2069 = arith.mulf %2068, %1830 : vector<8x128xf32>
    %2070 = vector.broadcast %1941 : f32 to vector<8x128xf32>
    %2071 = arith.mulf %2070, %1910 : vector<8x128xf32>
    %2072 = arith.addf %2069, %2071 : vector<8x128xf32>
    %2073 = vector.broadcast %1941 : f32 to vector<8x128xf32>
    %2074 = arith.mulf %2073, %1840 : vector<8x128xf32>
    %2075 = vector.broadcast %1942 : f32 to vector<8x128xf32>
    %2076 = arith.mulf %2075, %1920 : vector<8x128xf32>
    %2077 = arith.subf %2074, %2076 : vector<8x128xf32>
    %2078 = vector.broadcast %1942 : f32 to vector<8x128xf32>
    %2079 = arith.mulf %2078, %1840 : vector<8x128xf32>
    %2080 = vector.broadcast %1941 : f32 to vector<8x128xf32>
    %2081 = arith.mulf %2080, %1920 : vector<8x128xf32>
    %2082 = arith.addf %2079, %2081 : vector<8x128xf32>
    %2083 = vector.broadcast %1941 : f32 to vector<8x128xf32>
    %2084 = arith.mulf %2083, %1850 : vector<8x128xf32>
    %2085 = vector.broadcast %1942 : f32 to vector<8x128xf32>
    %2086 = arith.mulf %2085, %1930 : vector<8x128xf32>
    %2087 = arith.subf %2084, %2086 : vector<8x128xf32>
    %2088 = vector.broadcast %1942 : f32 to vector<8x128xf32>
    %2089 = arith.mulf %2088, %1850 : vector<8x128xf32>
    %2090 = vector.broadcast %1941 : f32 to vector<8x128xf32>
    %2091 = arith.mulf %2090, %1930 : vector<8x128xf32>
    %2092 = arith.addf %2089, %2091 : vector<8x128xf32>
    %2093 = vector.broadcast %1941 : f32 to vector<8x128xf32>
    %2094 = arith.mulf %2093, %1860 : vector<8x128xf32>
    %2095 = vector.broadcast %1942 : f32 to vector<8x128xf32>
    %2096 = arith.mulf %2095, %1940 : vector<8x128xf32>
    %2097 = arith.subf %2094, %2096 : vector<8x128xf32>
    %2098 = vector.broadcast %1942 : f32 to vector<8x128xf32>
    %2099 = arith.mulf %2098, %1860 : vector<8x128xf32>
    %2100 = vector.broadcast %1941 : f32 to vector<8x128xf32>
    %2101 = arith.mulf %2100, %1940 : vector<8x128xf32>
    %2102 = arith.addf %2099, %2101 : vector<8x128xf32>
    %c18 = arith.constant 18 : index
    %2103 = memref.load %arg1[%c18] : memref<88xf32, #tpu.memory_space<smem>>
    %c22 = arith.constant 22 : index
    %2104 = memref.load %arg1[%c22] : memref<88xf32, #tpu.memory_space<smem>>
    %2105 = vector.broadcast %2103 : f32 to vector<8x128xf32>
    %2106 = arith.mulf %2105, %1947 : vector<8x128xf32>
    %2107 = vector.broadcast %2104 : f32 to vector<8x128xf32>
    %2108 = arith.mulf %2107, %1987 : vector<8x128xf32>
    %2109 = arith.subf %2106, %2108 : vector<8x128xf32>
    %2110 = vector.broadcast %2104 : f32 to vector<8x128xf32>
    %2111 = arith.mulf %2110, %1947 : vector<8x128xf32>
    %2112 = vector.broadcast %2103 : f32 to vector<8x128xf32>
    %2113 = arith.mulf %2112, %1987 : vector<8x128xf32>
    %2114 = arith.addf %2111, %2113 : vector<8x128xf32>
    %2115 = vector.broadcast %2103 : f32 to vector<8x128xf32>
    %2116 = arith.mulf %2115, %1957 : vector<8x128xf32>
    %2117 = vector.broadcast %2104 : f32 to vector<8x128xf32>
    %2118 = arith.mulf %2117, %1997 : vector<8x128xf32>
    %2119 = arith.subf %2116, %2118 : vector<8x128xf32>
    %2120 = vector.broadcast %2104 : f32 to vector<8x128xf32>
    %2121 = arith.mulf %2120, %1957 : vector<8x128xf32>
    %2122 = vector.broadcast %2103 : f32 to vector<8x128xf32>
    %2123 = arith.mulf %2122, %1997 : vector<8x128xf32>
    %2124 = arith.addf %2121, %2123 : vector<8x128xf32>
    %2125 = vector.broadcast %2103 : f32 to vector<8x128xf32>
    %2126 = arith.mulf %2125, %1967 : vector<8x128xf32>
    %2127 = vector.broadcast %2104 : f32 to vector<8x128xf32>
    %2128 = arith.mulf %2127, %2007 : vector<8x128xf32>
    %2129 = arith.subf %2126, %2128 : vector<8x128xf32>
    %2130 = vector.broadcast %2104 : f32 to vector<8x128xf32>
    %2131 = arith.mulf %2130, %1967 : vector<8x128xf32>
    %2132 = vector.broadcast %2103 : f32 to vector<8x128xf32>
    %2133 = arith.mulf %2132, %2007 : vector<8x128xf32>
    %2134 = arith.addf %2131, %2133 : vector<8x128xf32>
    %2135 = vector.broadcast %2103 : f32 to vector<8x128xf32>
    %2136 = arith.mulf %2135, %1977 : vector<8x128xf32>
    %2137 = vector.broadcast %2104 : f32 to vector<8x128xf32>
    %2138 = arith.mulf %2137, %2017 : vector<8x128xf32>
    %2139 = arith.subf %2136, %2138 : vector<8x128xf32>
    %2140 = vector.broadcast %2104 : f32 to vector<8x128xf32>
    %2141 = arith.mulf %2140, %1977 : vector<8x128xf32>
    %2142 = vector.broadcast %2103 : f32 to vector<8x128xf32>
    %2143 = arith.mulf %2142, %2017 : vector<8x128xf32>
    %2144 = arith.addf %2141, %2143 : vector<8x128xf32>
    %2145 = vector.broadcast %2103 : f32 to vector<8x128xf32>
    %2146 = arith.mulf %2145, %1952 : vector<8x128xf32>
    %2147 = vector.broadcast %2104 : f32 to vector<8x128xf32>
    %2148 = arith.mulf %2147, %1992 : vector<8x128xf32>
    %2149 = arith.subf %2146, %2148 : vector<8x128xf32>
    %2150 = vector.broadcast %2104 : f32 to vector<8x128xf32>
    %2151 = arith.mulf %2150, %1952 : vector<8x128xf32>
    %2152 = vector.broadcast %2103 : f32 to vector<8x128xf32>
    %2153 = arith.mulf %2152, %1992 : vector<8x128xf32>
    %2154 = arith.addf %2151, %2153 : vector<8x128xf32>
    %2155 = vector.broadcast %2103 : f32 to vector<8x128xf32>
    %2156 = arith.mulf %2155, %1962 : vector<8x128xf32>
    %2157 = vector.broadcast %2104 : f32 to vector<8x128xf32>
    %2158 = arith.mulf %2157, %2002 : vector<8x128xf32>
    %2159 = arith.subf %2156, %2158 : vector<8x128xf32>
    %2160 = vector.broadcast %2104 : f32 to vector<8x128xf32>
    %2161 = arith.mulf %2160, %1962 : vector<8x128xf32>
    %2162 = vector.broadcast %2103 : f32 to vector<8x128xf32>
    %2163 = arith.mulf %2162, %2002 : vector<8x128xf32>
    %2164 = arith.addf %2161, %2163 : vector<8x128xf32>
    %2165 = vector.broadcast %2103 : f32 to vector<8x128xf32>
    %2166 = arith.mulf %2165, %1972 : vector<8x128xf32>
    %2167 = vector.broadcast %2104 : f32 to vector<8x128xf32>
    %2168 = arith.mulf %2167, %2012 : vector<8x128xf32>
    %2169 = arith.subf %2166, %2168 : vector<8x128xf32>
    %2170 = vector.broadcast %2104 : f32 to vector<8x128xf32>
    %2171 = arith.mulf %2170, %1972 : vector<8x128xf32>
    %2172 = vector.broadcast %2103 : f32 to vector<8x128xf32>
    %2173 = arith.mulf %2172, %2012 : vector<8x128xf32>
    %2174 = arith.addf %2171, %2173 : vector<8x128xf32>
    %2175 = vector.broadcast %2103 : f32 to vector<8x128xf32>
    %2176 = arith.mulf %2175, %1982 : vector<8x128xf32>
    %2177 = vector.broadcast %2104 : f32 to vector<8x128xf32>
    %2178 = arith.mulf %2177, %2022 : vector<8x128xf32>
    %2179 = arith.subf %2176, %2178 : vector<8x128xf32>
    %2180 = vector.broadcast %2104 : f32 to vector<8x128xf32>
    %2181 = arith.mulf %2180, %1982 : vector<8x128xf32>
    %2182 = vector.broadcast %2103 : f32 to vector<8x128xf32>
    %2183 = arith.mulf %2182, %2022 : vector<8x128xf32>
    %2184 = arith.addf %2181, %2183 : vector<8x128xf32>
    %2185 = vector.broadcast %2103 : f32 to vector<8x128xf32>
    %2186 = arith.mulf %2185, %2027 : vector<8x128xf32>
    %2187 = vector.broadcast %2104 : f32 to vector<8x128xf32>
    %2188 = arith.mulf %2187, %2067 : vector<8x128xf32>
    %2189 = arith.subf %2186, %2188 : vector<8x128xf32>
    %2190 = vector.broadcast %2104 : f32 to vector<8x128xf32>
    %2191 = arith.mulf %2190, %2027 : vector<8x128xf32>
    %2192 = vector.broadcast %2103 : f32 to vector<8x128xf32>
    %2193 = arith.mulf %2192, %2067 : vector<8x128xf32>
    %2194 = arith.addf %2191, %2193 : vector<8x128xf32>
    %2195 = vector.broadcast %2103 : f32 to vector<8x128xf32>
    %2196 = arith.mulf %2195, %2037 : vector<8x128xf32>
    %2197 = vector.broadcast %2104 : f32 to vector<8x128xf32>
    %2198 = arith.mulf %2197, %2077 : vector<8x128xf32>
    %2199 = arith.subf %2196, %2198 : vector<8x128xf32>
    %2200 = vector.broadcast %2104 : f32 to vector<8x128xf32>
    %2201 = arith.mulf %2200, %2037 : vector<8x128xf32>
    %2202 = vector.broadcast %2103 : f32 to vector<8x128xf32>
    %2203 = arith.mulf %2202, %2077 : vector<8x128xf32>
    %2204 = arith.addf %2201, %2203 : vector<8x128xf32>
    %2205 = vector.broadcast %2103 : f32 to vector<8x128xf32>
    %2206 = arith.mulf %2205, %2047 : vector<8x128xf32>
    %2207 = vector.broadcast %2104 : f32 to vector<8x128xf32>
    %2208 = arith.mulf %2207, %2087 : vector<8x128xf32>
    %2209 = arith.subf %2206, %2208 : vector<8x128xf32>
    %2210 = vector.broadcast %2104 : f32 to vector<8x128xf32>
    %2211 = arith.mulf %2210, %2047 : vector<8x128xf32>
    %2212 = vector.broadcast %2103 : f32 to vector<8x128xf32>
    %2213 = arith.mulf %2212, %2087 : vector<8x128xf32>
    %2214 = arith.addf %2211, %2213 : vector<8x128xf32>
    %2215 = vector.broadcast %2103 : f32 to vector<8x128xf32>
    %2216 = arith.mulf %2215, %2057 : vector<8x128xf32>
    %2217 = vector.broadcast %2104 : f32 to vector<8x128xf32>
    %2218 = arith.mulf %2217, %2097 : vector<8x128xf32>
    %2219 = arith.subf %2216, %2218 : vector<8x128xf32>
    %2220 = vector.broadcast %2104 : f32 to vector<8x128xf32>
    %2221 = arith.mulf %2220, %2057 : vector<8x128xf32>
    %2222 = vector.broadcast %2103 : f32 to vector<8x128xf32>
    %2223 = arith.mulf %2222, %2097 : vector<8x128xf32>
    %2224 = arith.addf %2221, %2223 : vector<8x128xf32>
    %2225 = vector.broadcast %2103 : f32 to vector<8x128xf32>
    %2226 = arith.mulf %2225, %2032 : vector<8x128xf32>
    %2227 = vector.broadcast %2104 : f32 to vector<8x128xf32>
    %2228 = arith.mulf %2227, %2072 : vector<8x128xf32>
    %2229 = arith.subf %2226, %2228 : vector<8x128xf32>
    %2230 = vector.broadcast %2104 : f32 to vector<8x128xf32>
    %2231 = arith.mulf %2230, %2032 : vector<8x128xf32>
    %2232 = vector.broadcast %2103 : f32 to vector<8x128xf32>
    %2233 = arith.mulf %2232, %2072 : vector<8x128xf32>
    %2234 = arith.addf %2231, %2233 : vector<8x128xf32>
    %2235 = vector.broadcast %2103 : f32 to vector<8x128xf32>
    %2236 = arith.mulf %2235, %2042 : vector<8x128xf32>
    %2237 = vector.broadcast %2104 : f32 to vector<8x128xf32>
    %2238 = arith.mulf %2237, %2082 : vector<8x128xf32>
    %2239 = arith.subf %2236, %2238 : vector<8x128xf32>
    %2240 = vector.broadcast %2104 : f32 to vector<8x128xf32>
    %2241 = arith.mulf %2240, %2042 : vector<8x128xf32>
    %2242 = vector.broadcast %2103 : f32 to vector<8x128xf32>
    %2243 = arith.mulf %2242, %2082 : vector<8x128xf32>
    %2244 = arith.addf %2241, %2243 : vector<8x128xf32>
    %2245 = vector.broadcast %2103 : f32 to vector<8x128xf32>
    %2246 = arith.mulf %2245, %2052 : vector<8x128xf32>
    %2247 = vector.broadcast %2104 : f32 to vector<8x128xf32>
    %2248 = arith.mulf %2247, %2092 : vector<8x128xf32>
    %2249 = arith.subf %2246, %2248 : vector<8x128xf32>
    %2250 = vector.broadcast %2104 : f32 to vector<8x128xf32>
    %2251 = arith.mulf %2250, %2052 : vector<8x128xf32>
    %2252 = vector.broadcast %2103 : f32 to vector<8x128xf32>
    %2253 = arith.mulf %2252, %2092 : vector<8x128xf32>
    %2254 = arith.addf %2251, %2253 : vector<8x128xf32>
    %2255 = vector.broadcast %2103 : f32 to vector<8x128xf32>
    %2256 = arith.mulf %2255, %2062 : vector<8x128xf32>
    %2257 = vector.broadcast %2104 : f32 to vector<8x128xf32>
    %2258 = arith.mulf %2257, %2102 : vector<8x128xf32>
    %2259 = arith.subf %2256, %2258 : vector<8x128xf32>
    %2260 = vector.broadcast %2104 : f32 to vector<8x128xf32>
    %2261 = arith.mulf %2260, %2062 : vector<8x128xf32>
    %2262 = vector.broadcast %2103 : f32 to vector<8x128xf32>
    %2263 = arith.mulf %2262, %2102 : vector<8x128xf32>
    %2264 = arith.addf %2261, %2263 : vector<8x128xf32>
    %c19 = arith.constant 19 : index
    %2265 = memref.load %arg1[%c19] : memref<88xf32, #tpu.memory_space<smem>>
    %c23 = arith.constant 23 : index
    %2266 = memref.load %arg1[%c23] : memref<88xf32, #tpu.memory_space<smem>>
    %2267 = vector.broadcast %2265 : f32 to vector<8x128xf32>
    %2268 = arith.mulf %2267, %2109 : vector<8x128xf32>
    %2269 = vector.broadcast %2266 : f32 to vector<8x128xf32>
    %2270 = arith.mulf %2269, %2129 : vector<8x128xf32>
    %2271 = arith.subf %2268, %2270 : vector<8x128xf32>
    %2272 = vector.broadcast %2266 : f32 to vector<8x128xf32>
    %2273 = arith.mulf %2272, %2109 : vector<8x128xf32>
    %2274 = vector.broadcast %2265 : f32 to vector<8x128xf32>
    %2275 = arith.mulf %2274, %2129 : vector<8x128xf32>
    %2276 = arith.addf %2273, %2275 : vector<8x128xf32>
    %2277 = vector.broadcast %2265 : f32 to vector<8x128xf32>
    %2278 = arith.mulf %2277, %2119 : vector<8x128xf32>
    %2279 = vector.broadcast %2266 : f32 to vector<8x128xf32>
    %2280 = arith.mulf %2279, %2139 : vector<8x128xf32>
    %2281 = arith.subf %2278, %2280 : vector<8x128xf32>
    %2282 = vector.broadcast %2266 : f32 to vector<8x128xf32>
    %2283 = arith.mulf %2282, %2119 : vector<8x128xf32>
    %2284 = vector.broadcast %2265 : f32 to vector<8x128xf32>
    %2285 = arith.mulf %2284, %2139 : vector<8x128xf32>
    %2286 = arith.addf %2283, %2285 : vector<8x128xf32>
    %2287 = vector.broadcast %2265 : f32 to vector<8x128xf32>
    %2288 = arith.mulf %2287, %2114 : vector<8x128xf32>
    %2289 = vector.broadcast %2266 : f32 to vector<8x128xf32>
    %2290 = arith.mulf %2289, %2134 : vector<8x128xf32>
    %2291 = arith.subf %2288, %2290 : vector<8x128xf32>
    %2292 = vector.broadcast %2266 : f32 to vector<8x128xf32>
    %2293 = arith.mulf %2292, %2114 : vector<8x128xf32>
    %2294 = vector.broadcast %2265 : f32 to vector<8x128xf32>
    %2295 = arith.mulf %2294, %2134 : vector<8x128xf32>
    %2296 = arith.addf %2293, %2295 : vector<8x128xf32>
    %2297 = vector.broadcast %2265 : f32 to vector<8x128xf32>
    %2298 = arith.mulf %2297, %2124 : vector<8x128xf32>
    %2299 = vector.broadcast %2266 : f32 to vector<8x128xf32>
    %2300 = arith.mulf %2299, %2144 : vector<8x128xf32>
    %2301 = arith.subf %2298, %2300 : vector<8x128xf32>
    %2302 = vector.broadcast %2266 : f32 to vector<8x128xf32>
    %2303 = arith.mulf %2302, %2124 : vector<8x128xf32>
    %2304 = vector.broadcast %2265 : f32 to vector<8x128xf32>
    %2305 = arith.mulf %2304, %2144 : vector<8x128xf32>
    %2306 = arith.addf %2303, %2305 : vector<8x128xf32>
    %2307 = vector.broadcast %2265 : f32 to vector<8x128xf32>
    %2308 = arith.mulf %2307, %2149 : vector<8x128xf32>
    %2309 = vector.broadcast %2266 : f32 to vector<8x128xf32>
    %2310 = arith.mulf %2309, %2169 : vector<8x128xf32>
    %2311 = arith.subf %2308, %2310 : vector<8x128xf32>
    %2312 = vector.broadcast %2266 : f32 to vector<8x128xf32>
    %2313 = arith.mulf %2312, %2149 : vector<8x128xf32>
    %2314 = vector.broadcast %2265 : f32 to vector<8x128xf32>
    %2315 = arith.mulf %2314, %2169 : vector<8x128xf32>
    %2316 = arith.addf %2313, %2315 : vector<8x128xf32>
    %2317 = vector.broadcast %2265 : f32 to vector<8x128xf32>
    %2318 = arith.mulf %2317, %2159 : vector<8x128xf32>
    %2319 = vector.broadcast %2266 : f32 to vector<8x128xf32>
    %2320 = arith.mulf %2319, %2179 : vector<8x128xf32>
    %2321 = arith.subf %2318, %2320 : vector<8x128xf32>
    %2322 = vector.broadcast %2266 : f32 to vector<8x128xf32>
    %2323 = arith.mulf %2322, %2159 : vector<8x128xf32>
    %2324 = vector.broadcast %2265 : f32 to vector<8x128xf32>
    %2325 = arith.mulf %2324, %2179 : vector<8x128xf32>
    %2326 = arith.addf %2323, %2325 : vector<8x128xf32>
    %2327 = vector.broadcast %2265 : f32 to vector<8x128xf32>
    %2328 = arith.mulf %2327, %2154 : vector<8x128xf32>
    %2329 = vector.broadcast %2266 : f32 to vector<8x128xf32>
    %2330 = arith.mulf %2329, %2174 : vector<8x128xf32>
    %2331 = arith.subf %2328, %2330 : vector<8x128xf32>
    %2332 = vector.broadcast %2266 : f32 to vector<8x128xf32>
    %2333 = arith.mulf %2332, %2154 : vector<8x128xf32>
    %2334 = vector.broadcast %2265 : f32 to vector<8x128xf32>
    %2335 = arith.mulf %2334, %2174 : vector<8x128xf32>
    %2336 = arith.addf %2333, %2335 : vector<8x128xf32>
    %2337 = vector.broadcast %2265 : f32 to vector<8x128xf32>
    %2338 = arith.mulf %2337, %2164 : vector<8x128xf32>
    %2339 = vector.broadcast %2266 : f32 to vector<8x128xf32>
    %2340 = arith.mulf %2339, %2184 : vector<8x128xf32>
    %2341 = arith.subf %2338, %2340 : vector<8x128xf32>
    %2342 = vector.broadcast %2266 : f32 to vector<8x128xf32>
    %2343 = arith.mulf %2342, %2164 : vector<8x128xf32>
    %2344 = vector.broadcast %2265 : f32 to vector<8x128xf32>
    %2345 = arith.mulf %2344, %2184 : vector<8x128xf32>
    %2346 = arith.addf %2343, %2345 : vector<8x128xf32>
    %2347 = vector.broadcast %2265 : f32 to vector<8x128xf32>
    %2348 = arith.mulf %2347, %2189 : vector<8x128xf32>
    %2349 = vector.broadcast %2266 : f32 to vector<8x128xf32>
    %2350 = arith.mulf %2349, %2209 : vector<8x128xf32>
    %2351 = arith.subf %2348, %2350 : vector<8x128xf32>
    %2352 = vector.broadcast %2266 : f32 to vector<8x128xf32>
    %2353 = arith.mulf %2352, %2189 : vector<8x128xf32>
    %2354 = vector.broadcast %2265 : f32 to vector<8x128xf32>
    %2355 = arith.mulf %2354, %2209 : vector<8x128xf32>
    %2356 = arith.addf %2353, %2355 : vector<8x128xf32>
    %2357 = vector.broadcast %2265 : f32 to vector<8x128xf32>
    %2358 = arith.mulf %2357, %2199 : vector<8x128xf32>
    %2359 = vector.broadcast %2266 : f32 to vector<8x128xf32>
    %2360 = arith.mulf %2359, %2219 : vector<8x128xf32>
    %2361 = arith.subf %2358, %2360 : vector<8x128xf32>
    %2362 = vector.broadcast %2266 : f32 to vector<8x128xf32>
    %2363 = arith.mulf %2362, %2199 : vector<8x128xf32>
    %2364 = vector.broadcast %2265 : f32 to vector<8x128xf32>
    %2365 = arith.mulf %2364, %2219 : vector<8x128xf32>
    %2366 = arith.addf %2363, %2365 : vector<8x128xf32>
    %2367 = vector.broadcast %2265 : f32 to vector<8x128xf32>
    %2368 = arith.mulf %2367, %2194 : vector<8x128xf32>
    %2369 = vector.broadcast %2266 : f32 to vector<8x128xf32>
    %2370 = arith.mulf %2369, %2214 : vector<8x128xf32>
    %2371 = arith.subf %2368, %2370 : vector<8x128xf32>
    %2372 = vector.broadcast %2266 : f32 to vector<8x128xf32>
    %2373 = arith.mulf %2372, %2194 : vector<8x128xf32>
    %2374 = vector.broadcast %2265 : f32 to vector<8x128xf32>
    %2375 = arith.mulf %2374, %2214 : vector<8x128xf32>
    %2376 = arith.addf %2373, %2375 : vector<8x128xf32>
    %2377 = vector.broadcast %2265 : f32 to vector<8x128xf32>
    %2378 = arith.mulf %2377, %2204 : vector<8x128xf32>
    %2379 = vector.broadcast %2266 : f32 to vector<8x128xf32>
    %2380 = arith.mulf %2379, %2224 : vector<8x128xf32>
    %2381 = arith.subf %2378, %2380 : vector<8x128xf32>
    %2382 = vector.broadcast %2266 : f32 to vector<8x128xf32>
    %2383 = arith.mulf %2382, %2204 : vector<8x128xf32>
    %2384 = vector.broadcast %2265 : f32 to vector<8x128xf32>
    %2385 = arith.mulf %2384, %2224 : vector<8x128xf32>
    %2386 = arith.addf %2383, %2385 : vector<8x128xf32>
    %2387 = vector.broadcast %2265 : f32 to vector<8x128xf32>
    %2388 = arith.mulf %2387, %2229 : vector<8x128xf32>
    %2389 = vector.broadcast %2266 : f32 to vector<8x128xf32>
    %2390 = arith.mulf %2389, %2249 : vector<8x128xf32>
    %2391 = arith.subf %2388, %2390 : vector<8x128xf32>
    %2392 = vector.broadcast %2266 : f32 to vector<8x128xf32>
    %2393 = arith.mulf %2392, %2229 : vector<8x128xf32>
    %2394 = vector.broadcast %2265 : f32 to vector<8x128xf32>
    %2395 = arith.mulf %2394, %2249 : vector<8x128xf32>
    %2396 = arith.addf %2393, %2395 : vector<8x128xf32>
    %2397 = vector.broadcast %2265 : f32 to vector<8x128xf32>
    %2398 = arith.mulf %2397, %2239 : vector<8x128xf32>
    %2399 = vector.broadcast %2266 : f32 to vector<8x128xf32>
    %2400 = arith.mulf %2399, %2259 : vector<8x128xf32>
    %2401 = arith.subf %2398, %2400 : vector<8x128xf32>
    %2402 = vector.broadcast %2266 : f32 to vector<8x128xf32>
    %2403 = arith.mulf %2402, %2239 : vector<8x128xf32>
    %2404 = vector.broadcast %2265 : f32 to vector<8x128xf32>
    %2405 = arith.mulf %2404, %2259 : vector<8x128xf32>
    %2406 = arith.addf %2403, %2405 : vector<8x128xf32>
    %2407 = vector.broadcast %2265 : f32 to vector<8x128xf32>
    %2408 = arith.mulf %2407, %2234 : vector<8x128xf32>
    %2409 = vector.broadcast %2266 : f32 to vector<8x128xf32>
    %2410 = arith.mulf %2409, %2254 : vector<8x128xf32>
    %2411 = arith.subf %2408, %2410 : vector<8x128xf32>
    %2412 = vector.broadcast %2266 : f32 to vector<8x128xf32>
    %2413 = arith.mulf %2412, %2234 : vector<8x128xf32>
    %2414 = vector.broadcast %2265 : f32 to vector<8x128xf32>
    %2415 = arith.mulf %2414, %2254 : vector<8x128xf32>
    %2416 = arith.addf %2413, %2415 : vector<8x128xf32>
    %2417 = vector.broadcast %2265 : f32 to vector<8x128xf32>
    %2418 = arith.mulf %2417, %2244 : vector<8x128xf32>
    %2419 = vector.broadcast %2266 : f32 to vector<8x128xf32>
    %2420 = arith.mulf %2419, %2264 : vector<8x128xf32>
    %2421 = arith.subf %2418, %2420 : vector<8x128xf32>
    %2422 = vector.broadcast %2266 : f32 to vector<8x128xf32>
    %2423 = arith.mulf %2422, %2244 : vector<8x128xf32>
    %2424 = vector.broadcast %2265 : f32 to vector<8x128xf32>
    %2425 = arith.mulf %2424, %2264 : vector<8x128xf32>
    %2426 = arith.addf %2423, %2425 : vector<8x128xf32>
    %2427 = arith.mulf %2271, %2271 : vector<8x128xf32>
    %2428 = arith.mulf %2281, %2281 : vector<8x128xf32>
    %2429 = arith.addf %2427, %2428 : vector<8x128xf32>
    %2430 = arith.mulf %2276, %2276 : vector<8x128xf32>
    %2431 = arith.mulf %2286, %2286 : vector<8x128xf32>
    %2432 = arith.addf %2430, %2431 : vector<8x128xf32>
    %2433 = arith.mulf %2291, %2291 : vector<8x128xf32>
    %2434 = arith.mulf %2301, %2301 : vector<8x128xf32>
    %2435 = arith.addf %2433, %2434 : vector<8x128xf32>
    %2436 = arith.mulf %2296, %2296 : vector<8x128xf32>
    %2437 = arith.mulf %2306, %2306 : vector<8x128xf32>
    %2438 = arith.addf %2436, %2437 : vector<8x128xf32>
    %2439 = arith.mulf %2311, %2311 : vector<8x128xf32>
    %2440 = arith.mulf %2321, %2321 : vector<8x128xf32>
    %2441 = arith.addf %2439, %2440 : vector<8x128xf32>
    %2442 = arith.mulf %2316, %2316 : vector<8x128xf32>
    %2443 = arith.mulf %2326, %2326 : vector<8x128xf32>
    %2444 = arith.addf %2442, %2443 : vector<8x128xf32>
    %2445 = arith.mulf %2331, %2331 : vector<8x128xf32>
    %2446 = arith.mulf %2341, %2341 : vector<8x128xf32>
    %2447 = arith.addf %2445, %2446 : vector<8x128xf32>
    %2448 = arith.mulf %2336, %2336 : vector<8x128xf32>
    %2449 = arith.mulf %2346, %2346 : vector<8x128xf32>
    %2450 = arith.addf %2448, %2449 : vector<8x128xf32>
    %2451 = arith.mulf %2351, %2351 : vector<8x128xf32>
    %2452 = arith.mulf %2361, %2361 : vector<8x128xf32>
    %2453 = arith.addf %2451, %2452 : vector<8x128xf32>
    %2454 = arith.mulf %2356, %2356 : vector<8x128xf32>
    %2455 = arith.mulf %2366, %2366 : vector<8x128xf32>
    %2456 = arith.addf %2454, %2455 : vector<8x128xf32>
    %2457 = arith.mulf %2371, %2371 : vector<8x128xf32>
    %2458 = arith.mulf %2381, %2381 : vector<8x128xf32>
    %2459 = arith.addf %2457, %2458 : vector<8x128xf32>
    %2460 = arith.mulf %2376, %2376 : vector<8x128xf32>
    %2461 = arith.mulf %2386, %2386 : vector<8x128xf32>
    %2462 = arith.addf %2460, %2461 : vector<8x128xf32>
    %2463 = arith.mulf %2391, %2391 : vector<8x128xf32>
    %2464 = arith.mulf %2401, %2401 : vector<8x128xf32>
    %2465 = arith.addf %2463, %2464 : vector<8x128xf32>
    %2466 = arith.mulf %2396, %2396 : vector<8x128xf32>
    %2467 = arith.mulf %2406, %2406 : vector<8x128xf32>
    %2468 = arith.addf %2466, %2467 : vector<8x128xf32>
    %2469 = arith.mulf %2411, %2411 : vector<8x128xf32>
    %2470 = arith.mulf %2421, %2421 : vector<8x128xf32>
    %2471 = arith.addf %2469, %2470 : vector<8x128xf32>
    %2472 = arith.mulf %2416, %2416 : vector<8x128xf32>
    %2473 = arith.mulf %2426, %2426 : vector<8x128xf32>
    %2474 = arith.addf %2472, %2473 : vector<8x128xf32>
    %2475 = arith.addf %2429, %2432 : vector<8x128xf32>
    %2476 = arith.addf %2435, %2438 : vector<8x128xf32>
    %2477 = arith.addf %2441, %2444 : vector<8x128xf32>
    %2478 = arith.addf %2447, %2450 : vector<8x128xf32>
    %2479 = arith.addf %2453, %2456 : vector<8x128xf32>
    %2480 = arith.addf %2459, %2462 : vector<8x128xf32>
    %2481 = arith.addf %2465, %2468 : vector<8x128xf32>
    %2482 = arith.addf %2471, %2474 : vector<8x128xf32>
    %2483 = arith.addf %2475, %2476 : vector<8x128xf32>
    %2484 = arith.addf %2477, %2478 : vector<8x128xf32>
    %2485 = arith.addf %2479, %2480 : vector<8x128xf32>
    %2486 = arith.addf %2481, %2482 : vector<8x128xf32>
    %2487 = arith.addf %2483, %2484 : vector<8x128xf32>
    %2488 = arith.addf %2485, %2486 : vector<8x128xf32>
    %2489 = arith.addf %2487, %2488 : vector<8x128xf32>
    %2490 = arith.addf %2483, %2485 : vector<8x128xf32>
    %2491 = arith.addf %2475, %2477 : vector<8x128xf32>
    %2492 = arith.addf %2479, %2481 : vector<8x128xf32>
    %2493 = arith.addf %2491, %2492 : vector<8x128xf32>
    %2494 = arith.addf %2429, %2435 : vector<8x128xf32>
    %2495 = arith.addf %2441, %2447 : vector<8x128xf32>
    %2496 = arith.addf %2494, %2495 : vector<8x128xf32>
    %2497 = arith.addf %2453, %2459 : vector<8x128xf32>
    %2498 = arith.addf %2465, %2471 : vector<8x128xf32>
    %2499 = arith.addf %2497, %2498 : vector<8x128xf32>
    %2500 = arith.addf %2496, %2499 : vector<8x128xf32>
    %cst_22 = arith.constant 1.000000e+00 : f32
    %2501 = vector.broadcast %cst_22 : f32 to vector<8x128xf32>
    %2502 = arith.subf %2501, %2489 : vector<8x128xf32>
    %cst_23 = arith.constant 5.000000e-01 : f32
    %2503 = vector.broadcast %cst_23 : f32 to vector<8x128xf32>
    %2504 = arith.mulf %2503, %2502 : vector<8x128xf32>
    %2505 = arith.addf %2487, %2504 : vector<8x128xf32>
    %c0_24 = arith.constant 0 : index
    %2506 = arith.index_cast %1 : i32 to index
    %c0_25 = arith.constant 0 : index
    %2507 = vector.load %arg3[%c0_24, %2506, %c0_25] : memref<4x8x128xf32, #tpu.memory_space<vmem>>, vector<1x8x128xf32>
    %2508 = vector.shape_cast %2507 : vector<1x8x128xf32> to vector<8x128xf32>
    %2509 = vector.shape_cast %2505 : vector<8x128xf32> to vector<1x8x128xf32>
    tpu.vector_store %arg3[%c0_24, %2506, %c0_25], %2509 {strides = array<i32>} : memref<4x8x128xf32, #tpu.memory_space<vmem>>, vector<1x8x128xf32>,
    %2510 = arith.addf %2490, %2504 : vector<8x128xf32>
    %c1_26 = arith.constant 1 : index
    %2511 = arith.index_cast %1 : i32 to index
    %c0_27 = arith.constant 0 : index
    %2512 = vector.load %arg3[%c1_26, %2511, %c0_27] : memref<4x8x128xf32, #tpu.memory_space<vmem>>, vector<1x8x128xf32>
    %2513 = vector.shape_cast %2512 : vector<1x8x128xf32> to vector<8x128xf32>
    %2514 = vector.shape_cast %2510 : vector<8x128xf32> to vector<1x8x128xf32>
    tpu.vector_store %arg3[%c1_26, %2511, %c0_27], %2514 {strides = array<i32>} : memref<4x8x128xf32, #tpu.memory_space<vmem>>, vector<1x8x128xf32>,
    %2515 = arith.addf %2493, %2504 : vector<8x128xf32>
    %c2_28 = arith.constant 2 : index
    %2516 = arith.index_cast %1 : i32 to index
    %c0_29 = arith.constant 0 : index
    %2517 = vector.load %arg3[%c2_28, %2516, %c0_29] : memref<4x8x128xf32, #tpu.memory_space<vmem>>, vector<1x8x128xf32>
    %2518 = vector.shape_cast %2517 : vector<1x8x128xf32> to vector<8x128xf32>
    %2519 = vector.shape_cast %2515 : vector<8x128xf32> to vector<1x8x128xf32>
    tpu.vector_store %arg3[%c2_28, %2516, %c0_29], %2519 {strides = array<i32>} : memref<4x8x128xf32, #tpu.memory_space<vmem>>, vector<1x8x128xf32>,
    %2520 = arith.addf %2500, %2504 : vector<8x128xf32>
    %c3_30 = arith.constant 3 : index
    %2521 = arith.index_cast %1 : i32 to index
    %c0_31 = arith.constant 0 : index
    %2522 = vector.load %arg3[%c3_30, %2521, %c0_31] : memref<4x8x128xf32, #tpu.memory_space<vmem>>, vector<1x8x128xf32>
    %2523 = vector.shape_cast %2522 : vector<1x8x128xf32> to vector<8x128xf32>
    %2524 = vector.shape_cast %2520 : vector<8x128xf32> to vector<1x8x128xf32>
    tpu.vector_store %arg3[%c3_30, %2521, %c0_31], %2524 {strides = array<i32>} : memref<4x8x128xf32, #tpu.memory_space<vmem>>, vector<1x8x128xf32>,
    %c1_i32 = arith.constant 1 : i32
    return
  }
  func.func @transform_0(%arg0: i32, %arg1: memref<88xf32, #tpu.memory_space<smem>>) -> (i32, i32, i32) {
    %c0_i32 = arith.constant 0 : i32
    %c0_i32_0 = arith.constant 0 : i32
    %c0_i32_1 = arith.constant 0 : i32
    return %c0_i32, %arg0, %c0_i32_0 : i32, i32, i32
  }
  func.func @transform_1(%arg0: i32, %arg1: memref<88xf32, #tpu.memory_space<smem>>) -> (i32, i32, i32) {
    %c0_i32 = arith.constant 0 : i32
    %c0_i32_0 = arith.constant 0 : i32
    %c0_i32_1 = arith.constant 0 : i32
    return %c0_i32, %arg0, %c0_i32_0 : i32, i32, i32
  }
}

</mosaic_0001>

<bundles_post_ra>
// kernel: tpu_custom_call.1
= control target key start
LH: loop header
LB: loop body
LE: loop exit
PB: predicated region body
PF: predicated region fallthrough
CT: control target
= control target key end

     0   :  { %s6028_s0 = inlined_call_operand.hbm [shape: f32[88], index: 0, kind: input, shape index: {}]   ;;  %s6029_s1 = inlined_call_operand.hbm [shape: f32[4,8,128], index: 1, kind: input, shape index: {}]   ;;  %s6030_s2 = inlined_call_operand.hbm [shape: f32[4,8,128], index: 2, kind: output, shape index: {}]  }
   0x1   :  { %6042 = sst [smem:[#allocation15_spill]] %s6030_s2  ;;  %s2670_s11 = scalar_lea.hbm %s6028_s0, 16 }
   0x2   :  { %p2671_p0 = scmp.ne.s32.totalorder %s6028_s0, %s2670_s11  ;;  %p2674_p1 = scmp.lt.u32.totalorder %s2670_s11, %s6028_s0 }
   0x4   :  { %p2676_p2 = pnand %p2674_p1, %p2671_p0 }
   0x6   :  { %2679 = shalt.err (!%p2676_p2)  }
   0x7   :  { %s2730_s16 = smov [#allocation3]  }
   0x8   :  { %8 = dma.hbm_to_smem %s6028_s0, 16, %s2730_s16, [#allocation2] }
   0x9   :  { %2724 = dma.done.wait [#allocation2], 16 }
   0xa   :  { %2725 = vsyncadd [#allocation2], 4294967280 }
   0xb   :  { %10 = sfence }
   0xc   :  { %11 = vsyncpa [#allocation5], 0 }
   0xd   :  { %12 = vsyncpa [#allocation6], 0  ;;  %s2731_s19 = smov [#allocation4]   ;;  %s2680_s23 = scalar_lea.hbm %s6029_s1, 512 }
   0xe   :  { %s18_s20 = sshll.u32 %s2731_s19, 4  ;;  %p2681_p3 = scmp.ne.s32.totalorder %s6029_s1, %s2680_s23  ;;  %s19_s20 = int_to_ptr.vmem [resolvable:$true] %s18_s20 }
   0xf   :  { %p2684_p4 = scmp.lt.u32.totalorder %s2680_s23, %s6029_s1 }
  0x11   :  { %p2686_p5 = pnand %p2684_p4, %p2681_p3 }
  0x13   :  { %2689 = shalt.err (!%p2686_p5)
}
  0x14   :  { %s2690_s0 = scalar_lea.vmem %s19_s20, 512  ;;  %p2695_p7 = scmp.lt.s32.totalorder %s19_s20, %s19_s20 }
  0x15   :  { %p2691_p6 = scmp.ne.s32.totalorder %s19_s20, %s2690_s0  ;;  %p2696_p8 = scmp.lt.s32.totalorder %s2690_s0, %s2690_s0 }
  0x17   :  { %p2697_p9 = por %p2696_p8, %p2695_p7 }
  0x19   :  { %p2698_p10 = pnand %p2697_p9, %p2691_p6 }
  0x1b   :  { %2701 = shalt.err (!%p2698_p10)
}
  0x1c   :  { %s6031_s28 = smov 128   ;;  %s6032_s29 = smov 8  }
  0x1d   :  { %24 = dma.hbm_to_vmem [thread:$0]  %s6029_s1, 512, %s19_s20, [#allocation5], %s6031_s28, %s6031_s28, %s6032_s29  }
  0x1e   :  { %2726 = dma.done.wait [#allocation5], 512  }
  0x1f   :  { %2727 = vsyncadd [#allocation5], 4294966784  ;;  %v28_v0 = vld [vmem:[#allocation4] sm:$0xff]  ;;  %v239_v1 = vld [vmem:[#allocation4 + $0x8] sm:$0xff]  ;;  %v2734_v32 = vmov 683565275  }
  0x20   :  { %v450_v2 = vld [vmem:[#allocation4 + $0x10] sm:$0xff]  ;;  %v2783_v3 = vmul.f32 1.5707964, %v28_v0  ;;  %v2785_v4 = vmul.f32 1.5707964, %v239_v1  ;;  %s3063_s1 = sld [smem:[#allocation3 + $0x4]] }
  0x21   :  { %v2787_v5 = vmul.f32 1.5707964, %v450_v2  ;;  %v2735_v34 = vmov 2475754826   ;;  %v2736_v36 = vmov 2131351028  }
  0x22   :  { %v30_v6 = vand.u32 2147483647, %v2783_v3  ;;  %v33_v7 = vand.u32 2139095040, %v2783_v3  ;;  %v241_v8 = vand.u32 2147483647, %v2785_v4  ;;  %v244_v9 = vand.u32 2139095040, %v2785_v4 }
  0x23   :  { %v455_v14 = vand.u32 2139095040, %v2787_v5  ;;  %v2737_v38 = vmov 2102212464   ;;  %v2738_v40 = vmov 920167782   ;;  %s3072_s4 = sld [smem:[#allocation3]] }
  0x24   :  { %v34_v10 = vshrl.u32 %v33_v7, 23  ;;  %v37_v11 = vand.u32 8388607, %v30_v6  ;;  %v245_v12 = vshrl.u32 %v244_v9, 23  ;;  %v248_v13 = vand.u32 8388607, %v241_v8 }
  0x25   :  { %v456_v17 = vshrl.u32 %v455_v14, 23  ;;  %v2739_v48 = vmov 1326507024   ;;  %s3079_s5 = sld [smem:[#allocation3 + $0x1]]  ;;  %s3088_s6 = sld [smem:[#allocation3 + $0x5]] }
  0x26   :  { %v2508_v15 = vadd.s32 4294967169, %v34_v10  ;;  %v2516_v16 = vadd.s32 4294967169, %v245_v12  ;;  %v38_v19 = vor.u32 8388608, %v37_v11  ;;  %v249_v20 = vor.u32 8388608, %v248_v13  ;;  %s3090_s7 = sld [smem:[#allocation3 + $0x2]]  ;;  %s3096_s8 = sld [smem:[#allocation3 + $0x6]] }
  0x27   :  { %v2524_v22 = vadd.s32 4294967169, %v456_v17  ;;  %s3098_s9 = sld [smem:[#allocation3 + $0x3]]  ;;  %s3104_s10 = sld [smem:[#allocation3 + $0x7]] }
  0x28   :  { %v40_v18 = vadd.s32 1, %v2508_v15  ;;  %v251_v21 = vadd.s32 1, %v2516_v16  ;;  %v2798_v27 = vshll.u32 %v38_v19, 8  ;;  %v2800_v29 = vshll.u32 %v249_v20, 8  ;;  %s3106_s11 = sld [smem:[#allocation3 + $0x18]]  ;;  %s3118_s13 = sld [smem:[#allocation3 + $0x19]] }
  0x29   :  { %v2802_v30 = vadd.s32 1, %v2524_v22  ;;  %s3108_s12 = sld [smem:[#allocation3 + $0x28]]  ;;  %s3120_s14 = sld [smem:[#allocation3 + $0x29]] }
  0x2a   :  { %vm41_vm0 = vcmp.gt.s32.totalorder %v40_v18, 0  ;;  %vm252_vm1 = vcmp.gt.s32.totalorder %v251_v21, 0  ;;  %s3126_s15 = sld [smem:[#allocation3 + $0x1a]]  ;;  %s3138_s17 = sld [smem:[#allocation3 + $0x1b]] }
  0x2b   :  { %v42_v23 = vsel %vm41_vm0, %v40_v18, 0  ;;  %v253_v26 = vsel %vm252_vm1, %v251_v21, 0  ;;  %vm463_vm6 = vcmp.gt.s32.totalorder %v2802_v30, 0  ;;  %s3128_s16 = sld [smem:[#allocation3 + $0x2a]]  ;;  %s3140_s18 = sld [smem:[#allocation3 + $0x2b]] }
  0x2c   :  { %v43_v24 = vshrl.u32 %v42_v23, 5  ;;  %v44_v25 = vand.u32 31, %v42_v23  ;;  %v255_v28 = vand.u32 31, %v253_v26  ;;  %v2809_v42 = vshrl.u32 %v253_v26, 5  ;;  %s3148_s19 = sld [smem:[#allocation3 + $0x1c]]  ;;  %s3157_s21 = sld [smem:[#allocation3 + $0x1d]] }
  0x2d   :  { %s3150_s20 = sld [smem:[#allocation3 + $0x2c]]  ;;  %s3159_s22 = sld [smem:[#allocation3 + $0x2d]] }
  0x2e   :  { %v45_v31 = vsub.s32 32, %v44_v25  ;;  %v47_v33 = vshll.u32 %v2734_v32, %v44_v25  ;;  %v50_v35 = vshll.u32 %v2735_v34, %v44_v25  ;;  %v53_v37 = vshll.u32 %v2736_v36, %v44_v25  ;;  %6049 = sst [smem:[#allocation11_spill]] %s3118_s13  ;;  %s3169_s23 = sld [smem:[#allocation3 + $0x1e]] }
  0x2f   :  { %v56_v39 = vshll.u32 %v2737_v38, %v44_v25  ;;  %v59_v41 = vshll.u32 %v2738_v40, %v44_v25  ;;  %vm62_vm2 = vcmp.lt.s32.totalorder %v43_v24, 1  ;;  %vm63_vm3 = vcmp.lt.s32.totalorder %v43_v24, 2  ;;  %6050 = sst [smem:[#allocation12_spill]] %s3120_s14  ;;  %s3171_s24 = sld [smem:[#allocation3 + $0x2e]] }
  0x30   :  { %v46_v43 = vshrl.u32 %v2734_v32, %v45_v31  ;;  %v48_v44 = vshrl.u32 %v2735_v34, %v45_v31  ;;  %v51_v45 = vshrl.u32 %v2736_v36, %v45_v31  ;;  %v54_v46 = vshrl.u32 %v2737_v38, %v45_v31  ;;  %s3184_s25 = sld [smem:[#allocation3 + $0x1f]]  ;;  %s3191_s27 = sld [smem:[#allocation3 + $0x20]] }
  0x31   :  { %v57_v47 = vshrl.u32 %v2738_v40, %v45_v31  ;;  %v60_v49 = vshrl.u32 %v2739_v48, %v45_v31  ;;  %vm65_vm4 = vcmp.lt.s32.totalorder %v43_v24, 4  ;;  %v256_v53 = vsub.s32 32, %v255_v28  ;;  %6052 = sst [smem:[#allocation13_spill]] %s3128_s16  ;;  %s3186_s26 = sld [smem:[#allocation3 + $0x2f]] }
  0x32   :  { %v49_v50 = vor.u32 %v48_v44, %v47_v33  ;;  %v52_v51 = vor.u32 %v51_v45, %v50_v35  ;;  %v55_v52 = vor.u32 %v54_v46, %v53_v37  ;;  %vm64_vm5 = vcmp.lt.s32.totalorder %v43_v24, 3  ;;  %s3193_s0 = sld [smem:[#allocation3 + $0x30]]  ;;  %s3199_s30 = sld [smem:[#allocation3 + $0x21]] }
  0x33   :  { %v58_v54 = vor.u32 %v57_v47, %v56_v39  ;;  %v61_v55 = vor.u32 %v60_v49, %v59_v41  ;;  %v258_v56 = vshll.u32 %v2734_v32, %v255_v28  ;;  %v261_v0 = vshll.u32 %v2735_v34, %v255_v28  ;;  %s3201_s3 = sld [smem:[#allocation3 + $0x31]]  ;;  %s3258_s28 = sld [smem:[#allocation3 + $0x26]] }
  0x34   :  { %v66_v57 = vsel %vm62_vm2, %v46_v43, %v49_v50  ;;  %v67_v58 = vsel %vm65_vm4, %v55_v52, 2102212464  ;;  %v70_v59 = vsel %vm62_vm2, %v49_v50, %v52_v51  ;;  %v74_v60 = vsel %vm62_vm2, %v52_v51, %v55_v52  ;;  %s3260_s29 = sld [smem:[#allocation3 + $0x36]]  ;;  %s3266_s2 = sld [smem:[#allocation3 + $0x27]] }
  0x35   :  { %v68_v61 = vsel %vm64_vm5, %v52_v51, %v67_v58  ;;  %v71_v62 = vsel %vm65_vm4, %v58_v54, 920167782  ;;  %v75_v63 = vsel %vm65_vm4, %v61_v55, 1326507024  ;;  %v257_v7 = vshrl.u32 %v2734_v32, %v256_v53 }
  0x36   :  { %v72_v1 = vsel %vm64_vm5, %v55_v52, %v71_v62  ;;  %v76_v2 = vsel %vm64_vm5, %v58_v54, %v75_v63  ;;  %v259_v9 = vshrl.u32 %v2735_v34, %v256_v53  ;;  %v69_v10 = vsel %vm63_vm3, %v66_v57, %v68_v61 }
  0x37   :  { %v73_v11 = vsel %vm63_vm3, %v70_v59, %v72_v1  ;;  %v77_v12 = vsel %vm63_vm3, %v74_v60, %v76_v2  ;;  %v262_v13 = vshrl.u32 %v2736_v36, %v256_v53  ;;  %v264_v20 = vshll.u32 %v2736_v36, %v255_v28  ;;  %v661_v2 = vld [vmem:[#allocation4 + $0x18] sm:$0xff] }
  0x38   :  { %v2830_v14 = vmul.u32.u64.low %v2798_v27, %v77_v12  ;;  %v2831_v15 = vmul.u32.u64.high %v2798_v27, %v77_v12, %v2830_v14  ;;  %v2834_v16 = vmul.u32.u64.low %v2798_v27, %v73_v11  ;;  %v2835_v17 = vmul.u32.u64.high %v2798_v27, %v73_v11, %v2834_v16 }
  0x39   :  { %v260_v18 = vor.u32 %v259_v9, %v258_v56  ;;  %v263_v19 = vor.u32 %v262_v13, %v261_v0  ;;  %v265_v21 = vshrl.u32 %v2737_v38, %v256_v53  ;;  %v267_v22 = vshll.u32 %v2737_v38, %v255_v28 }
  0x3a   :  { %v268_v23 = vshrl.u32 %v2738_v40, %v256_v53  ;;  %v270_v24 = vshll.u32 %v2738_v40, %v255_v28  ;;  %v271_v25 = vshrl.u32 %v2739_v48, %v256_v53  ;;  %v85_v26 = vmul.u32 %v2798_v27, %v69_v10 }
  0x3b   :  { %v266_v31 = vor.u32 %v265_v21, %v264_v20  ;;  %vm273_vm7 = vcmp.lt.s32.totalorder %v2809_v42, 1  ;;  %vm274_vm8 = vcmp.lt.s32.totalorder %v2809_v42, 2  ;;  %vm87_vm9 = vc.u32 %v2831_v15, %v2834_v16 }
  0x3c   :  { %v88_v33 = vadd.s32 1, %v2835_v17  ;;  %v269_v35 = vor.u32 %v268_v23, %v267_v22  ;;  %vm275_vm10 = vcmp.lt.s32.totalorder %v2809_v42, 3  ;;  %v272_v37 = vor.u32 %v271_v25, %v270_v24 }
  0x3d   :  { %vm276_vm11 = vcmp.lt.s32.totalorder %v2809_v42, 4  ;;  %v277_v28 = vsel %vm273_vm7, %v257_v7, %v260_v18  ;;  %v281_v39 = vsel %vm273_vm7, %v260_v18, %v263_v19  ;;  %v285_v44 = vsel %vm273_vm7, %v263_v19, %v266_v31 }
  0x3e   :  { %v89_v27 = vsel %vm87_vm9, %v88_v33, %v2835_v17  ;;  %v278_v41 = vsel %vm276_vm11, %v266_v31, 2102212464  ;;  %v282_v43 = vsel %vm276_vm11, %v269_v35, 920167782  ;;  %v286_v49 = vsel %vm276_vm11, %v272_v37, 1326507024 }
  0x3f   :  { %v90_v45 = vadd.s32 %v89_v27, %v85_v26  ;;  %v279_v46 = vsel %vm275_vm10, %v263_v19, %v278_v41  ;;  %v283_v47 = vsel %vm275_vm10, %v266_v31, %v282_v43  ;;  %v287_v52 = vsel %vm275_vm10, %v269_v35, %v286_v49 }
  0x40   :  { %v280_v50 = vsel %vm274_vm8, %v277_v28, %v279_v46  ;;  %v284_v51 = vsel %vm274_vm8, %v281_v39, %v283_v47  ;;  %v464_v53 = vsel %vm463_vm6, %v2802_v30, 0  ;;  %v288_v55 = vsel %vm274_vm8, %v285_v44, %v287_v52 }
  0x41   :  { %v91_v54 = vadd.s32 536870912, %v90_v45  ;;  %v2863_v56 = vmul.u32.u64.low %v2800_v29, %v284_v51  ;;  %v2864_v57 = vmul.u32.u64.high %v2800_v29, %v284_v51, %v2863_v56  ;;  %v466_v61 = vand.u32 31, %v464_v53 }
  0x42   :  { %v2868_v58 = vmul.u32.u64.low %v2800_v29, %v288_v55  ;;  %v2869_v59 = vmul.u32.u64.high %v2800_v29, %v288_v55, %v2868_v58  ;;  %v296_v62 = vmul.u32 %v2800_v29, %v280_v50  ;;  %v452_v10 = vand.u32 2147483647, %v2787_v5 }
  0x43   :  { %v2871_v60 = vshrl.u32 %v91_v54, 30  ;;  %v299_v63 = vadd.s32 1, %v2864_v57  ;;  %v467_v1 = vsub.s32 32, %v466_v61  ;;  %v465_v29 = vshrl.u32 %v464_v53, 5 }
  0x44   :  { %vm298_vm12 = vc.u32 %v2869_v59, %v2863_v56  ;;  %v469_v12 = vshll.u32 %v2734_v32, %v466_v61  ;;  %v2884_v13 = vmul.f32 1.5707964, %v661_v2  ;;  %v472_v18 = vshll.u32 %v2735_v34, %v466_v61 }
  0x45   :  { %v93_v30 = vshll.u32 %v2871_v60, 30  ;;  %v300_v0 = vsel %vm298_vm12, %v299_v63, %v2864_v57  ;;  %v470_v17 = vshrl.u32 %v2735_v34, %v467_v1  ;;  %v473_v19 = vshrl.u32 %v2736_v36, %v467_v1 }
  0x46   :  { %v301_v7 = vadd.s32 %v300_v0, %v296_v62  ;;  %v475_v21 = vshll.u32 %v2736_v36, %v466_v61  ;;  %v476_v22 = vshrl.u32 %v2737_v38, %v467_v1  ;;  %v478_v23 = vshll.u32 %v2737_v38, %v466_v61 }
  0x47   :  { %v2878_v42 = vsub.s32 %v90_v45, %v93_v30  ;;  %v479_v24 = vshrl.u32 %v2738_v40, %v467_v1  ;;  %v459_v31 = vand.u32 8388607, %v452_v10  ;;  %vm487_vm13 = vcmp.lt.s32.totalorder %v465_v29, 4 }
  0x48   :  { %v302_v11 = vadd.s32 536870912, %v301_v7  ;;  %v481_v35 = vshll.u32 %v2738_v40, %v466_v61  ;;  %v482_v37 = vshrl.u32 %v2739_v48, %v467_v1  ;;  %v666_v28 = vand.u32 2139095040, %v2884_v13 }
  0x49   :  { %v96_v9 = vsub.s32 0, %v2878_v42  ;;  %v480_v33 = vor.u32 %v479_v24, %v478_v23  ;;  %v471_v27 = vor.u32 %v470_v17, %v469_v12  ;;  %v474_v41 = vor.u32 %v473_v19, %v472_v18 }
  0x4a   :  { %v2890_v20 = vshrl.u32 %v302_v11, 30  ;;  %v477_v43 = vor.u32 %v476_v22, %v475_v21  ;;  %vm484_vm14 = vcmp.lt.s32.totalorder %v465_v29, 1  ;;  %vm486_vm15 = vcmp.lt.s32.totalorder %v465_v29, 3 }
  0x4b   :  { %v2509_v14 = vmin.u32 %v96_v9, %v2878_v42  ;;  %v493_v44 = vsel %vm487_vm13, %v480_v33, 920167782  ;;  %v460_v47 = vor.u32 8388608, %v459_v31  ;;  %v468_v49 = vshrl.u32 %v2734_v32, %v467_v1 }
  0x4c   :  { %v304_v26 = vshll.u32 %v2890_v20, 30  ;;  %v483_v50 = vor.u32 %v482_v37, %v481_v35  ;;  %vm485_vm0 = vcmp.lt.s32.totalorder %v465_v29, 2  ;;  %v667_v51 = vshrl.u32 %v666_v28, 23 }
  0x4d   :  { %v98_v25 = vclz %v2509_v14  ;;  %v489_v53 = vsel %vm487_vm13, %v477_v43, 2102212464  ;;  %v492_v54 = vsel %vm484_vm14, %v471_v27, %v474_v41  ;;  %v494_v55 = vsel %vm486_vm15, %v477_v43, %v493_v44 }
  0x4e   :  { %v2902_v39 = vsub.s32 %v301_v7, %v304_v26  ;;  %v488_v58 = vsel %vm484_vm14, %v468_v49, %v471_v27  ;;  %v500_v61 = vshll.u32 %v460_v47, 8  ;;  %v490_v62 = vsel %vm486_vm15, %v474_v41, %v489_v53 }
  0x4f   :  { %v2510_v45 = vadd.s32 4294967294, %v98_v25  ;;  %v495_v30 = vsel %vm485_vm0, %v492_v54, %v494_v55  ;;  %v496_v63 = vsel %vm484_vm14, %v474_v41, %v477_v43  ;;  %v497_v0 = vsel %vm487_vm13, %v483_v50, 1326507024 }
  0x50   :  { %v307_v46 = vsub.s32 0, %v2902_v39  ;;  %v2532_v2 = vadd.s32 4294967169, %v667_v51  ;;  %v498_v9 = vsel %vm486_vm15, %v480_v33, %v497_v0  ;;  %v491_v11 = vsel %vm485_vm0, %v488_v58, %v490_v62 }
  0x51   :  { %vm2511_vm1 = vcmp.lt.s32.totalorder %v2510_v45, 0  ;;  %v499_v12 = vsel %vm485_vm0, %v496_v63, %v498_v9  ;;  %v2919_v14 = vmul.u32.u64.low %v500_v61, %v495_v30  ;;  %v2920_v17 = vmul.u32.u64.high %v500_v61, %v495_v30, %v2919_v14 }
  0x52   :  { %v2517_v52 = vmin.u32 %v307_v46, %v2902_v39  ;;  %v101_v7 = vsel %vm2511_vm1, 0, %v2510_v45  ;;  %v2923_v18 = vmul.u32.u64.low %v500_v61, %v499_v12  ;;  %v2924_v19 = vmul.u32.u64.high %v500_v61, %v499_v12, %v2923_v18 }
  0x53   :  { %v106_v21 = vsub.s32 4294967266, %v101_v7  ;;  %v673_v22 = vadd.s32 1, %v2532_v2  ;;  %v507_v23 = vmul.u32 %v500_v61, %v491_v11  ;;  %v86_v24 = vadd.s32 %v2834_v16, %v2831_v15 }
  0x54   :  { %v309_v57 = vclz %v2517_v52  ;;  %v510_v25 = vadd.s32 1, %v2920_v17  ;;  %v102_v26 = vsub.s32 32, %v101_v7  ;;  %vm509_vm4 = vc.u32 %v2924_v19, %v2919_v14 }
  0x55   :  { %vm674_vm3 = vcmp.gt.s32.totalorder %v673_v22, 0  ;;  %v107_v33 = vadd.s32 127, %v106_v21  ;;  %v103_v41 = vshll.u32 %v2878_v42, %v101_v7  ;;  %v663_v15 = vand.u32 2147483647, %v2884_v13 }
  0x56   :  { %v2518_v1 = vadd.s32 4294967294, %v309_v57  ;;  %v675_v31 = vsel %vm674_vm3, %v673_v22, 0  ;;  %v511_v35 = vsel %vm509_vm4, %v510_v25, %v2920_v17  ;;  %v104_v43 = vshrl.u32 %v86_v24, %v102_v26 }
  0x57   :  { %v512_v37 = vadd.s32 %v511_v35, %v507_v23  ;;  %v677_v28 = vand.u32 31, %v675_v31  ;;  %v108_v16 = vshll.u32 %v107_v33, 23  ;;  %v297_v45 = vadd.s32 %v2863_v56, %v2869_v59 }
  0x58   :  { %vm2519_vm2 = vcmp.lt.s32.totalorder %v2518_v1, 0  ;;  %v105_v51 = vor.u32 %v104_v43, %v103_v41  ;;  %v670_v53 = vand.u32 8388607, %v663_v15  ;;  %v676_v30 = vshrl.u32 %v675_v31, 5 }
  0x59   :  { %v312_v29 = vsel %vm2519_vm2, 0, %v2518_v1  ;;  %v513_v44 = vadd.s32 536870912, %v512_v37  ;;  %v678_v49 = vsub.s32 32, %v677_v28  ;;  %v109_v42 = vor.u32 4788187, %v108_v16 }
  0x5a   :  { %v317_v27 = vsub.s32 4294967266, %v312_v29  ;;  %v313_v46 = vsub.s32 32, %v312_v29  ;;  %v314_v54 = vshll.u32 %v2902_v39, %v312_v29  ;;  %v680_v57 = vshll.u32 %v2734_v32, %v677_v28 }
  0x5b   :  { %v2936_v47 = vshrl.u32 %v513_v44, 30  ;;  %v681_v56 = vshrl.u32 %v2735_v34, %v678_v49  ;;  %v683_v59 = vshll.u32 %v2735_v34, %v677_v28  ;;  %v684_v61 = vshrl.u32 %v2736_v36, %v678_v49 }
  0x5c   :  { %v318_v50 = vadd.s32 127, %v317_v27  ;;  %v315_v55 = vshrl.u32 %v297_v45, %v313_v46  ;;  %v689_v63 = vshll.u32 %v2737_v38, %v677_v28  ;;  %v690_v0 = vshrl.u32 %v2738_v40, %v678_v49 }
  0x5d   :  { %v515_v52 = vshll.u32 %v2936_v47, 30  ;;  %v112_v1 = vcvt.s32.f32 %v105_v51  ;;  %v686_v39 = vshll.u32 %v2736_v36, %v677_v28  ;;  %v687_v7 = vshrl.u32 %v2737_v38, %v678_v49 }
  0x5e   :  { %v319_v62 = vshll.u32 %v318_v50, 23  ;;  %v110_v9 = vand.u32 2147483647, %v109_v42  ;;  %v671_v11 = vor.u32 8388608, %v670_v53  ;;  %v692_v12 = vshll.u32 %v2738_v40, %v677_v28 }
  0x5f   :  { %v516_v58 = vsub.s32 %v512_v37, %v515_v52  ;;  %v693_v34 = vshrl.u32 %v2739_v48, %v678_v49  ;;  %v682_v18 = vor.u32 %v681_v56, %v680_v57  ;;  %v685_v21 = vor.u32 %v684_v61, %v683_v59 }
  0x60   :  { %v316_v22 = vor.u32 %v315_v55, %v314_v54  ;;  %v320_v23 = vor.u32 4788187, %v319_v62  ;;  %v691_v24 = vor.u32 %v690_v0, %v689_v63  ;;  %vm695_vm5 = vcmp.lt.s32.totalorder %v676_v30, 1 }
  0x61   :  { %v518_v2 = vsub.s32 0, %v516_v58  ;;  %v679_v26 = vshrl.u32 %v2734_v32, %v678_v49  ;;  %v688_v29 = vor.u32 %v687_v7, %v686_v39  ;;  %vm698_vm6 = vcmp.lt.s32.totalorder %v676_v30, 4 }
  0x62   :  { %v113_v36 = vmul.f32 %v112_v1, %v110_v9  ;;  %v694_v38 = vor.u32 %v693_v34, %v692_v12  ;;  %vm697_vm7 = vcmp.lt.s32.totalorder %v676_v30, 3  ;;  %v711_v31 = vshll.u32 %v671_v11, 8 }
  0x63   :  { %v2525_v17 = vmin.u32 %v518_v2, %v516_v58  ;;  %vm696_vm8 = vcmp.lt.s32.totalorder %v676_v30, 2  ;;  %v700_v40 = vsel %vm698_vm6, %v688_v29, 2102212464  ;;  %v703_v48 = vsel %vm695_vm5, %v682_v18, %v685_v21 }
  0x64   :  { %v321_v35 = vand.u32 2147483647, %v320_v23  ;;  %v323_v37 = vcvt.s32.f32 %v316_v22  ;;  %v508_v28 = vadd.s32 %v2919_v14, %v2924_v19  ;;  %v704_v27 = vsel %vm698_vm6, %v691_v24, 920167782 }
  0x65   :  { %v520_v25 = vclz %v2525_v17  ;;  %v699_v32 = vsel %vm695_vm5, %v679_v26, %v682_v18  ;;  %v705_v41 = vsel %vm697_vm7, %v688_v29, %v704_v27  ;;  %v707_v43 = vsel %vm695_vm5, %v685_v21, %v688_v29 }
  0x66   :  { %v701_v16 = vsel %vm697_vm7, %v685_v21, %v700_v40  ;;  %v706_v45 = vsel %vm696_vm8, %v703_v48, %v705_v41  ;;  %v708_v46 = vsel %vm698_vm6, %v694_v38, 1326507024  ;;  %v114_v59 = vxor.u32 2147483648, %v113_v36 }
  0x67   :  { %v2526_v33 = vadd.s32 4294967294, %v520_v25  ;;  %v709_v14 = vsel %vm697_vm7, %v691_v24, %v708_v46  ;;  %v2966_v52 = vmul.u32.u64.low %v711_v31, %v706_v45  ;;  %v2967_v53 = vmul.u32.u64.high %v711_v31, %v706_v45, %v2966_v52 }
  0x68   :  { %v710_v19 = vsel %vm696_vm8, %v707_v43, %v709_v14  ;;  %v702_v55 = vsel %vm696_vm8, %v699_v32, %v701_v16  ;;  %v324_v61 = vmul.f32 %v323_v37, %v321_v35  ;;  %vm32_vm10 = vcmp.lt.s32.totalorder %v2783_v3, 0 }
  0x69   :  { %vm2527_vm9 = vcmp.lt.s32.totalorder %v2526_v33, 0  ;;  %v2971_v57 = vmul.u32.u64.low %v711_v31, %v710_v19  ;;  %v2972_v56 = vmul.u32.u64.high %v711_v31, %v710_v19, %v2971_v57  ;;  %v718_v63 = vmul.u32 %v711_v31, %v702_v55 }
  0x6a   :  { %v523_v44 = vsel %vm2527_vm9, 0, %v2526_v33  ;;  %v721_v0 = vadd.s32 1, %v2967_v53  ;;  %vm2978_vm11 = vcmp.le.f32.partialorder %v30_v6, 0.7853982  ;;  %v116_v30 = vsub.s32 4, %v2871_v60 }
  0x6b   :  { %v524_v49 = vsub.s32 32, %v523_v44  ;;  %v525_v50 = vshll.u32 %v516_v58, %v523_v44  ;;  %v528_v51 = vsub.s32 4294967266, %v523_v44  ;;  %vm720_vm12 = vc.u32 %v2972_v56, %v2966_v52 }
  0x6c   :  { %v115_v7 = vsel %vm32_vm10, %v114_v59, %v113_v36  ;;  %v325_v9 = vxor.u32 2147483648, %v324_v61  ;;  %v722_v12 = vsel %vm720_vm12, %v721_v0, %v2967_v53  ;;  %vm243_vm13 = vcmp.lt.s32.totalorder %v2785_v4, 0 }
  0x6d   :  { %v526_v42 = vshrl.u32 %v508_v28, %v524_v49  ;;  %v529_v54 = vadd.s32 127, %v528_v51  ;;  %v723_v34 = vadd.s32 %v722_v12, %v718_v63  ;;  %v117_v6 = vsel %vm32_vm10, %v116_v30, %v2871_v60 }
  0x6e   :  { %v118_v18 = vsel %vm2978_vm11, %v2783_v3, %v115_v7  ;;  %v327_v21 = vsub.s32 4, %v2890_v20  ;;  %vm2998_vm14 = vcmp.le.f32.partialorder %v241_v8, 0.7853982  ;;  %v326_v24 = vsel %vm243_vm13, %v325_v9, %v324_v61 }
  0x6f   :  { %v527_v62 = vor.u32 %v526_v42, %v525_v50  ;;  %v530_v58 = vshll.u32 %v529_v54, 23  ;;  %v724_v22 = vadd.s32 536870912, %v723_v34  ;;  %v119_v60 = vsel %vm2978_vm11, 0, %v117_v6 }
  0x70   :  { %2654 = vcosq.f32 %v118_v18  ;;  %vm454_vm15 = vcmp.lt.s32.totalorder %v2787_v5, 0  ;;  %v328_v29 = vsel %vm243_vm13, %v327_v21, %v2890_v20  ;;  %v329_v8 = vsel %vm2998_vm14, %v2785_v4, %v326_v24 }
  0x71   :  { %v531_v1 = vor.u32 4788187, %v530_v58  ;;  %v534_v2 = vcvt.s32.f32 %v527_v62  ;;  %v3002_v26 = vshrl.u32 %v724_v22, 30  ;;  %2656 = vsinq.f32 %v118_v18 }
  0x72   :  { %v538_v38 = vsub.s32 4, %v2936_v47  ;;  %vm453_vm0 = vcmp.le.f32.partialorder %v452_v10, 0.7853982  ;;  %v226_v40 = vadd.s32 3, %v119_v60  ;;  %v330_v48 = vsel %vm2998_vm14, 0, %v328_v29 }
  0x73   :  { %v532_v11 = vand.u32 2147483647, %v531_v1  ;;  %v726_v36 = vshll.u32 %v3002_v26, 30  ;;  %2658 = vcosq.f32 %v329_v8  ;;  %v3022_v28 = vand.u32 3, %v119_v60 }
  0x74   :  { %2660 = vsinq.f32 %v329_v8  ;;  %v539_v35 = vsel %vm454_vm15, %v538_v38, %v2936_v47  ;;  %v437_v27 = vadd.s32 3, %v330_v48  ;;  %v3025_v32 = vand.u32 3, %v226_v40 }
  0x75   :  { %v535_v17 = vmul.f32 %v534_v2, %v532_v11  ;;  %v3015_v33 = vsub.s32 %v723_v34, %v726_v36  ;;  %v541_v41 = vsel %vm453_vm0, 0, %v539_v35  ;;  %v3027_v16 = vand.u32 3, %v330_v48 }
  0x76   :  { %vm124_vm1 = vcmp.lt.s32.totalorder %v3022_v28, 2  ;;  %vm125_vm2 = vcmp.eq.s32.totalorder %v3022_v28, 0  ;;  %v3031_v47 = vand.u32 3, %v437_v27  ;;  %vm665_vm3 = vcmp.lt.s32.totalorder %v2884_v13, 0 }
  0x77   :  { %v536_v25 = vxor.u32 2147483648, %v535_v17  ;;  %v729_v20 = vsub.s32 0, %v3015_v33  ;;  %vm128_vm4 = vcmp.eq.s32.totalorder %v3022_v28, 2  ;;  %vm228_vm5 = vcmp.lt.s32.totalorder %v3025_v32, 2 }
  0x78   :  { %vm229_vm6 = vcmp.eq.s32.totalorder %v3025_v32, 0  ;;  %v648_v49 = vadd.s32 3, %v541_v41  ;;  %vm232_vm7 = vcmp.eq.s32.totalorder %v3025_v32, 2  ;;  %v719_v51 = vadd.s32 %v2966_v52, %v2972_v56 }
  0x79   :  { %v537_v31 = vsel %vm454_vm15, %v536_v25, %v535_v17  ;;  %v2533_v10 = vmin.u32 %v729_v20, %v3015_v33  ;;  %vm122_vm9 = vweird.f32 %v2783_v3  ;;  %vm336_vm10 = vcmp.eq.s32.totalorder %v3027_v16, 0 }
  0x7a   :  { %v540_v37 = vsel %vm453_vm0, %v2787_v5, %v537_v31  ;;  %v2655_v44 = vpop.eup %2654  ;;  %vm339_vm11 = vcmp.eq.s32.totalorder %v3027_v16, 2  ;;  %vm3045_vm12 = vcmp.le.f32.partialorder %v663_v15, 0.7853982  ;;  %vm335_vm13 = vcmp.lt.s32.totalorder %v3027_v16, 2 }
  0x7b   :  { %2662 = vcosq.f32 %v540_v37  ;;  %v731_v43 = vclz %v2533_v10  ;;  %v2657_v45 = vpop.eup %2656  ;;  %v129_v50 = vxor.u32 2147483648, %v2655_v44  ;;  %vm440_vm15 = vcmp.eq.s32.totalorder %v3031_v47, 0 }
  0x7c   :  { %2664 = vsinq.f32 %v540_v37  ;;  %v126_v19 = vxor.u32 2147483648, %v2657_v45  ;;  %v3052_v52 = vand.u32 3, %v541_v41  ;;  %vm443_vm0 = vcmp.eq.s32.totalorder %v3031_v47, 2 }
  0x7d   :  { %v2534_v46 = vadd.s32 4294967294, %v731_v43  ;;  %v2659_v14 = vpop.eup %2658  ;;  %v3056_v56 = vand.u32 3, %v648_v49  ;;  %v749_v59 = vsub.s32 4, %v3002_v26  ;;  %v130_v61 = vsel %vm128_vm4, %v129_v50, %v2657_v45 }
  0x7e   :  { %v2661_v54 = vpop.eup %2660  ;;  %v234_v62 = vsel %vm232_vm7, %v129_v50, %v2657_v45  ;;  %v340_v58 = vxor.u32 2147483648, %v2659_v14  ;;  %v127_v0 = vsel %vm125_vm2, %v2655_v44, %v126_v19  ;;  %v231_v1 = vsel %vm229_vm6, %v2655_v44, %v126_v19 }
  0x7f   :  { %vm2535_vm8 = vcmp.lt.s32.totalorder %v2534_v46, 0  ;;  %v337_v2 = vxor.u32 2147483648, %v2661_v54  ;;  %vm547_vm4 = vcmp.eq.s32.totalorder %v3052_v52, 0  ;;  %vm550_vm14 = vcmp.eq.s32.totalorder %v3052_v52, 2 }
  0x80   :  { %v734_v42 = vsel %vm2535_vm8, 0, %v2534_v46  ;;  %vm546_vm8 = vcmp.lt.s32.totalorder %v3052_v52, 2  ;;  %vm650_vm7 = vcmp.lt.s32.totalorder %v3056_v56, 2  ;;  %vm651_vm2 = vcmp.eq.s32.totalorder %v3056_v56, 0 }
  0x81   :  { %v735_v55 = vsub.s32 32, %v734_v42  ;;  %v736_v57 = vshll.u32 %v3015_v33, %v734_v42  ;;  %v739_v15 = vsub.s32 4294967266, %v734_v42  ;;  %v750_v12 = vsel %vm665_vm3, %v749_v59, %v3002_v26 }
  0x82   :  { %v131_v34 = vsel %vm124_vm1, %v127_v0, %v130_v61  ;;  %v235_v17 = vsel %vm228_vm5, %v231_v1, %v234_v62  ;;  %v341_v6 = vsel %vm339_vm11, %v340_v58, %v2661_v54  ;;  %vm654_vm6 = vcmp.eq.s32.totalorder %v3056_v56, 2 }
  0x83   :  { %v737_v63 = vshrl.u32 %v719_v51, %v735_v55  ;;  %v740_v39 = vadd.s32 127, %v739_v15  ;;  %v338_v18 = vsel %vm336_vm10, %v2659_v14, %v337_v2  ;;  %v445_v21 = vsel %vm443_vm0, %v340_v58, %v2661_v54 }
  0x84   :  { %v442_v24 = vsel %vm440_vm15, %v2659_v14, %v337_v2  ;;  %v752_v60 = vsel %vm3045_vm12, 0, %v750_v12  ;;  %v132_v8 = vsel %vm122_vm9, nan, %v131_v34  ;;  %v236_v36 = vsel %vm122_vm9, nan, %v235_v17 }
  0x85   :  { %v2663_v30 = vpop.eup %2662  ;;  %v738_v7 = vor.u32 %v737_v63, %v736_v57  ;;  %v741_v11 = vshll.u32 %v740_v39, 23  ;;  %vm333_vm1 = vweird.f32 %v2785_v4  ;;  %v3116_v38 = vstv %s3063_s1  ;;  %s3210_s1 = sld [smem:[#allocation3 + $0x22]] }
  0x86   :  { %v2665_v9 = vpop.eup %2664  ;;  %v551_v26 = vxor.u32 2147483648, %v2663_v30  ;;  %v342_v31 = vsel %vm335_vm13, %v338_v18, %v341_v6  ;;  %vm6051_vm5 = vcmp.lt.s32.totalorder %v3031_v47, 2  ;;  %v859_v48 = vadd.s32 3, %v752_v60 }
  0x87   :  { %v742_v22 = vor.u32 4788187, %v741_v11  ;;  %v745_v23 = vcvt.s32.f32 %v738_v7  ;;  %v548_v25 = vxor.u32 2147483648, %v2665_v9  ;;  %v446_v33 = vsel %vm6051_vm5, %v442_v24, %v445_v21 }
  0x88   :  { %v552_v20 = vsel %vm550_vm14, %v551_v26, %v2665_v9  ;;  %v656_v37 = vsel %vm654_vm6, %v551_v26, %v2665_v9  ;;  %v3143_v27 = vstv %s3072_s4  ;;  %v3146_v10 = vmul.f32 0.0, %v3116_v38  ;;  %s3212_s4 = sld [smem:[#allocation3 + $0x32]] }
  0x89   :  { %v743_v29 = vand.u32 2147483647, %v742_v22  ;;  %v549_v3 = vsel %vm547_vm4, %v2663_v30, %v548_v25  ;;  %v653_v35 = vsel %vm651_vm2, %v2663_v30, %v548_v25  ;;  %v343_v32 = vsel %vm333_vm1, nan, %v342_v31 }
  0x8a   :  { %v447_v41 = vsel %vm333_vm1, nan, %v446_v33  ;;  %vm544_vm9 = vweird.f32 %v2787_v5  ;;  %v553_v43 = vsel %vm546_vm8, %v549_v3, %v552_v20  ;;  %v657_v44 = vsel %vm650_vm7, %v653_v35, %v656_v37 }
  0x8b   :  { %v746_v40 = vmul.f32 %v745_v23, %v743_v29  ;;  %v3167_v45 = vand.u32 3, %v752_v60  ;;  %v3176_v47 = vand.u32 3, %v859_v48  ;;  %v3179_v46 = vmul.f32 0.0, %v3143_v27 }
  0x8c   :  { %v3182_v49 = vstv %s3079_s5  ;;  %v870_v50 = vmul.f32 %v343_v32, %v132_v8  ;;  %v880_v51 = vmul.f32 %v447_v41, %v132_v8  ;;  %v3189_v14 = vstv %s3088_s6  ;;  %s3223_s5 = sld [smem:[#allocation3 + $0x23]] }
  0x8d   :  { %v747_v28 = vxor.u32 2147483648, %v746_v40  ;;  %v554_v19 = vsel %vm544_vm9, nan, %v553_v43  ;;  %v658_v53 = vsel %vm544_vm9, nan, %v657_v44  ;;  %v890_v42 = vmul.f32 %v343_v32, %v236_v36  ;;  %s3225_s6 = sld [smem:[#allocation3 + $0x33]] }
  0x8e   :  { %v900_v54 = vmul.f32 %v447_v41, %v236_v36  ;;  %v3205_v52 = vstv %s3090_s7  ;;  %v3208_v55 = vstv %s3096_s8  ;;  %vm758_vm10 = vcmp.eq.s32.totalorder %v3167_v45, 0  ;;  %s3235_s7 = sld [smem:[#allocation3 + $0x24]] }
  0x8f   :  { %v748_v16 = vsel %vm665_vm3, %v747_v28, %v746_v40  ;;  %vm761_vm3 = vcmp.eq.s32.totalorder %v3167_v45, 2  ;;  %vm862_vm11 = vcmp.eq.s32.totalorder %v3176_v47, 0  ;;  %v3218_v5 = vstv %s3098_s9  ;;  %s3237_s8 = sld [smem:[#allocation3 + $0x34]]  ;;  %s3248_s9 = sld [smem:[#allocation3 + $0x25]] }
  0x90   :  { %v751_v4 = vsel %vm3045_vm12, %v2884_v13, %v748_v16  ;;  %vm865_vm12 = vcmp.eq.s32.totalorder %v3176_v47, 2  ;;  %v3221_v57 = vstv %s3104_s10  ;;  %vm757_vm13 = vcmp.lt.s32.totalorder %v3167_v45, 2  ;;  %s3250_s10 = sld [smem:[#allocation3 + $0x35]] }
  0x91   :  { %2666 = vcosq.f32 %v751_v4  ;;  %vm861_vm14 = vcmp.lt.s32.totalorder %v3176_v47, 2  ;;  %v3229_v56 = vmul.f32 %v870_v50, %v554_v19  ;;  %v3231_v15 = vmul.f32 %v870_v50, %v658_v53 }
  0x92   :  { %2668 = vsinq.f32 %v751_v4  ;;  %v1280_v59 = vstv %s3106_s11  ;;  %v1282_v61 = vstv %s3108_s12  ;;  %vm755_vm15 = vweird.f32 %v2884_v13  ;;  %s4539_s12 = sld [smem:[#allocation3 + $0xe]] }
  0x93   :  { %v3240_v62 = vmul.f32 %v880_v51, %v554_v19  ;;  %v3242_v58 = vmul.f32 %v880_v51, %v658_v53  ;;  %v3244_v63 = vmul.f32 %v890_v42, %v554_v19  ;;  %v3246_v0 = vmul.f32 %v890_v42, %v658_v53 }
  0x94   :  { %v3252_v1 = vmul.f32 %v900_v54, %v554_v19  ;;  %v3254_v2 = vmul.f32 %v900_v54, %v658_v53  ;;  %v1290_v39 = vstv %s3118_s13  ;;  %v1292_v30 = vstv %s3120_s14  ;;  %s3268_s13 = sld [smem:[#allocation3 + $0x37]]  ;;  %s3274_s14 = sld [smem:[#allocation3 + $0x8]] }
  0x95   :  { %v1300_v7 = vstv %s3126_s15  ;;  %v1302_v9 = vstv %s3128_s16  ;;  %v1310_v11 = vstv %s3138_s17  ;;  %v1312_v12 = vstv %s3140_s18  ;;  %s3276_s16 = sld [smem:[#allocation3 + $0xc]]  ;;  %s4745_s15 = sld [smem:[#allocation3 + $0xf]] }
  0x96   :  { %v1320_v34 = vstv %s3148_s19  ;;  %v1322_v17 = vstv %s3150_s20  ;;  %v1330_v6 = vstv %s3157_s21  ;;  %s4941_s17 = sld [smem:[#allocation3 + $0x38]]  ;;  %s4961_s19 = sld [smem:[#allocation3 + $0x39]] }
  0x97   :  { %s4943_s18 = sld [smem:[#allocation3 + $0x48]]  ;;  %s4963_s20 = sld [smem:[#allocation3 + $0x49]] }
  0x98   :  { %s4981_s21 = sld [smem:[#allocation3 + $0x3a]] }
  0x9a   :  { %6053 = sst [smem:[#allocation14_spill]] %s3268_s13  ;;  %s4735_s13 = sld [smem:[#allocation3 + $0xb]] }
  0x9b   :  { %v2667_v25 = vpop.eup %2666  ;;  %v3318_v43 = vstv %s3276_s16  ;;  %s6086_s11 = sld [smem:[#allocation14_spill]]  ;;  %s5119_s16 = sld [smem:[#allocation3 + $0x53]] }
  0x9c   :  { %v2669_v36 = vpop.eup %2668  ;;  %v762_v31 = vxor.u32 2147483648, %v2667_v25 }
  0x9d   :  { %v759_v3 = vxor.u32 2147483648, %v2669_v36 }
  0x9e   :  { %v763_v28 = vsel %vm761_vm3, %v762_v31, %v2669_v36  ;;  %v867_v32 = vsel %vm865_vm12, %v762_v31, %v2669_v36  ;;  %v3315_v31 = vstv %s3274_s14  ;;  %s5117_s14 = sld [smem:[#allocation3 + $0x43]] }
  0x9f   :  { %v760_v44 = vsel %vm758_vm10, %v2667_v25, %v759_v3  ;;  %v864_v16 = vsel %vm862_vm11, %v2667_v25, %v759_v3 }
  0xa0   :  { %v764_v51 = vsel %vm757_vm13, %v760_v44, %v763_v28  ;;  %v868_v19 = vsel %vm861_vm14, %v864_v16, %v867_v32 }
  0xa1   :  { %v765_v54 = vsel %vm755_vm15, nan, %v764_v51  ;;  %v869_v36 = vsel %vm755_vm15, nan, %v868_v19 }
  0xa2   :  { %v872_v25 = vmul.f32 %v3229_v56, %v765_v54  ;;  %v873_v45 = vmul.f32 %v3229_v56, %v869_v36  ;;  %v876_v3 = vmul.f32 %v3231_v15, %v765_v54  ;;  %v878_v47 = vmul.f32 %v3231_v15, %v869_v36 }
  0xa3   :  { %v882_v28 = vmul.f32 %v3240_v62, %v765_v54  ;;  %v884_v32 = vmul.f32 %v3240_v62, %v869_v36  ;;  %v3327_v44 = vmul.f32 %v3242_v58, %v765_v54  ;;  %v3330_v13 = vmul.f32 %v3242_v58, %v869_v36 }
  0xa4   :  { %v874_v16 = vsub.f32 0.0, %v873_v45  ;;  %v877_v51 = vsub.f32 0.0, %v876_v3  ;;  %v879_v19 = vsub.f32 0.0, %v878_v47  ;;  %v892_v42 = vmul.f32 %v3244_v63, %v765_v54 }
  0xa5   :  { %v883_v56 = vsub.f32 0.0, %v882_v28  ;;  %v885_v53 = vsub.f32 0.0, %v884_v32  ;;  %v888_v50 = vsub.f32 0.0, %v3327_v44  ;;  %v894_v15 = vmul.f32 %v3244_v63, %v869_v36 }
  0xa6   :  { %v893_v4 = vsub.f32 0.0, %v892_v42  ;;  %v897_v62 = vmul.f32 %v3246_v0, %v765_v54  ;;  %v899_v41 = vmul.f32 %v3246_v0, %v869_v36  ;;  %v902_v37 = vmul.f32 %v3252_v1, %v765_v54 }
  0xa7   :  { %v895_v58 = vsub.f32 0.0, %v894_v15  ;;  %v904_v45 = vmul.f32 %v3252_v1, %v869_v36  ;;  %v906_v3 = vmul.f32 %v3254_v2, %v765_v54  ;;  %v907_v47 = vmul.f32 %v3254_v2, %v869_v36 }
  0xa8   :  { %v898_v28 = vsub.f32 0.0, %v897_v62  ;;  %v903_v32 = vsub.f32 0.0, %v902_v37  ;;  %v911_v44 = vmul.f32 %v3143_v27, %v872_v25  ;;  %v915_v63 = vmul.f32 %v3116_v38, %v872_v25 }
  0xa9   :  { %v918_v42 = vmul.f32 %v3116_v38, %v893_v4  ;;  %v920_v35 = vmul.f32 %v3143_v27, %v893_v4  ;;  %v922_v0 = vmul.f32 %v3116_v38, %v895_v58  ;;  %v924_v15 = vmul.f32 %v3143_v27, %v895_v58 }
  0xaa   :  { %v914_v1 = vsub.f32 %v911_v44, %v3146_v10  ;;  %v3349_v54 = vadd.f32 %v3179_v46, %v915_v63  ;;  %v926_v2 = vmul.f32 %v3143_v27, %v874_v16  ;;  %v928_v37 = vmul.f32 %v3116_v38, %v874_v16 }
  0xab   :  { %v919_v36 = vsub.f32 %v3179_v46, %v918_v42  ;;  %v3355_v25 = vadd.f32 %v920_v35, %v3146_v10  ;;  %v3358_v4 = vsub.f32 %v3179_v46, %v922_v0  ;;  %v3361_v62 = vadd.f32 %v924_v15, %v3146_v10 }
  0xac   :  { %v3364_v58 = vsub.f32 %v926_v2, %v3146_v10  ;;  %v3367_v44 = vadd.f32 %v928_v37, %v3179_v46  ;;  %v930_v63 = vmul.f32 %v3116_v38, %v898_v28  ;;  %v932_v16 = vmul.f32 %v3143_v27, %v898_v28 }
  0xad   :  { %v934_v42 = vmul.f32 %v3143_v27, %v877_v51  ;;  %v936_v35 = vmul.f32 %v3116_v38, %v877_v51  ;;  %v938_v0 = vmul.f32 %v3143_v27, %v879_v19  ;;  %v940_v20 = vmul.f32 %v3116_v38, %v879_v19 }
  0xae   :  { %v3376_v15 = vsub.f32 %v3179_v46, %v930_v63  ;;  %v3379_v2 = vadd.f32 %v932_v16, %v3146_v10  ;;  %v942_v37 = vmul.f32 %v3116_v38, %v899_v41  ;;  %v944_v48 = vmul.f32 %v3143_v27, %v899_v41 }
  0xaf   :  { %v3384_v28 = vsub.f32 %v934_v42, %v3146_v10  ;;  %v3387_v40 = vadd.f32 %v936_v35, %v3179_v46  ;;  %v3390_v51 = vsub.f32 %v938_v0, %v3146_v10  ;;  %v3393_v19 = vadd.f32 %v940_v20, %v3179_v46 }
  0xb0   :  { %v3396_v63 = vsub.f32 %v3179_v46, %v942_v37  ;;  %v3399_v16 = vadd.f32 %v944_v48, %v3146_v10  ;;  %v946_v41 = vmul.f32 %v3116_v38, %v903_v32  ;;  %v948_v42 = vmul.f32 %v3143_v27, %v903_v32 }
  0xb1   :  { %v950_v33 = vmul.f32 %v3143_v27, %v883_v56  ;;  %v952_v35 = vmul.f32 %v3116_v38, %v883_v56  ;;  %v954_v0 = vmul.f32 %v3143_v27, %v885_v53  ;;  %v956_v8 = vmul.f32 %v3116_v38, %v885_v53 }
  0xb2   :  { %v947_v20 = vsub.f32 %v3179_v46, %v946_v41  ;;  %v3409_v37 = vadd.f32 %v948_v42, %v3146_v10  ;;  %v958_v48 = vmul.f32 %v3116_v38, %v904_v45  ;;  %v960_v29 = vmul.f32 %v3143_v27, %v904_v45 }
  0xb3   :  { %v951_v60 = vsub.f32 %v950_v33, %v3146_v10  ;;  %v3415_v32 = vadd.f32 %v952_v35, %v3179_v46  ;;  %v955_v56 = vsub.f32 %v954_v0, %v3146_v10  ;;  %v3419_v26 = vadd.f32 %v956_v8, %v3179_v46 }
  0xb4   :  { %v959_v53 = vsub.f32 %v3179_v46, %v958_v48  ;;  %v3423_v41 = vadd.f32 %v960_v29, %v3146_v10  ;;  %v962_v42 = vmul.f32 %v3143_v27, %v888_v50  ;;  %v964_v24 = vmul.f32 %v3116_v38, %v888_v50 }
  0xb5   :  { %v966_v45 = vmul.f32 %v3116_v38, %v906_v3  ;;  %v968_v33 = vmul.f32 %v3143_v27, %v906_v3  ;;  %v970_v35 = vmul.f32 %v3116_v38, %v907_v47  ;;  %v972_v0 = vmul.f32 %v3143_v27, %v907_v47 }
  0xb6   :  { %v963_v8 = vsub.f32 %v962_v42, %v3146_v10  ;;  %v3433_v23 = vadd.f32 %v964_v24, %v3179_v46  ;;  %v974_v29 = vmul.f32 %v3143_v27, %v3330_v13  ;;  %v976_v48 = vmul.f32 %v3116_v38, %v3330_v13 }
  0xb7   :  { %v967_v50 = vsub.f32 %v3179_v46, %v966_v45  ;;  %v3441_v22 = vadd.f32 %v968_v33, %v3146_v10  ;;  %v971_v3 = vsub.f32 %v3179_v46, %v970_v35  ;;  %v3445_v47 = vadd.f32 %v972_v0, %v3146_v10 }
  0xb8   :  { %v975_v42 = vsub.f32 %v974_v29, %v3146_v10  ;;  %v3449_v24 = vadd.f32 %v976_v48, %v3179_v46  ;;  %v981_v27 = vmul.f32 %v3182_v49, %v914_v1  ;;  %v983_v21 = vmul.f32 %v3189_v14, %v947_v20 }
  0xb9   :  { %v985_v38 = vmul.f32 %v3189_v14, %v914_v1  ;;  %v986_v13 = vmul.f32 %v3182_v49, %v947_v20  ;;  %v988_v45 = vmul.f32 %v3182_v49, %v919_v36  ;;  %v989_v33 = vmul.f32 %v3189_v14, %v951_v60 }
  0xba   :  { %v3457_v35 = vsub.f32 %v981_v27, %v983_v21  ;;  %v991_v0 = vmul.f32 %v3189_v14, %v919_v36  ;;  %v992_v10 = vmul.f32 %v3182_v49, %v951_v60  ;;  %v994_v46 = vmul.f32 %v3182_v49, %v3358_v4 }
  0xbb   :  { %v3463_v29 = vadd.f32 %v986_v13, %v985_v38  ;;  %v3465_v48 = vsub.f32 %v988_v45, %v989_v33  ;;  %v995_v1 = vmul.f32 %v3189_v14, %v955_v56  ;;  %v997_v20 = vmul.f32 %v3189_v14, %v3358_v4 }
  0xbc   :  { %v3470_v18 = vadd.f32 %v992_v10, %v991_v0  ;;  %v998_v21 = vmul.f32 %v3182_v49, %v955_v56  ;;  %v1000_v36 = vmul.f32 %v3182_v49, %v3364_v58  ;;  %v1001_v60 = vmul.f32 %v3189_v14, %v959_v53 }
  0xbd   :  { %v3476_v27 = vsub.f32 %v994_v46, %v995_v1  ;;  %v1003_v38 = vmul.f32 %v3189_v14, %v3364_v58  ;;  %v1004_v13 = vmul.f32 %v3182_v49, %v959_v53  ;;  %v1006_v45 = vmul.f32 %v3182_v49, %v3376_v15 }
  0xbe   :  { %v3483_v4 = vadd.f32 %v998_v21, %v997_v20  ;;  %v3485_v33 = vsub.f32 %v1000_v36, %v1001_v60  ;;  %v1007_v56 = vmul.f32 %v3189_v14, %v963_v8  ;;  %v1009_v0 = vmul.f32 %v3189_v14, %v3376_v15 }
  0xbf   :  { %v3490_v10 = vadd.f32 %v1004_v13, %v1003_v38  ;;  %v1010_v46 = vmul.f32 %v3182_v49, %v963_v8  ;;  %v1012_v58 = vmul.f32 %v3182_v49, %v3384_v28  ;;  %v1013_v53 = vmul.f32 %v3189_v14, %v967_v50 }
  0xc0   :  { %v3496_v1 = vsub.f32 %v1006_v45, %v1007_v56  ;;  %v1015_v20 = vmul.f32 %v3189_v14, %v3384_v28  ;;  %v1016_v21 = vmul.f32 %v3182_v49, %v967_v50  ;;  %v1018_v36 = vmul.f32 %v3182_v49, %v3390_v51 }
  0xc1   :  { %v3503_v15 = vadd.f32 %v1010_v46, %v1009_v0  ;;  %v3505_v60 = vsub.f32 %v1012_v58, %v1013_v53  ;;  %v1019_v8 = vmul.f32 %v3189_v14, %v971_v3  ;;  %v1021_v38 = vmul.f32 %v3189_v14, %v3390_v51 }
  0xc2   :  { %v3510_v13 = vadd.f32 %v1016_v21, %v1015_v20  ;;  %v1022_v45 = vmul.f32 %v3182_v49, %v971_v3  ;;  %v1024_v28 = vmul.f32 %v3182_v49, %v3396_v63  ;;  %v1025_v50 = vmul.f32 %v3189_v14, %v975_v42 }
  0xc3   :  { %v3516_v56 = vsub.f32 %v1018_v36, %v1019_v8  ;;  %v1027_v0 = vmul.f32 %v3189_v14, %v3396_v63  ;;  %v1028_v46 = vmul.f32 %v3182_v49, %v975_v42  ;;  %v1030_v58 = vmul.f32 %v3182_v49, %v3349_v54 }
  0xc4   :  { %v3523_v51 = vadd.f32 %v1022_v45, %v1021_v38  ;;  %v3525_v53 = vsub.f32 %v1024_v28, %v1025_v50  ;;  %v1031_v3 = vmul.f32 %v3189_v14, %v3409_v37  ;;  %v1033_v20 = vmul.f32 %v3189_v14, %v3349_v54 }
  0xc5   :  { %v3531_v21 = vadd.f32 %v1028_v46, %v1027_v0  ;;  %v1034_v63 = vmul.f32 %v3182_v49, %v3409_v37  ;;  %v1036_v42 = vmul.f32 %v3182_v49, %v3355_v25  ;;  %v1037_v36 = vmul.f32 %v3189_v14, %v3415_v32 }
  0xc6   :  { %v3539_v8 = vsub.f32 %v1030_v58, %v1031_v3  ;;  %v1039_v38 = vmul.f32 %v3189_v14, %v3355_v25  ;;  %v1040_v45 = vmul.f32 %v3182_v49, %v3415_v32  ;;  %v1042_v54 = vmul.f32 %v3182_v49, %v3361_v62 }
  0xc7   :  { %v3547_v28 = vadd.f32 %v1034_v63, %v1033_v20  ;;  %v3549_v37 = vsub.f32 %v1036_v42, %v1037_v36  ;;  %v1043_v50 = vmul.f32 %v3189_v14, %v3419_v26  ;;  %v1045_v0 = vmul.f32 %v3189_v14, %v3361_v62 }
  0xc8   :  { %v3555_v46 = vadd.f32 %v1040_v45, %v1039_v38  ;;  %v1046_v25 = vmul.f32 %v3182_v49, %v3419_v26  ;;  %v1048_v32 = vmul.f32 %v3182_v49, %v3367_v44  ;;  %v1049_v58 = vmul.f32 %v3189_v14, %v3423_v41 }
  0xc9   :  { %v3563_v3 = vsub.f32 %v1042_v54, %v1043_v50  ;;  %v1051_v20 = vmul.f32 %v3189_v14, %v3367_v44  ;;  %v1052_v63 = vmul.f32 %v3182_v49, %v3423_v41  ;;  %v1054_v62 = vmul.f32 %v3182_v49, %v3379_v2 }
  0xca   :  { %v3571_v42 = vadd.f32 %v1046_v25, %v1045_v0  ;;  %v3573_v26 = vsub.f32 %v1048_v32, %v1049_v58  ;;  %v1055_v36 = vmul.f32 %v3189_v14, %v3433_v23  ;;  %v1057_v38 = vmul.f32 %v3189_v14, %v3379_v2 }
  0xcb   :  { %v3579_v45 = vadd.f32 %v1052_v63, %v1051_v20  ;;  %v1058_v44 = vmul.f32 %v3182_v49, %v3433_v23  ;;  %v1060_v41 = vmul.f32 %v3182_v49, %v3387_v40  ;;  %v1061_v54 = vmul.f32 %v3189_v14, %v3441_v22 }
  0xcc   :  { %v3587_v50 = vsub.f32 %v1054_v62, %v1055_v36  ;;  %v1063_v0 = vmul.f32 %v3189_v14, %v3387_v40  ;;  %v1064_v25 = vmul.f32 %v3182_v49, %v3441_v22  ;;  %v1066_v2 = vmul.f32 %v3182_v49, %v3393_v19 }
  0xcd   :  { %v3595_v32 = vadd.f32 %v1058_v44, %v1057_v38  ;;  %v3597_v23 = vsub.f32 %v1060_v41, %v1061_v54  ;;  %v1067_v58 = vmul.f32 %v3189_v14, %v3445_v47  ;;  %v1069_v20 = vmul.f32 %v3189_v14, %v3393_v19 }
  0xce   :  { %v3603_v63 = vadd.f32 %v1064_v25, %v1063_v0  ;;  %v1070_v40 = vmul.f32 %v3182_v49, %v3445_v47  ;;  %v1072_v22 = vmul.f32 %v3182_v49, %v3399_v16  ;;  %v1073_v62 = vmul.f32 %v3189_v14, %v3449_v24 }
  0xcf   :  { %v3611_v36 = vsub.f32 %v1066_v2, %v1067_v58  ;;  %v1075_v38 = vmul.f32 %v3189_v14, %v3399_v16  ;;  %v1076_v44 = vmul.f32 %v3182_v49, %v3449_v24  ;;  %v1081_v19 = vmul.f32 %v3205_v52, %v3457_v35 }
  0xd0   :  { %v3619_v41 = vadd.f32 %v1070_v40, %v1069_v20  ;;  %v3621_v47 = vsub.f32 %v1072_v22, %v1073_v62  ;;  %v1083_v54 = vmul.f32 %v3208_v55, %v3496_v1  ;;  %v1085_v0 = vmul.f32 %v3208_v55, %v3457_v35 }
  0xd1   :  { %v3627_v25 = vadd.f32 %v1076_v44, %v1075_v38  ;;  %v1086_v14 = vmul.f32 %v3205_v52, %v3496_v1  ;;  %v1088_v49 = vmul.f32 %v3205_v52, %v3465_v48  ;;  %v1089_v16 = vmul.f32 %v3208_v55, %v3505_v60 }
  0xd2   :  { %v3635_v24 = vsub.f32 %v1081_v19, %v1083_v54  ;;  %v1091_v2 = vmul.f32 %v3208_v55, %v3465_v48  ;;  %v1092_v58 = vmul.f32 %v3205_v52, %v3505_v60  ;;  %v1094_v35 = vmul.f32 %v3205_v52, %v3476_v27 }
  0xd3   :  { %v3643_v20 = vadd.f32 %v1086_v14, %v1085_v0  ;;  %v3645_v1 = vsub.f32 %v1088_v49, %v1089_v16  ;;  %v1095_v40 = vmul.f32 %v3208_v55, %v3516_v56  ;;  %v1097_v22 = vmul.f32 %v3208_v55, %v3476_v27 }
  0xd4   :  { %v3651_v62 = vadd.f32 %v1092_v58, %v1091_v2  ;;  %v1098_v48 = vmul.f32 %v3205_v52, %v3516_v56  ;;  %v1100_v60 = vmul.f32 %v3205_v52, %v3485_v33  ;;  %v1101_v38 = vmul.f32 %v3208_v55, %v3525_v53 }
  0xd5   :  { %v3659_v44 = vsub.f32 %v1094_v35, %v1095_v40  ;;  %v1103_v19 = vmul.f32 %v3208_v55, %v3485_v33  ;;  %v1104_v54 = vmul.f32 %v3205_v52, %v3525_v53  ;;  %v1106_v27 = vmul.f32 %v3205_v52, %v3463_v29 }
  0xd6   :  { %v3667_v0 = vadd.f32 %v1098_v48, %v1097_v22  ;;  %v3669_v56 = vsub.f32 %v1100_v60, %v1101_v38  ;;  %v1107_v14 = vmul.f32 %v3208_v55, %v3503_v15  ;;  %v1109_v49 = vmul.f32 %v3208_v55, %v3463_v29 }
  0xd7   :  { %v3675_v16 = vadd.f32 %v1104_v54, %v1103_v19  ;;  %v1110_v33 = vmul.f32 %v3205_v52, %v3503_v15  ;;  %v1112_v53 = vmul.f32 %v3205_v52, %v3470_v18  ;;  %v1113_v2 = vmul.f32 %v3208_v55, %v3510_v13 }
  0xd8   :  { %v3683_v58 = vsub.f32 %v1106_v27, %v1107_v14  ;;  %v1115_v35 = vmul.f32 %v3208_v55, %v3470_v18  ;;  %v1116_v40 = vmul.f32 %v3205_v52, %v3510_v13  ;;  %v1118_v29 = vmul.f32 %v3205_v52, %v3483_v4 }
  0xd9   :  { %v3691_v22 = vadd.f32 %v1110_v33, %v1109_v49  ;;  %v3693_v15 = vsub.f32 %v1112_v53, %v1113_v2  ;;  %v1119_v48 = vmul.f32 %v3208_v55, %v3523_v51  ;;  %v1121_v60 = vmul.f32 %v3208_v55, %v3483_v4 }
  0xda   :  { %v3699_v38 = vadd.f32 %v1116_v40, %v1115_v35  ;;  %v1122_v18 = vmul.f32 %v3205_v52, %v3523_v51  ;;  %v1124_v13 = vmul.f32 %v3205_v52, %v3490_v10  ;;  %v1125_v19 = vmul.f32 %v3208_v55, %v3531_v21 }
  0xdb   :  { %v3707_v54 = vsub.f32 %v1118_v29, %v1119_v48  ;;  %v1127_v27 = vmul.f32 %v3208_v55, %v3490_v10  ;;  %v1128_v14 = vmul.f32 %v3205_v52, %v3531_v21  ;;  %v1130_v4 = vmul.f32 %v3205_v52, %v3539_v8 }
  0xdc   :  { %v3715_v49 = vadd.f32 %v1122_v18, %v1121_v60  ;;  %v3717_v51 = vsub.f32 %v1124_v13, %v1125_v19  ;;  %v1131_v33 = vmul.f32 %v3208_v55, %v3587_v50  ;;  %v1133_v53 = vmul.f32 %v3208_v55, %v3539_v8 }
  0xdd   :  { %v3723_v2 = vadd.f32 %v1128_v14, %v1127_v27  ;;  %v1134_v10 = vmul.f32 %v3205_v52, %v3587_v50  ;;  %v1136_v21 = vmul.f32 %v3205_v52, %v3549_v37  ;;  %v1137_v35 = vmul.f32 %v3208_v55, %v3597_v23 }
  0xde   :  { %v3731_v40 = vsub.f32 %v1130_v4, %v1131_v33  ;;  %v1139_v29 = vmul.f32 %v3208_v55, %v3549_v37  ;;  %v1140_v48 = vmul.f32 %v3205_v52, %v3597_v23  ;;  %v1142_v8 = vmul.f32 %v3205_v52, %v3563_v3 }
  0xdf   :  { %v3739_v60 = vadd.f32 %v1134_v10, %v1133_v53  ;;  %v3741_v50 = vsub.f32 %v1136_v21, %v1137_v35  ;;  %v1143_v18 = vmul.f32 %v3208_v55, %v3611_v36  ;;  %v1145_v13 = vmul.f32 %v3208_v55, %v3563_v3 }
  0xe0   :  { %v3747_v19 = vadd.f32 %v1140_v48, %v1139_v29  ;;  %v1146_v37 = vmul.f32 %v3205_v52, %v3611_v36  ;;  %v1148_v23 = vmul.f32 %v3205_v52, %v3573_v26  ;;  %v1149_v27 = vmul.f32 %v3208_v55, %v3621_v47 }
  0xe1   :  { %v3755_v14 = vsub.f32 %v1142_v8, %v1143_v18  ;;  %v1151_v4 = vmul.f32 %v3208_v55, %v3573_v26  ;;  %v1152_v33 = vmul.f32 %v3205_v52, %v3621_v47  ;;  %v1154_v3 = vmul.f32 %v3205_v52, %v3547_v28 }
  0xe2   :  { %v3763_v53 = vadd.f32 %v1146_v37, %v1145_v13  ;;  %v3765_v36 = vsub.f32 %v1148_v23, %v1149_v27  ;;  %v1155_v10 = vmul.f32 %v3208_v55, %v3595_v32  ;;  %v1157_v21 = vmul.f32 %v3208_v55, %v3547_v28 }
  0xe3   :  { %v3771_v35 = vadd.f32 %v1152_v33, %v1151_v4  ;;  %v1158_v26 = vmul.f32 %v3205_v52, %v3595_v32  ;;  %v1160_v47 = vmul.f32 %v3205_v52, %v3555_v46  ;;  %v1161_v29 = vmul.f32 %v3208_v55, %v3603_v63 }
  0xe4   :  { %v3779_v48 = vsub.f32 %v1154_v3, %v1155_v10  ;;  %v1163_v8 = vmul.f32 %v3208_v55, %v3555_v46  ;;  %v1164_v18 = vmul.f32 %v3205_v52, %v3603_v63  ;;  %v1166_v28 = vmul.f32 %v3205_v52, %v3571_v42 }
  0xe5   :  { %v3787_v13 = vadd.f32 %v1158_v26, %v1157_v21  ;;  %v3789_v32 = vsub.f32 %v1160_v47, %v1161_v29  ;;  %v1167_v37 = vmul.f32 %v3208_v55, %v3619_v41  ;;  %v1169_v23 = vmul.f32 %v3208_v55, %v3571_v42 }
  0xe6   :  { %v3795_v27 = vadd.f32 %v1164_v18, %v1163_v8  ;;  %v1170_v46 = vmul.f32 %v3205_v52, %v3619_v41  ;;  %v1172_v63 = vmul.f32 %v3205_v52, %v3579_v45  ;;  %v1173_v4 = vmul.f32 %v3208_v55, %v3627_v25 }
  0xe7   :  { %v3803_v33 = vsub.f32 %v1166_v28, %v1167_v37  ;;  %v1175_v3 = vmul.f32 %v3208_v55, %v3579_v45  ;;  %v1176_v10 = vmul.f32 %v3205_v52, %v3627_v25  ;;  %v1181_v42 = vmul.f32 %v3218_v5, %v3635_v24 }
  0xe8   :  { %v3811_v21 = vadd.f32 %v1170_v46, %v1169_v23  ;;  %v3813_v41 = vsub.f32 %v1172_v63, %v1173_v4  ;;  %v1183_v26 = vmul.f32 %v3221_v57, %v3659_v44  ;;  %v1185_v47 = vmul.f32 %v3221_v57, %v3635_v24 }
  0xe9   :  { %v3819_v29 = vadd.f32 %v1176_v10, %v1175_v3  ;;  %v1186_v55 = vmul.f32 %v3218_v5, %v3659_v44  ;;  %v1188_v52 = vmul.f32 %v3218_v5, %v3645_v1  ;;  %v1189_v45 = vmul.f32 %v3221_v57, %v3669_v56 }
  0xea   :  { %v3827_v25 = vsub.f32 %v1181_v42, %v1183_v26  ;;  %v1191_v8 = vmul.f32 %v3221_v57, %v3645_v1  ;;  %v1192_v18 = vmul.f32 %v3218_v5, %v3669_v56  ;;  %v1194_v24 = vmul.f32 %v3218_v5, %v3643_v20 }
  0xeb   :  { %v3835_v28 = vadd.f32 %v1186_v55, %v1185_v47  ;;  %v3837_v44 = vsub.f32 %v1188_v52, %v1189_v45  ;;  %v1195_v37 = vmul.f32 %v3221_v57, %v3667_v0  ;;  %v1197_v23 = vmul.f32 %v3221_v57, %v3643_v20 }
  0xec   :  { %v3843_v46 = vadd.f32 %v1192_v18, %v1191_v8  ;;  %v1198_v1 = vmul.f32 %v3218_v5, %v3667_v0  ;;  %v1200_v56 = vmul.f32 %v3218_v5, %v3651_v62  ;;  %v1201_v63 = vmul.f32 %v3221_v57, %v3675_v16 }
  0xed   :  { %v3851_v4 = vsub.f32 %v1194_v24, %v1195_v37  ;;  %v1203_v3 = vmul.f32 %v3221_v57, %v3651_v62  ;;  %v1204_v10 = vmul.f32 %v3218_v5, %v3675_v16  ;;  %v1206_v20 = vmul.f32 %v3218_v5, %v3683_v58 }
  0xee   :  { %v3859_v42 = vadd.f32 %v1198_v1, %v1197_v23  ;;  %v3861_v0 = vsub.f32 %v1200_v56, %v1201_v63  ;;  %v1207_v26 = vmul.f32 %v3221_v57, %v3707_v54  ;;  %v1209_v47 = vmul.f32 %v3221_v57, %v3683_v58 }
  0xef   :  { %v3867_v55 = vadd.f32 %v1204_v10, %v1203_v3  ;;  %v1210_v62 = vmul.f32 %v3218_v5, %v3707_v54  ;;  %v1212_v16 = vmul.f32 %v3218_v5, %v3693_v15  ;;  %v1213_v52 = vmul.f32 %v3221_v57, %v3717_v51 }
  0xf0   :  { %v3875_v45 = vsub.f32 %v1206_v20, %v1207_v26  ;;  %v1215_v8 = vmul.f32 %v3221_v57, %v3693_v15  ;;  %v1216_v18 = vmul.f32 %v3218_v5, %v3717_v51  ;;  %v1218_v58 = vmul.f32 %v3218_v5, %v3691_v22 }
  0xf1   :  { %v3883_v24 = vadd.f32 %v1210_v62, %v1209_v47  ;;  %v3885_v54 = vsub.f32 %v1212_v16, %v1213_v52  ;;  %v1219_v37 = vmul.f32 %v3221_v57, %v3715_v49  ;;  %v1221_v23 = vmul.f32 %v3221_v57, %v3691_v22 }
  0xf2   :  { %v3891_v1 = vadd.f32 %v1216_v18, %v1215_v8  ;;  %v1222_v15 = vmul.f32 %v3218_v5, %v3715_v49  ;;  %v1224_v51 = vmul.f32 %v3218_v5, %v3699_v38  ;;  %v1225_v56 = vmul.f32 %v3221_v57, %v3723_v2 }
  0xf3   :  { %v3899_v63 = vsub.f32 %v1218_v58, %v1219_v37  ;;  %v1227_v3 = vmul.f32 %v3221_v57, %v3699_v38  ;;  %v1228_v10 = vmul.f32 %v3218_v5, %v3723_v2  ;;  %v1230_v22 = vmul.f32 %v3218_v5, %v3731_v40 }
  0xf4   :  { %v3907_v20 = vadd.f32 %v1222_v15, %v1221_v23  ;;  %v3909_v49 = vsub.f32 %v1224_v51, %v1225_v56  ;;  %v1231_v26 = vmul.f32 %v3221_v57, %v3755_v14  ;;  %v1233_v47 = vmul.f32 %v3221_v57, %v3731_v40 }
  0xf5   :  { %v3915_v62 = vadd.f32 %v1228_v10, %v1227_v3  ;;  %v1234_v38 = vmul.f32 %v3218_v5, %v3755_v14  ;;  %v1236_v2 = vmul.f32 %v3218_v5, %v3741_v50  ;;  %v1237_v16 = vmul.f32 %v3221_v57, %v3765_v36 }
  0xf6   :  { %v3923_v52 = vsub.f32 %v1230_v22, %v1231_v26  ;;  %v1239_v8 = vmul.f32 %v3221_v57, %v3741_v50  ;;  %v1240_v18 = vmul.f32 %v3218_v5, %v3765_v36  ;;  %v1242_v40 = vmul.f32 %v3218_v5, %v3739_v60 }
  0xf7   :  { %v3931_v58 = vadd.f32 %v1234_v38, %v1233_v47  ;;  %v3933_v14 = vsub.f32 %v1236_v2, %v1237_v16  ;;  %v1243_v37 = vmul.f32 %v3221_v57, %v3763_v53  ;;  %v1245_v23 = vmul.f32 %v3221_v57, %v3739_v60 }
  0xf8   :  { %v3939_v15 = vadd.f32 %v1240_v18, %v1239_v8  ;;  %v1246_v50 = vmul.f32 %v3218_v5, %v3763_v53  ;;  %v1248_v36 = vmul.f32 %v3218_v5, %v3747_v19  ;;  %v1249_v51 = vmul.f32 %v3221_v57, %v3771_v35 }
  0xf9   :  { %v3947_v56 = vsub.f32 %v1242_v40, %v1243_v37  ;;  %v1251_v3 = vmul.f32 %v3221_v57, %v3747_v19  ;;  %v1252_v10 = vmul.f32 %v3218_v5, %v3771_v35  ;;  %v1254_v60 = vmul.f32 %v3218_v5, %v3779_v48 }
  0xfa   :  { %v3955_v22 = vadd.f32 %v1246_v50, %v1245_v23  ;;  %v3957_v53 = vsub.f32 %v1248_v36, %v1249_v51  ;;  %v1255_v26 = vmul.f32 %v3221_v57, %v3803_v33  ;;  %v1257_v47 = vmul.f32 %v3221_v57, %v3779_v48 }
  0xfb   :  { %v3963_v38 = vadd.f32 %v1252_v10, %v1251_v3  ;;  %v1258_v19 = vmul.f32 %v3218_v5, %v3803_v33  ;;  %v1260_v35 = vmul.f32 %v3218_v5, %v3789_v32  ;;  %v1261_v2 = vmul.f32 %v3221_v57, %v3813_v41 }
  0xfc   :  { %v3971_v16 = vsub.f32 %v1254_v60, %v1255_v26  ;;  %v1263_v8 = vmul.f32 %v3221_v57, %v3789_v32  ;;  %v1264_v48 = vmul.f32 %v3218_v5, %v3813_v41  ;;  %v1266_v18 = vmul.f32 %v3218_v5, %v3787_v13 }
  0xfd   :  { %v3979_v33 = vadd.f32 %v1258_v19, %v1257_v47  ;;  %v3981_v40 = vsub.f32 %v1260_v35, %v1261_v2  ;;  %v1267_v37 = vmul.f32 %v3221_v57, %v3811_v21  ;;  %v1269_v32 = vmul.f32 %v3221_v57, %v3787_v13 }
  0xfe   :  { %v3987_v23 = vadd.f32 %v1264_v48, %v1263_v8  ;;  %v1270_v41 = vmul.f32 %v3218_v5, %v3811_v21  ;;  %v1272_v50 = vmul.f32 %v3218_v5, %v3795_v27  ;;  %v1273_v36 = vmul.f32 %v3221_v57, %v3819_v29 }
  0xff   :  { %v3995_v51 = vsub.f32 %v1266_v18, %v1267_v37  ;;  %v1275_v13 = vmul.f32 %v3221_v57, %v3795_v27  ;;  %v1276_v3 = vmul.f32 %v3218_v5, %v3819_v29  ;;  %v1281_v21 = vmul.f32 %v1280_v59, %v3827_v25 }
 0x100   :  { %v4004_v10 = vadd.f32 %v1270_v41, %v1269_v32  ;;  %v4006_v60 = vsub.f32 %v1272_v50, %v1273_v36  ;;  %v1283_v26 = vmul.f32 %v1282_v61, %v3837_v44  ;;  %v1285_v57 = vmul.f32 %v1280_v59, %v3837_v44 }
 0x101   :  { %v4014_v27 = vadd.f32 %v1276_v3, %v1275_v13  ;;  %v1286_v5 = vmul.f32 %v1282_v61, %v3827_v25  ;;  %v1291_v29 = vmul.f32 %v1290_v39, %v3835_v28  ;;  %v1293_v47 = vmul.f32 %v1292_v30, %v3843_v46 }
 0x102   :  { %v4025_v19 = vsub.f32 %v1281_v21, %v1283_v26  ;;  %v1295_v59 = vmul.f32 %v1290_v39, %v3843_v46  ;;  %v1296_v44 = vmul.f32 %v1292_v30, %v3835_v28  ;;  %v1301_v61 = vmul.f32 %v1300_v7, %v3851_v4 }
 0x103   :  { %v4036_v25 = vadd.f32 %v1286_v5, %v1285_v57  ;;  %v4038_v35 = vsub.f32 %v1291_v29, %v1293_v47  ;;  %v1303_v2 = vmul.f32 %v1302_v9, %v3861_v0  ;;  %v1305_v39 = vmul.f32 %v1300_v7, %v3861_v0 }
 0x104   :  { %v4046_v46 = vadd.f32 %v1296_v44, %v1295_v59  ;;  %v1306_v30 = vmul.f32 %v1302_v9, %v3851_v4  ;;  %v1311_v28 = vmul.f32 %v1310_v11, %v3859_v42  ;;  %v1313_v8 = vmul.f32 %v1312_v12, %v3867_v55 }
 0x105   :  { %v4057_v48 = vsub.f32 %v1301_v61, %v1303_v2  ;;  %v1315_v7 = vmul.f32 %v1310_v11, %v3867_v55  ;;  %v1316_v0 = vmul.f32 %v1312_v12, %v3859_v42  ;;  %v1321_v9 = vmul.f32 %v1320_v34, %v3875_v45 }
 0x106   :  { %v4068_v4 = vadd.f32 %v1306_v30, %v1305_v39  ;;  %v4070_v18 = vsub.f32 %v1311_v28, %v1313_v8  ;;  %v1323_v37 = vmul.f32 %v1322_v17, %v3885_v54  ;;  %v1325_v11 = vmul.f32 %v1320_v34, %v3885_v54 }
 0x107   :  { %v4078_v55 = vadd.f32 %v1316_v0, %v1315_v7  ;;  %v1326_v12 = vmul.f32 %v1322_v17, %v3875_v45  ;;  %v1331_v42 = vmul.f32 %v1330_v6, %v3883_v24  ;;  %v6057_v32 = vstv %s3159_s22  ;;  %s4983_s22 = sld [smem:[#allocation3 + $0x4a]] }
 0x108   :  { %v1333_v41 = vmul.f32 %v6057_v32, %v3891_v1  ;;  %v4089_v50 = vsub.f32 %v1321_v9, %v1323_v37  ;;  %v1335_v34 = vmul.f32 %v1330_v6, %v3891_v1  ;;  %v6058_v54 = vmov %v6057_v32 }
 0x109   :  { %v1336_v36 = vmul.f32 %v6058_v54, %v3883_v24  ;;  %v6059_v13 = vstv %s3169_s23  ;;  %v4100_v45 = vadd.f32 %v1326_v12, %v1325_v11  ;;  %v6060_v21 = vstv %s3171_s24  ;;  %s5001_s23 = sld [smem:[#allocation3 + $0x3b]] }
 0x10a   :  { %v1341_v17 = vmul.f32 %v6059_v13, %v3899_v63  ;;  %v4102_v3 = vsub.f32 %v1331_v42, %v1333_v41  ;;  %v1343_v26 = vmul.f32 %v6060_v21, %v3909_v49  ;;  %v6061_v57 = vmov %v6059_v13  ;;  %s5003_s24 = sld [smem:[#allocation3 + $0x4b]] }
 0x10b   :  { %v1345_v6 = vmul.f32 %v6061_v57, %v3909_v49  ;;  %v4110_v1 = vadd.f32 %v1336_v36, %v1335_v34  ;;  %v6062_v24 = vmov %v6060_v21  ;;  %v6063_v29 = vstv %s3184_s25  ;;  %s5019_s25 = sld [smem:[#allocation3 + $0x3c]] }
 0x10c   :  { %v1346_v5 = vmul.f32 %v6062_v24, %v3899_v63  ;;  %v1351_v47 = vmul.f32 %v6063_v29, %v3907_v20  ;;  %v6064_v59 = vstv %s3186_s26  ;;  %v4121_v61 = vsub.f32 %v1341_v17, %v1343_v26  ;;  %s5021_s26 = sld [smem:[#allocation3 + $0x4c]] }
 0x10d   :  { %v1353_v44 = vmul.f32 %v6064_v59, %v3915_v62  ;;  %v6065_v2 = vmov %v6063_v29  ;;  %v6066_v39 = vmov %v6064_v59  ;;  %v6067_v28 = vstv %s3191_s27  ;;  %s5033_s27 = sld [smem:[#allocation3 + $0x3d]] }
 0x10e   :  { %v1355_v49 = vmul.f32 %v6065_v2, %v3915_v62  ;;  %v1356_v30 = vmul.f32 %v6066_v39, %v3907_v20  ;;  %v1361_v63 = vmul.f32 %v6067_v28, %v3923_v52  ;;  %v4132_v8 = vadd.f32 %v1346_v5, %v1345_v6 }
 0x10f   :  { %v4134_v7 = vsub.f32 %v1351_v47, %v1353_v44  ;;  %v6068_v0 = vstv %s3193_s0  ;;  %v6069_v37 = vmov %v6067_v28  ;;  %v6071_v42 = vstv %s3199_s30  ;;  %s5035_s0 = sld [smem:[#allocation3 + $0x4d]]  ;;  %s5047_s30 = sld [smem:[#allocation3 + $0x3e]] }
 0x110   :  { %v1363_v9 = vmul.f32 %v6068_v0, %v3933_v14  ;;  %v1365_v62 = vmul.f32 %v6069_v37, %v3933_v14  ;;  %v4142_v11 = vadd.f32 %v1356_v30, %v1355_v49  ;;  %v6070_v20 = vmov %v6068_v0 }
 0x111   :  { %v1366_v12 = vmul.f32 %v6070_v20, %v3923_v52  ;;  %v1371_v32 = vmul.f32 %v6071_v42, %v3931_v58  ;;  %v6072_v41 = vstv %s3201_s3  ;;  %v6073_v36 = vmov %v6071_v42  ;;  %s5049_s3 = sld [smem:[#allocation3 + $0x4e]] }
 0x112   :  { %v1373_v34 = vmul.f32 %v6072_v41, %v3939_v15  ;;  %v1364_v54 = vsub.f32 %v1361_v63, %v1363_v9  ;;  %v1375_v13 = vmul.f32 %v6073_v36, %v3939_v15  ;;  %v6074_v14 = vmov %v6072_v41 }
 0x113   :  { %v1376_v17 = vmul.f32 %v6074_v14, %v3931_v58  ;;  %v6075_v21 = vstv %s3210_s1  ;;  %v1367_v26 = vadd.f32 %v1366_v12, %v1365_v62  ;;  %v6076_v6 = vstv %s3212_s4  ;;  %s5061_s1 = sld [smem:[#allocation3 + $0x3f]] }
 0x114   :  { %v1381_v52 = vmul.f32 %v6075_v21, %v3947_v56  ;;  %v1374_v57 = vsub.f32 %v1371_v32, %v1373_v34  ;;  %v1383_v24 = vmul.f32 %v6076_v6, %v3957_v53  ;;  %v6077_v5 = vmov %v6075_v21  ;;  %s5063_s4 = sld [smem:[#allocation3 + $0x4f]] }
 0x115   :  { %v1385_v29 = vmul.f32 %v6077_v5, %v3957_v53  ;;  %v1377_v15 = vadd.f32 %v1376_v17, %v1375_v13  ;;  %v6078_v47 = vmov %v6076_v6  ;;  %v6079_v59 = vstv %s3223_s5  ;;  %s5075_s5 = sld [smem:[#allocation3 + $0x40]] }
 0x116   :  { %v1386_v58 = vmul.f32 %v6078_v47, %v3947_v56  ;;  %v1391_v44 = vmul.f32 %v6079_v59, %v3955_v22  ;;  %v6080_v2 = vstv %s3225_s6  ;;  %v1384_v39 = vsub.f32 %v1381_v52, %v1383_v24  ;;  %s5077_s6 = sld [smem:[#allocation3 + $0x50]] }
 0x117   :  { %v1393_v49 = vmul.f32 %v6080_v2, %v3963_v38  ;;  %v6081_v30 = vmov %v6079_v59  ;;  %v6082_v53 = vmov %v6080_v2  ;;  %v6083_v0 = vstv %s3235_s7  ;;  %s5089_s7 = sld [smem:[#allocation3 + $0x41]] }
 0x118   :  { %v1395_v28 = vmul.f32 %v6081_v30, %v3963_v38  ;;  %v1396_v63 = vmul.f32 %v6082_v53, %v3955_v22  ;;  %v1401_v56 = vmul.f32 %v6083_v0, %v3971_v16  ;;  %v1387_v9 = vadd.f32 %v1386_v58, %v1385_v29 }
 0x119   :  { %v4186_v37 = vsub.f32 %v1391_v44, %v1393_v49  ;;  %v6084_v62 = vstv %s3237_s8  ;;  %v6085_v12 = vmov %v6083_v0  ;;  %v6088_v41 = vstv %s3248_s9  ;;  %s5091_s8 = sld [smem:[#allocation3 + $0x51]]  ;;  %s5103_s9 = sld [smem:[#allocation3 + $0x42]] }
 0x11a   :  { %v1403_v20 = vmul.f32 %v6084_v62, %v3981_v40  ;;  %v1405_v42 = vmul.f32 %v6085_v12, %v3981_v40  ;;  %v4194_v38 = vadd.f32 %v1396_v63, %v1395_v28  ;;  %v6087_v22 = vmov %v6084_v62 }
 0x11b   :  { %v1406_v32 = vmul.f32 %v6087_v22, %v3971_v16  ;;  %v1411_v34 = vmul.f32 %v6088_v41, %v3979_v33  ;;  %v6089_v36 = vstv %s3250_s10  ;;  %v6090_v17 = vmov %v6088_v41  ;;  %s5105_s10 = sld [smem:[#allocation3 + $0x52]] }
 0x11c   :  { %v1413_v13 = vmul.f32 %v6089_v36, %v3987_v23  ;;  %v4205_v14 = vsub.f32 %v1401_v56, %v1403_v20  ;;  %v1415_v21 = vmul.f32 %v6090_v17, %v3987_v23  ;;  %v6091_v40 = vmov %v6089_v36 }
 0x11d   :  { %v1416_v52 = vmul.f32 %v6091_v40, %v3979_v33  ;;  %v6092_v6 = vstv %s3258_s28  ;;  %v4216_v16 = vadd.f32 %v1406_v32, %v1405_v42  ;;  %v6093_v29 = vstv %s3260_s29  ;;  %s4369_s28 = sld [smem:[#allocation3 + $0xd]]  ;;  %s4537_s29 = sld [smem:[#allocation3 + $0xa]] }
 0x11e   :  { %v1421_v24 = vmul.f32 %v6092_v6, %v3995_v51  ;;  %v4218_v5 = vsub.f32 %v1411_v34, %v1413_v13  ;;  %v1423_v47 = vmul.f32 %v6093_v29, %v4006_v60  ;;  %v6094_v58 = vmov %v6092_v6 }
 0x11f   :  { %v1425_v59 = vmul.f32 %v6094_v58, %v4006_v60  ;;  %v4226_v44 = vadd.f32 %v1416_v52, %v1415_v21  ;;  %v6095_v23 = vmov %v6093_v29  ;;  %v6096_v33 = vstv %s3266_s2  ;;  %s4359_s2 = sld [smem:[#allocation3 + $0x9]] }
 0x120   :  { %v1426_v2 = vmul.f32 %v6095_v23, %v3995_v51  ;;  %v1431_v49 = vmul.f32 %v6096_v33, %v4004_v10  ;;  %v6097_v30 = vstv %s6086_s11  ;;  %v4237_v53 = vsub.f32 %v1421_v24, %v1423_v47  ;;  %s5131_s11 = sld [smem:[#allocation3 + $0x44]] }
 0x121   :  { %v1433_v28 = vmul.f32 %v6097_v30, %v4014_v27  ;;  %v6098_v63 = vmov %v6096_v33  ;;  %v6099_v56 = vmov %v6097_v30  ;;  %v1441_v60 = vmul.f32 %v3315_v31, %v4025_v19 }
 0x122   :  { %v1435_v0 = vmul.f32 %v6098_v63, %v4014_v27  ;;  %v1436_v62 = vmul.f32 %v6099_v56, %v4004_v10  ;;  %v4247_v20 = vadd.f32 %v1426_v2, %v1425_v59  ;;  %v1443_v12 = vmul.f32 %v3318_v43, %v1364_v54 }
 0x123   :  { %v4249_v51 = vsub.f32 %v1431_v49, %v1433_v28  ;;  %v1445_v42 = vmul.f32 %v3318_v43, %v4025_v19  ;;  %v1446_v32 = vmul.f32 %v3315_v31, %v1364_v54  ;;  %v1448_v27 = vmul.f32 %v3315_v31, %v4036_v25 }
 0x124   :  { %v4254_v22 = vadd.f32 %v1436_v62, %v1435_v0  ;;  %v1449_v10 = vmul.f32 %v3318_v43, %v1367_v26  ;;  %v4260_v41 = vsub.f32 %v1441_v60, %v1443_v12  ;;  %v1451_v34 = vmul.f32 %v3318_v43, %v4036_v25 }
 0x125   :  { %v1452_v36 = vmul.f32 %v3315_v31, %v1367_v26  ;;  %v1454_v13 = vmul.f32 %v3315_v31, %v4038_v35  ;;  %v4267_v19 = vadd.f32 %v1446_v32, %v1445_v42  ;;  %v1455_v54 = vmul.f32 %v3318_v43, %v1374_v57 }
 0x126   :  { %v4269_v17 = vsub.f32 %v1448_v27, %v1449_v10  ;;  %v1457_v21 = vmul.f32 %v3318_v43, %v4038_v35  ;;  %v1458_v52 = vmul.f32 %v3315_v31, %v1374_v57  ;;  %v1460_v25 = vmul.f32 %v3315_v31, %v4046_v46 }
 0x127   :  { %v4274_v40 = vadd.f32 %v1452_v36, %v1451_v34  ;;  %v1461_v26 = vmul.f32 %v3318_v43, %v1377_v15  ;;  %v4280_v6 = vsub.f32 %v1454_v13, %v1455_v54  ;;  %v1463_v24 = vmul.f32 %v3318_v43, %v4046_v46 }
 0x128   :  { %v1464_v29 = vmul.f32 %v3315_v31, %v1377_v15  ;;  %v1466_v47 = vmul.f32 %v3315_v31, %v4057_v48  ;;  %v4287_v35 = vadd.f32 %v1458_v52, %v1457_v21  ;;  %v1467_v57 = vmul.f32 %v3318_v43, %v1384_v39 }
 0x129   :  { %v4289_v58 = vsub.f32 %v1460_v25, %v1461_v26  ;;  %v1469_v59 = vmul.f32 %v3318_v43, %v4057_v48  ;;  %v1470_v2 = vmul.f32 %v3315_v31, %v1384_v39  ;;  %v1472_v46 = vmul.f32 %v3315_v31, %v4068_v4 }
 0x12a   :  { %v4294_v23 = vadd.f32 %v1464_v29, %v1463_v24  ;;  %v1473_v15 = vmul.f32 %v3318_v43, %v1387_v9  ;;  %v4300_v33 = vsub.f32 %v1466_v47, %v1467_v57  ;;  %v1475_v49 = vmul.f32 %v3318_v43, %v4068_v4 }
 0x12b   :  { %v1476_v30 = vmul.f32 %v3315_v31, %v1387_v9  ;;  %v1478_v28 = vmul.f32 %v3315_v31, %v4070_v18  ;;  %v4307_v48 = vadd.f32 %v1470_v2, %v1469_v59  ;;  %v1479_v39 = vmul.f32 %v3318_v43, %v4186_v37 }
 0x12c   :  { %v4309_v63 = vsub.f32 %v1472_v46, %v1473_v15  ;;  %v1481_v0 = vmul.f32 %v3318_v43, %v4070_v18  ;;  %v1482_v4 = vmul.f32 %v3315_v31, %v4186_v37  ;;  %v1484_v9 = vmul.f32 %v3315_v31, %v4078_v55 }
 0x12d   :  { %v4315_v56 = vadd.f32 %v1476_v30, %v1475_v49  ;;  %v1485_v62 = vmul.f32 %v3318_v43, %v4194_v38  ;;  %v4323_v60 = vsub.f32 %v1478_v28, %v1479_v39  ;;  %v1487_v12 = vmul.f32 %v3318_v43, %v4078_v55 }
 0x12e   :  { %v1488_v42 = vmul.f32 %v3315_v31, %v4194_v38  ;;  %v1490_v18 = vmul.f32 %v3315_v31, %v4089_v50  ;;  %v4331_v32 = vadd.f32 %v1482_v4, %v1481_v0  ;;  %v1491_v27 = vmul.f32 %v3318_v43, %v4205_v14 }
 0x12f   :  { %v4333_v37 = vsub.f32 %v1484_v9, %v1485_v62  ;;  %v1493_v10 = vmul.f32 %v3318_v43, %v4089_v50  ;;  %v1494_v55 = vmul.f32 %v3315_v31, %v4205_v14  ;;  %v1496_v38 = vmul.f32 %v3315_v31, %v4100_v45 }
 0x130   :  { %v4339_v34 = vadd.f32 %v1488_v42, %v1487_v12  ;;  %v1497_v36 = vmul.f32 %v3318_v43, %v4216_v16  ;;  %v1492_v13 = vsub.f32 %v1490_v18, %v1491_v27  ;;  %v1499_v54 = vmul.f32 %v3318_v43, %v4100_v45 }
 0x131   :  { %v1500_v21 = vmul.f32 %v3315_v31, %v4216_v16  ;;  %v1502_v50 = vmul.f32 %v3315_v31, %v4102_v3  ;;  %v4353_v52 = vadd.f32 %v1494_v55, %v1493_v10  ;;  %v1503_v14 = vmul.f32 %v3318_v43, %v4218_v5 }
 0x132   :  { %v1498_v25 = vsub.f32 %v1496_v38, %v1497_v36  ;;  %v1505_v26 = vmul.f32 %v3318_v43, %v4102_v3  ;;  %v1506_v45 = vmul.f32 %v3315_v31, %v4218_v5  ;;  %v1508_v16 = vmul.f32 %v3315_v31, %v4110_v1 }
 0x133   :  { %v4361_v24 = vadd.f32 %v1500_v21, %v1499_v54  ;;  %v1509_v29 = vmul.f32 %v3318_v43, %v4226_v44  ;;  %v1504_v47 = vsub.f32 %v1502_v50, %v1503_v14  ;;  %v1511_v57 = vmul.f32 %v3318_v43, %v4110_v1 }
 0x134   :  { %v1512_v3 = vmul.f32 %v3315_v31, %v4226_v44  ;;  %v1514_v59 = vmul.f32 %v3315_v31, %v4121_v61  ;;  %v4377_v2 = vadd.f32 %v1506_v45, %v1505_v26  ;;  %v1515_v46 = vmul.f32 %v3318_v43, %v4237_v53 }
 0x135   :  { %v1510_v5 = vsub.f32 %v1508_v16, %v1509_v29  ;;  %v1517_v15 = vmul.f32 %v3318_v43, %v4121_v61  ;;  %v1518_v1 = vmul.f32 %v3315_v31, %v4237_v53  ;;  %v1520_v44 = vmul.f32 %v3315_v31, %v4132_v8 }
 0x136   :  { %v4383_v49 = vadd.f32 %v1512_v3, %v1511_v57  ;;  %v1521_v30 = vmul.f32 %v3318_v43, %v4247_v20  ;;  %v1516_v28 = vsub.f32 %v1514_v59, %v1515_v46  ;;  %v1523_v39 = vmul.f32 %v3318_v43, %v4132_v8 }
 0x137   :  { %v1524_v0 = vmul.f32 %v3315_v31, %v4247_v20  ;;  %v1526_v61 = vmul.f32 %v3315_v31, %v4134_v7  ;;  %v4397_v4 = vadd.f32 %v1518_v1, %v1517_v15  ;;  %v1527_v9 = vmul.f32 %v3318_v43, %v4249_v51 }
 0x138   :  { %v1522_v53 = vsub.f32 %v1520_v44, %v1521_v30  ;;  %v1529_v62 = vmul.f32 %v3318_v43, %v4134_v7  ;;  %v1530_v8 = vmul.f32 %v3315_v31, %v4249_v51  ;;  %v1532_v20 = vmul.f32 %v3315_v31, %v4142_v11 }
 0x139   :  { %v4403_v12 = vadd.f32 %v1524_v0, %v1523_v39  ;;  %v1533_v42 = vmul.f32 %v3318_v43, %v4254_v22  ;;  %v1528_v18 = vsub.f32 %v1526_v61, %v1527_v9  ;;  %v1535_v27 = vmul.f32 %v3318_v43, %v4142_v11 }
 0x13a   :  { %v1536_v10 = vmul.f32 %v3315_v31, %v4254_v22  ;;  %v4416_v55 = vstv %s4359_s2  ;;  %v4418_v7 = vadd.f32 %v1530_v8, %v1529_v62  ;;  %v4423_v36 = vstv %s4369_s28  ;;  %s5133_s2 = sld [smem:[#allocation3 + $0x54]]  ;;  %s5145_s28 = sld [smem:[#allocation3 + $0x45]] }
 0x13b   :  { %v1534_v38 = vsub.f32 %v1532_v20, %v1533_v42  ;;  %v1541_v51 = vmul.f32 %v4416_v55, %v4260_v41  ;;  %v1543_v21 = vmul.f32 %v4423_v36, %v1492_v13  ;;  %v1545_v43 = vmul.f32 %v4423_v36, %v4260_v41 }
 0x13c   :  { %v4425_v54 = vadd.f32 %v1536_v10, %v1535_v27  ;;  %v1546_v11 = vmul.f32 %v4416_v55, %v1492_v13  ;;  %v1548_v31 = vmul.f32 %v4416_v55, %v4269_v17  ;;  %v1549_v22 = vmul.f32 %v4423_v36, %v1498_v25 }
 0x13d   :  { %v1551_v50 = vmul.f32 %v4423_v36, %v4269_v17  ;;  %v1552_v14 = vmul.f32 %v4416_v55, %v1498_v25  ;;  %v4437_v26 = vsub.f32 %v1541_v51, %v1543_v21  ;;  %v1554_v16 = vmul.f32 %v4416_v55, %v4280_v6 }
 0x13e   :  { %v4439_v45 = vadd.f32 %v1546_v11, %v1545_v43  ;;  %v1555_v41 = vmul.f32 %v4423_v36, %v1504_v47  ;;  %v4444_v13 = vsub.f32 %v1548_v31, %v1549_v22  ;;  %v1557_v57 = vmul.f32 %v4423_v36, %v4280_v6 }
 0x13f   :  { %v4446_v29 = vadd.f32 %v1552_v14, %v1551_v50  ;;  %v1558_v17 = vmul.f32 %v4416_v55, %v1504_v47  ;;  %v1560_v25 = vmul.f32 %v4416_v55, %v4289_v58  ;;  %v1561_v59 = vmul.f32 %v4423_v36, %v1510_v5 }
 0x140   :  { %v4451_v3 = vsub.f32 %v1554_v16, %v1555_v41  ;;  %v1563_v46 = vmul.f32 %v4423_v36, %v4289_v58  ;;  %v1564_v1 = vmul.f32 %v4416_v55, %v1510_v5  ;;  %v1566_v44 = vmul.f32 %v4416_v55, %v4300_v33 }
 0x141   :  { %v4458_v15 = vadd.f32 %v1558_v17, %v1557_v57  ;;  %v1567_v6 = vmul.f32 %v4423_v36, %v1516_v28  ;;  %v4464_v47 = vsub.f32 %v1560_v25, %v1561_v59  ;;  %v1569_v30 = vmul.f32 %v4423_v36, %v4300_v33 }
 0x142   :  { %v1570_v39 = vmul.f32 %v4416_v55, %v1516_v28  ;;  %v1572_v0 = vmul.f32 %v4416_v55, %v4309_v63  ;;  %v4471_v58 = vadd.f32 %v1564_v1, %v1563_v46  ;;  %v1573_v5 = vmul.f32 %v4423_v36, %v1522_v53 }
 0x143   :  { %v4473_v61 = vsub.f32 %v1566_v44, %v1567_v6  ;;  %v1575_v9 = vmul.f32 %v4423_v36, %v4309_v63  ;;  %v1576_v8 = vmul.f32 %v4416_v55, %v1522_v53  ;;  %v1578_v33 = vmul.f32 %v4416_v55, %v4323_v60 }
 0x144   :  { %v4478_v62 = vadd.f32 %v1570_v39, %v1569_v30  ;;  %v1579_v28 = vmul.f32 %v4423_v36, %v1528_v18  ;;  %v4484_v20 = vsub.f32 %v1572_v0, %v1573_v5  ;;  %v1581_v42 = vmul.f32 %v4423_v36, %v4323_v60 }
 0x145   :  { %v1582_v27 = vmul.f32 %v4416_v55, %v1528_v18  ;;  %v1584_v10 = vmul.f32 %v4416_v55, %v4333_v37  ;;  %v4491_v63 = vadd.f32 %v1576_v8, %v1575_v9  ;;  %v1585_v53 = vmul.f32 %v4423_v36, %v1534_v38 }
 0x146   :  { %v4493_v51 = vsub.f32 %v1578_v33, %v1579_v28  ;;  %v1587_v21 = vmul.f32 %v4423_v36, %v4333_v37  ;;  %v1588_v11 = vmul.f32 %v4416_v55, %v1534_v38  ;;  %v1590_v60 = vmul.f32 %v4416_v55, %v4267_v19 }
 0x147   :  { %v4498_v43 = vadd.f32 %v1582_v27, %v1581_v42  ;;  %v1591_v18 = vmul.f32 %v4423_v36, %v4353_v52  ;;  %v4505_v31 = vsub.f32 %v1584_v10, %v1585_v53  ;;  %v1593_v22 = vmul.f32 %v4423_v36, %v4267_v19 }
 0x148   :  { %v1594_v50 = vmul.f32 %v4416_v55, %v4353_v52  ;;  %v1596_v37 = vmul.f32 %v4416_v55, %v4274_v40  ;;  %v4513_v14 = vadd.f32 %v1588_v11, %v1587_v21  ;;  %v1597_v16 = vmul.f32 %v4423_v36, %v4361_v24 }
 0x149   :  { %v4515_v38 = vsub.f32 %v1590_v60, %v1591_v18  ;;  %v1599_v41 = vmul.f32 %v4423_v36, %v4274_v40  ;;  %v1600_v19 = vmul.f32 %v4416_v55, %v4361_v24  ;;  %v1602_v52 = vmul.f32 %v4416_v55, %v4287_v35 }
 0x14a   :  { %v4521_v57 = vadd.f32 %v1594_v50, %v1593_v22  ;;  %v1603_v17 = vmul.f32 %v4423_v36, %v4377_v2  ;;  %v4529_v25 = vsub.f32 %v1596_v37, %v1597_v16  ;;  %v1605_v59 = vmul.f32 %v4423_v36, %v4287_v35 }
 0x14b   :  { %v1606_v46 = vmul.f32 %v4416_v55, %v4377_v2  ;;  %v1608_v40 = vmul.f32 %v4416_v55, %v4294_v23  ;;  %v4541_v24 = vadd.f32 %v1600_v19, %v1599_v41  ;;  %v1609_v44 = vmul.f32 %v4423_v36, %v4383_v49 }
 0x14c   :  { %v4543_v1 = vsub.f32 %v1602_v52, %v1603_v17  ;;  %v1611_v35 = vmul.f32 %v4423_v36, %v4294_v23  ;;  %v1612_v2 = vmul.f32 %v4416_v55, %v4383_v49  ;;  %v1614_v30 = vmul.f32 %v4416_v55, %v4307_v48 }
 0x14d   :  { %v4549_v6 = vadd.f32 %v1606_v46, %v1605_v59  ;;  %v1615_v39 = vmul.f32 %v4423_v36, %v4397_v4  ;;  %v4557_v0 = vsub.f32 %v1608_v40, %v1609_v44  ;;  %v1617_v5 = vmul.f32 %v4423_v36, %v4307_v48 }
 0x14e   :  { %v1618_v9 = vmul.f32 %v4416_v55, %v4397_v4  ;;  %v1620_v23 = vmul.f32 %v4416_v55, %v4315_v56  ;;  %v4565_v8 = vadd.f32 %v1612_v2, %v1611_v35  ;;  %v1621_v33 = vmul.f32 %v4423_v36, %v4403_v12 }
 0x14f   :  { %v4567_v49 = vsub.f32 %v1614_v30, %v1615_v39  ;;  %v1623_v28 = vmul.f32 %v4423_v36, %v4315_v56  ;;  %v1624_v48 = vmul.f32 %v4416_v55, %v4403_v12  ;;  %v1626_v4 = vmul.f32 %v4416_v55, %v4331_v32 }
 0x150   :  { %v4573_v42 = vadd.f32 %v1618_v9, %v1617_v5  ;;  %v1627_v27 = vmul.f32 %v4423_v36, %v4418_v7  ;;  %v4581_v10 = vsub.f32 %v1620_v23, %v1621_v33  ;;  %v1629_v53 = vmul.f32 %v4423_v36, %v4331_v32 }
 0x151   :  { %v1630_v56 = vmul.f32 %v4416_v55, %v4418_v7  ;;  %v1632_v21 = vmul.f32 %v4416_v55, %v4339_v34  ;;  %v4589_v11 = vadd.f32 %v1624_v48, %v1623_v28  ;;  %v1633_v60 = vmul.f32 %v4423_v36, %v4425_v54 }
 0x152   :  { %v4591_v12 = vsub.f32 %v1626_v4, %v1627_v27  ;;  %v1635_v18 = vmul.f32 %v4423_v36, %v4339_v34  ;;  %v1636_v32 = vmul.f32 %v4416_v55, %v4425_v54  ;;  %v4602_v50 = vstv %s4537_s29  ;;  %s5147_s29 = sld [smem:[#allocation3 + $0x55]] }
 0x153   :  { %v4597_v22 = vadd.f32 %v1630_v56, %v1629_v53  ;;  %v4605_v7 = vstv %s4539_s12  ;;  %v4607_v37 = vsub.f32 %v1632_v21, %v1633_v60  ;;  %v1641_v16 = vmul.f32 %v4602_v50, %v4437_v26  ;;  %s5159_s12 = sld [smem:[#allocation3 + $0x46]] }
 0x154   :  { %v1643_v41 = vmul.f32 %v4605_v7, %v4473_v61  ;;  %v1645_v34 = vmul.f32 %v4605_v7, %v4437_v26  ;;  %v4615_v36 = vadd.f32 %v1636_v32, %v1635_v18  ;;  %v1646_v55 = vmul.f32 %v4602_v50, %v4473_v61 }
 0x155   :  { %v1648_v54 = vmul.f32 %v4602_v50, %v4444_v13  ;;  %v1649_v19 = vmul.f32 %v4605_v7, %v4484_v20  ;;  %v1651_v17 = vmul.f32 %v4605_v7, %v4444_v13  ;;  %v1652_v59 = vmul.f32 %v4602_v50, %v4484_v20 }
 0x156   :  { %v4623_v52 = vsub.f32 %v1641_v16, %v1643_v41  ;;  %v1654_v26 = vmul.f32 %v4602_v50, %v4451_v3  ;;  %v4631_v46 = vadd.f32 %v1646_v55, %v1645_v34  ;;  %v1655_v40 = vmul.f32 %v4605_v7, %v4493_v51 }
 0x157   :  { %v4633_v61 = vsub.f32 %v1648_v54, %v1649_v19  ;;  %v1657_v44 = vmul.f32 %v4605_v7, %v4451_v3  ;;  %v4639_v35 = vadd.f32 %v1652_v59, %v1651_v17  ;;  %v1658_v13 = vmul.f32 %v4602_v50, %v4493_v51 }
 0x158   :  { %v1660_v20 = vmul.f32 %v4602_v50, %v4464_v47  ;;  %v1661_v2 = vmul.f32 %v4605_v7, %v4505_v31  ;;  %v4647_v30 = vsub.f32 %v1654_v26, %v1655_v40  ;;  %v1663_v39 = vmul.f32 %v4605_v7, %v4464_v47 }
 0x159   :  { %v1664_v5 = vmul.f32 %v4602_v50, %v4505_v31  ;;  %v1666_v3 = vmul.f32 %v4602_v50, %v4439_v45  ;;  %v4655_v9 = vadd.f32 %v1658_v13, %v1657_v44  ;;  %v1667_v23 = vmul.f32 %v4605_v7, %v4478_v62 }
 0x15a   :  { %v4657_v51 = vsub.f32 %v1660_v20, %v1661_v2  ;;  %v1669_v33 = vmul.f32 %v4605_v7, %v4439_v45  ;;  %v1670_v47 = vmul.f32 %v4602_v50, %v4478_v62  ;;  %v1672_v31 = vmul.f32 %v4602_v50, %v4446_v29 }
 0x15b   :  { %v4663_v28 = vadd.f32 %v1664_v5, %v1663_v39  ;;  %v1673_v48 = vmul.f32 %v4605_v7, %v4491_v63  ;;  %v4671_v4 = vsub.f32 %v1666_v3, %v1667_v23  ;;  %v1675_v27 = vmul.f32 %v4605_v7, %v4446_v29 }
 0x15c   :  { %v1676_v53 = vmul.f32 %v4602_v50, %v4491_v63  ;;  %v1678_v45 = vmul.f32 %v4602_v50, %v4458_v15  ;;  %v4679_v56 = vadd.f32 %v1670_v47, %v1669_v33  ;;  %v1679_v21 = vmul.f32 %v4605_v7, %v4498_v43 }
 0x15d   :  { %v4681_v62 = vsub.f32 %v1672_v31, %v1673_v48  ;;  %v1681_v60 = vmul.f32 %v4605_v7, %v4458_v15  ;;  %v1682_v29 = vmul.f32 %v4602_v50, %v4498_v43  ;;  %v1684_v63 = vmul.f32 %v4602_v50, %v4471_v58 }
 0x15e   :  { %v4687_v18 = vadd.f32 %v1676_v53, %v1675_v27  ;;  %v1685_v32 = vmul.f32 %v4605_v7, %v4513_v14  ;;  %v4695_v16 = vsub.f32 %v1678_v45, %v1679_v21  ;;  %v1687_v41 = vmul.f32 %v4605_v7, %v4471_v58 }
 0x15f   :  { %v1688_v34 = vmul.f32 %v4602_v50, %v4513_v14  ;;  %v1690_v15 = vmul.f32 %v4602_v50, %v4515_v38  ;;  %v4703_v55 = vadd.f32 %v1682_v29, %v1681_v60  ;;  %v1691_v54 = vmul.f32 %v4605_v7, %v4567_v49 }
 0x160   :  { %v4705_v43 = vsub.f32 %v1684_v63, %v1685_v32  ;;  %v1693_v19 = vmul.f32 %v4605_v7, %v4515_v38  ;;  %v1694_v58 = vmul.f32 %v4602_v50, %v4567_v49  ;;  %v1696_v14 = vmul.f32 %v4602_v50, %v4529_v25 }
 0x161   :  { %v4711_v17 = vadd.f32 %v1688_v34, %v1687_v41  ;;  %v1697_v59 = vmul.f32 %v4605_v7, %v4581_v10  ;;  %v4719_v26 = vsub.f32 %v1690_v15, %v1691_v54  ;;  %v1699_v40 = vmul.f32 %v4605_v7, %v4529_v25 }
 0x162   :  { %v1700_v44 = vmul.f32 %v4602_v50, %v4581_v10  ;;  %v1702_v38 = vmul.f32 %v4602_v50, %v4543_v1  ;;  %v4727_v13 = vadd.f32 %v1694_v58, %v1693_v19  ;;  %v1703_v20 = vmul.f32 %v4605_v7, %v4591_v12 }
 0x163   :  { %v4729_v49 = vsub.f32 %v1696_v14, %v1697_v59  ;;  %v1705_v2 = vmul.f32 %v4605_v7, %v4543_v1  ;;  %v1706_v25 = vmul.f32 %v4602_v50, %v4591_v12  ;;  %v1708_v10 = vmul.f32 %v4602_v50, %v4557_v0 }
 0x164   :  { %v4737_v39 = vadd.f32 %v1700_v44, %v1699_v40  ;;  %v1709_v5 = vmul.f32 %v4605_v7, %v4607_v37  ;;  %v4747_v3 = vsub.f32 %v1702_v38, %v1703_v20  ;;  %v1711_v1 = vmul.f32 %v4605_v7, %v4557_v0 }
 0x165   :  { %v1712_v23 = vmul.f32 %v4602_v50, %v4607_v37  ;;  %v1714_v33 = vmul.f32 %v4602_v50, %v4521_v57  ;;  %v4755_v12 = vadd.f32 %v1706_v25, %v1705_v2  ;;  %v1715_v31 = vmul.f32 %v4605_v7, %v4573_v42 }
 0x166   :  { %v4757_v47 = vsub.f32 %v1708_v10, %v1709_v5  ;;  %v1717_v48 = vmul.f32 %v4605_v7, %v4521_v57  ;;  %v1718_v0 = vmul.f32 %v4602_v50, %v4573_v42  ;;  %v1720_v37 = vmul.f32 %v4602_v50, %v4541_v24 }
 0x167   :  { %v4763_v27 = vadd.f32 %v1712_v23, %v1711_v1  ;;  %v1721_v53 = vmul.f32 %v4605_v7, %v4589_v11  ;;  %v4771_v45 = vsub.f32 %v1714_v33, %v1715_v31  ;;  %v1723_v21 = vmul.f32 %v4605_v7, %v4541_v24 }
 0x168   :  { %v1724_v57 = vmul.f32 %v4602_v50, %v4589_v11  ;;  %v1726_v60 = vmul.f32 %v4602_v50, %v4549_v6  ;;  %v4779_v42 = vadd.f32 %v1718_v0, %v1717_v48  ;;  %v1727_v63 = vmul.f32 %v4605_v7, %v4597_v22 }
 0x169   :  { %v4781_v29 = vsub.f32 %v1720_v37, %v1721_v53  ;;  %v1729_v32 = vmul.f32 %v4605_v7, %v4549_v6  ;;  %v1730_v24 = vmul.f32 %v4602_v50, %v4597_v22  ;;  %v1732_v11 = vmul.f32 %v4602_v50, %v4565_v8 }
 0x16a   :  { %v4787_v41 = vadd.f32 %v1724_v57, %v1723_v21  ;;  %v1733_v34 = vmul.f32 %v4605_v7, %v4615_v36  ;;  %v4795_v15 = vsub.f32 %v1726_v60, %v1727_v63  ;;  %v1735_v54 = vmul.f32 %v4605_v7, %v4565_v8 }
 0x16b   :  { %v1736_v19 = vmul.f32 %v4602_v50, %v4615_v36  ;;  %v4802_v6 = vstv %s4735_s13  ;;  %v4804_v58 = vadd.f32 %v1730_v24, %v1729_v32  ;;  %v4811_v59 = vstv %s4745_s15  ;;  %s5161_s13 = sld [smem:[#allocation3 + $0x56]]  ;;  %s5173_s15 = sld [smem:[#allocation3 + $0x47]] }
 0x16c   :  { %v4806_v14 = vsub.f32 %v1732_v11, %v1733_v34  ;;  %v1741_v22 = vmul.f32 %v4802_v6, %v4623_v52  ;;  %v1743_v44 = vmul.f32 %v4811_v59, %v4647_v30  ;;  %v1745_v8 = vmul.f32 %v4811_v59, %v4623_v52 }
 0x16d   :  { %v4813_v40 = vadd.f32 %v1736_v19, %v1735_v54  ;;  %v1746_v50 = vmul.f32 %v4802_v6, %v4647_v30  ;;  %v1748_v7 = vmul.f32 %v4802_v6, %v4633_v61  ;;  %v1749_v36 = vmul.f32 %v4811_v59, %v4657_v51 }
 0x16e   :  { %v1751_v38 = vmul.f32 %v4811_v59, %v4633_v61  ;;  %v1752_v20 = vmul.f32 %v4802_v6, %v4657_v51  ;;  %v4829_v2 = vsub.f32 %v1741_v22, %v1743_v44  ;;  %v1754_v52 = vmul.f32 %v4802_v6, %v4631_v46 }
 0x16f   :  { %v4831_v25 = vadd.f32 %v1746_v50, %v1745_v8  ;;  %v1755_v30 = vmul.f32 %v4811_v59, %v4655_v9  ;;  %v4837_v10 = vsub.f32 %v1748_v7, %v1749_v36  ;;  %v1757_v61 = vmul.f32 %v4811_v59, %v4631_v46 }
 0x170   :  { %v4839_v5 = vadd.f32 %v1752_v20, %v1751_v38  ;;  %v1758_v51 = vmul.f32 %v4802_v6, %v4655_v9  ;;  %v1760_v23 = vmul.f32 %v4802_v6, %v4639_v35  ;;  %v1761_v33 = vmul.f32 %v4811_v59, %v4663_v28 }
 0x171   :  { %v4845_v1 = vsub.f32 %v1754_v52, %v1755_v30  ;;  %v1763_v31 = vmul.f32 %v4811_v59, %v4639_v35  ;;  %v1764_v0 = vmul.f32 %v4802_v6, %v4663_v28  ;;  %v1766_v46 = vmul.f32 %v4802_v6, %v4671_v4 }
 0x172   :  { %v4853_v48 = vadd.f32 %v1758_v51, %v1757_v61  ;;  %v1767_v9 = vmul.f32 %v4811_v59, %v4695_v16  ;;  %v4861_v37 = vsub.f32 %v1760_v23, %v1761_v33  ;;  %v1769_v53 = vmul.f32 %v4811_v59, %v4671_v4 }
 0x173   :  { %v1770_v21 = vmul.f32 %v4802_v6, %v4695_v16  ;;  %v1772_v35 = vmul.f32 %v4802_v6, %v4681_v62  ;;  %v4869_v57 = vadd.f32 %v1764_v0, %v1763_v31  ;;  %v1773_v60 = vmul.f32 %v4811_v59, %v4705_v43 }
 0x174   :  { %v4871_v28 = vsub.f32 %v1766_v46, %v1767_v9  ;;  %v1775_v63 = vmul.f32 %v4811_v59, %v4681_v62  ;;  %v1776_v4 = vmul.f32 %v4802_v6, %v4705_v43  ;;  %v1778_v16 = vmul.f32 %v4802_v6, %v4679_v56 }
 0x175   :  { %v4877_v32 = vadd.f32 %v1770_v21, %v1769_v53  ;;  %v1779_v24 = vmul.f32 %v4811_v59, %v4703_v55  ;;  %v4885_v11 = vsub.f32 %v1772_v35, %v1773_v60  ;;  %v1781_v34 = vmul.f32 %v4811_v59, %v4679_v56 }
 0x176   :  { %v1782_v54 = vmul.f32 %v4802_v6, %v4703_v55  ;;  %v1784_v62 = vmul.f32 %v4802_v6, %v4687_v18  ;;  %v4893_v19 = vadd.f32 %v1776_v4, %v1775_v63  ;;  %v1785_v22 = vmul.f32 %v4811_v59, %v4711_v17 }
 0x177   :  { %v4895_v43 = vsub.f32 %v1778_v16, %v1779_v24  ;;  %v1787_v44 = vmul.f32 %v4811_v59, %v4687_v18  ;;  %v1788_v56 = vmul.f32 %v4802_v6, %v4711_v17  ;;  %v1790_v55 = vmul.f32 %v4802_v6, %v4719_v26 }
 0x178   :  { %v4901_v8 = vadd.f32 %v1782_v54, %v1781_v34  ;;  %v1791_v50 = vmul.f32 %v4811_v59, %v4747_v3  ;;  %v4909_v7 = vsub.f32 %v1784_v62, %v1785_v22  ;;  %v1793_v36 = vmul.f32 %v4811_v59, %v4719_v26 }
 0x179   :  { %v1794_v38 = vmul.f32 %v4802_v6, %v4747_v3  ;;  %v1796_v18 = vmul.f32 %v4802_v6, %v4729_v49  ;;  %v4917_v20 = vadd.f32 %v1788_v56, %v1787_v44  ;;  %v1797_v52 = vmul.f32 %v4811_v59, %v4757_v47 }
 0x17a   :  { %v4919_v17 = vsub.f32 %v1790_v55, %v1791_v50  ;;  %v1799_v30 = vmul.f32 %v4811_v59, %v4729_v49  ;;  %v1800_v26 = vmul.f32 %v4802_v6, %v4757_v47  ;;  %v1802_v3 = vmul.f32 %v4802_v6, %v4727_v13 }
 0x17b   :  { %v4925_v61 = vadd.f32 %v1794_v38, %v1793_v36  ;;  %v1803_v51 = vmul.f32 %v4811_v59, %v4755_v12  ;;  %v4933_v23 = vsub.f32 %v1796_v18, %v1797_v52  ;;  %v1805_v33 = vmul.f32 %v4811_v59, %v4727_v13 }
 0x17c   :  { %v1806_v31 = vmul.f32 %v4802_v6, %v4755_v12  ;;  %v1808_v49 = vmul.f32 %v4802_v6, %v4737_v39  ;;  %v4945_v47 = vadd.f32 %v1800_v26, %v1799_v30  ;;  %v1809_v46 = vmul.f32 %v4811_v59, %v4763_v27 }
 0x17d   :  { %v4947_v0 = vsub.f32 %v1802_v3, %v1803_v51  ;;  %v1811_v13 = vmul.f32 %v4811_v59, %v4737_v39  ;;  %v1812_v12 = vmul.f32 %v4802_v6, %v4763_v27  ;;  %v1814_v53 = vmul.f32 %v4802_v6, %v4771_v45 }
 0x17e   :  { %v4953_v9 = vadd.f32 %v1806_v31, %v1805_v33  ;;  %v1815_v21 = vmul.f32 %v4811_v59, %v4795_v15  ;;  %v4965_v35 = vsub.f32 %v1808_v49, %v1809_v46  ;;  %v1817_v39 = vmul.f32 %v4811_v59, %v4771_v45 }
 0x17f   :  { %v1818_v60 = vmul.f32 %v4802_v6, %v4795_v15  ;;  %v1820_v27 = vmul.f32 %v4802_v6, %v4781_v29  ;;  %v4973_v63 = vadd.f32 %v1812_v12, %v1811_v13  ;;  %v1821_v16 = vmul.f32 %v4811_v59, %v4806_v14 }
 0x180   :  { %v4975_v4 = vsub.f32 %v1814_v53, %v1815_v21  ;;  %v1823_v24 = vmul.f32 %v4811_v59, %v4781_v29  ;;  %v1824_v15 = vmul.f32 %v4802_v6, %v4806_v14  ;;  %v1826_v34 = vmul.f32 %v4802_v6, %v4779_v42 }
 0x181   :  { %v4985_v45 = vadd.f32 %v1818_v60, %v1817_v39  ;;  %v1827_v54 = vmul.f32 %v4811_v59, %v4804_v58  ;;  %v4993_v62 = vsub.f32 %v1820_v27, %v1821_v16  ;;  %v1829_v29 = vmul.f32 %v4811_v59, %v4779_v42 }
 0x182   :  { %v1830_v22 = vmul.f32 %v4802_v6, %v4804_v58  ;;  %v1832_v44 = vmul.f32 %v4802_v6, %v4787_v41  ;;  %v5005_v14 = vadd.f32 %v1824_v15, %v1823_v24  ;;  %v1833_v55 = vmul.f32 %v4811_v59, %v4813_v40 }
 0x183   :  { %v5007_v56 = vsub.f32 %v1826_v34, %v1827_v54  ;;  %v1835_v42 = vmul.f32 %v4811_v59, %v4787_v41  ;;  %v1836_v50 = vmul.f32 %v4802_v6, %v4813_v40  ;;  %v1840_v36 = vstv %s4941_s17  ;;  %s5175_s17 = sld [smem:[#allocation3 + $0x57]] }
 0x184   :  { %v5013_v58 = vadd.f32 %v1830_v22, %v1829_v29  ;;  %v1842_v38 = vstv %s4943_s18  ;;  %v5023_v18 = vsub.f32 %v1832_v44, %v1833_v55  ;;  %v1841_v52 = vmul.f32 %v1840_v36, %v4829_v2  ;;  %s5187_s18 = sld [smem:[#allocation3 + $0x10]] }
 0x185   :  { %v1843_v30 = vmul.f32 %v1842_v38, %v4837_v10  ;;  %v1845_v41 = vmul.f32 %v1840_v36, %v4837_v10  ;;  %v5028_v59 = vadd.f32 %v1836_v50, %v1835_v42  ;;  %v1846_v6 = vmul.f32 %v1842_v38, %v4829_v2 }
 0x186   :  { %v1850_v40 = vstv %s4961_s19  ;;  %v1852_v26 = vstv %s4963_s20  ;;  %v1860_v49 = vstv %s4981_s21  ;;  %v1862_v46 = vstv %s4983_s22  ;;  %s5189_s19 = sld [smem:[#allocation3 + $0x14]]  ;;  %s5359_s20 = sld [smem:[#allocation3 + $0x11]] }
 0x187   :  { %v5037_v3 = vsub.f32 %v1841_v52, %v1843_v30  ;;  %v1851_v51 = vmul.f32 %v1850_v40, %v4831_v25  ;;  %v1853_v33 = vmul.f32 %v1852_v26, %v4839_v5  ;;  %v1855_v10 = vmul.f32 %v1850_v40, %v4839_v5  ;;  %s5369_s21 = sld [smem:[#allocation3 + $0x15]]  ;;  %s5537_s22 = sld [smem:[#allocation3 + $0x12]] }
 0x188   :  { %v5042_v31 = vadd.f32 %v1846_v6, %v1845_v41  ;;  %v1856_v2 = vmul.f32 %v1852_v26, %v4831_v25  ;;  %v1861_v12 = vmul.f32 %v1860_v49, %v4845_v1  ;;  %v1863_v53 = vmul.f32 %v1862_v46, %v4861_v37 }
 0x189   :  { %v5051_v13 = vsub.f32 %v1851_v51, %v1853_v33  ;;  %v1865_v5 = vmul.f32 %v1860_v49, %v4861_v37  ;;  %v1866_v25 = vmul.f32 %v1862_v46, %v4845_v1  ;;  %v1870_v39 = vstv %s5001_s23  ;;  %s5539_s23 = sld [smem:[#allocation3 + $0x16]] }
 0x18a   :  { %v5056_v21 = vadd.f32 %v1856_v2, %v1855_v10  ;;  %v1872_v60 = vstv %s5003_s24  ;;  %v5065_v27 = vsub.f32 %v1861_v12, %v1863_v53  ;;  %v1871_v16 = vmul.f32 %v1870_v39, %v4853_v48  ;;  %s5735_s24 = sld [smem:[#allocation3 + $0x13]] }
 0x18b   :  { %v1873_v24 = vmul.f32 %v1872_v60, %v4869_v57  ;;  %v1875_v37 = vmul.f32 %v1870_v39, %v4869_v57  ;;  %v5070_v15 = vadd.f32 %v1866_v25, %v1865_v5  ;;  %v1876_v1 = vmul.f32 %v1872_v60, %v4853_v48 }
 0x18c   :  { %v1880_v34 = vstv %s5019_s25  ;;  %v1882_v54 = vstv %s5021_s26  ;;  %v1890_v42 = vstv %s5033_s27  ;;  %v1892_v50 = vstv %s5035_s0  ;;  %s5745_s25 = sld [smem:[#allocation3 + $0x17]]  ;;  %s2740_s26 = smov [#allocation7]  }
 0x18d   :  { %v5079_v29 = vsub.f32 %v1871_v16, %v1873_v24  ;;  %v1881_v22 = vmul.f32 %v1880_v34, %v4871_v28  ;;  %v1883_v44 = vmul.f32 %v1882_v54, %v4885_v11  ;;  %v1885_v57 = vmul.f32 %v1880_v34, %v4885_v11  ;;  %s2490_s27 = sshll.u32 %s2740_s26, 4  ;;  %s2491_s27 = int_to_ptr.vmem [resolvable:$true] %s2490_s27 }
 0x18e   :  { %v5084_v55 = vadd.f32 %v1876_v1, %v1875_v37  ;;  %v1886_v48 = vmul.f32 %v1882_v54, %v4871_v28  ;;  %v1891_v38 = vmul.f32 %v1890_v42, %v4877_v32  ;;  %v1893_v52 = vmul.f32 %v1892_v50, %v4893_v19  ;;  %s2702_s0 = scalar_lea.vmem %s2491_s27, 512  ;;  %p2707_p12 = scmp.lt.s32.totalorder %s2491_s27, %s2491_s27 }
 0x18f   :  { %v5093_v36 = vsub.f32 %v1881_v22, %v1883_v44  ;;  %v1895_v11 = vmul.f32 %v1890_v42, %v4893_v19  ;;  %v1896_v28 = vmul.f32 %v1892_v50, %v4877_v32  ;;  %v1900_v41 = vstv %s5047_s30  ;;  %p2703_p11 = scmp.ne.s32.totalorder %s2491_s27, %s2702_s0  ;;  %p2708_p13 = scmp.lt.s32.totalorder %s2702_s0, %s2702_s0 }
 0x190   :  { %v5098_v30 = vadd.f32 %v1886_v48, %v1885_v57  ;;  %v1902_v6 = vstv %s5049_s3  ;;  %v5107_v40 = vsub.f32 %v1891_v38, %v1893_v52  ;;  %v1901_v26 = vmul.f32 %v1900_v41, %v4895_v43 }
 0x191   :  { %v1903_v51 = vmul.f32 %v1902_v6, %v4909_v7  ;;  %v1905_v19 = vmul.f32 %v1900_v41, %v4909_v7  ;;  %v5112_v33 = vadd.f32 %v1896_v28, %v1895_v11  ;;  %v1906_v32 = vmul.f32 %v1902_v6, %v4895_v43  ;;  %p2709_p0 = por %p2708_p13, %p2707_p12 }
 0x192   :  { %v1910_v10 = vstv %s5061_s1  ;;  %v1912_v2 = vstv %s5063_s4  ;;  %v1920_v5 = vstv %s5075_s5  ;;  %v1922_v25 = vstv %s5077_s6 }
 0x193   :  { %v5121_v49 = vsub.f32 %v1901_v26, %v1903_v51  ;;  %v1911_v46 = vmul.f32 %v1910_v10, %v4901_v8  ;;  %v1913_v12 = vmul.f32 %v1912_v2, %v4917_v20  ;;  %v1915_v7 = vmul.f32 %v1910_v10, %v4917_v20  ;;  %p2710_p1 = pnand %p2709_p0, %p2703_p11 }
 0x194   :  { %v5126_v53 = vadd.f32 %v1906_v32, %v1905_v19  ;;  %v1916_v43 = vmul.f32 %v1912_v2, %v4901_v8  ;;  %v1921_v60 = vmul.f32 %v1920_v5, %v4919_v17  ;;  %v1923_v16 = vmul.f32 %v1922_v25, %v4933_v23 }
 0x195   :  { %v5135_v39 = vsub.f32 %v1911_v46, %v1913_v12  ;;  %v1925_v20 = vmul.f32 %v1920_v5, %v4933_v23  ;;  %v1926_v8 = vmul.f32 %v1922_v25, %v4919_v17  ;;  %v1930_v37 = vstv %s5089_s7 }
 0x196   :  { %v5140_v24 = vadd.f32 %v1916_v43, %v1915_v7  ;;  %v1932_v1 = vstv %s5091_s8  ;;  %v5149_v34 = vsub.f32 %v1921_v60, %v1923_v16  ;;  %v1931_v54 = vmul.f32 %v1930_v37, %v4925_v61 }
 0x197   :  { %v1933_v22 = vmul.f32 %v1932_v1, %v4945_v47  ;;  %v1935_v23 = vmul.f32 %v1930_v37, %v4945_v47  ;;  %v5154_v44 = vadd.f32 %v1926_v8, %v1925_v20  ;;  %v1936_v17 = vmul.f32 %v1932_v1, %v4925_v61 }
 0x198   :  { %v1940_v57 = vstv %s5103_s9  ;;  %v1942_v48 = vstv %s5105_s10  ;;  %v1950_v11 = vstv %s5117_s14  ;;  %v1952_v28 = vstv %s5119_s16 }
 0x199   :  { %v5163_v42 = vsub.f32 %v1931_v54, %v1933_v22  ;;  %v1941_v50 = vmul.f32 %v1940_v57, %v4947_v0  ;;  %v1943_v38 = vmul.f32 %v1942_v48, %v4965_v35  ;;  %v1945_v47 = vmul.f32 %v1940_v57, %v4965_v35 }
 0x19a   :  { %v5168_v52 = vadd.f32 %v1936_v17, %v1935_v23  ;;  %v1946_v61 = vmul.f32 %v1942_v48, %v4947_v0  ;;  %v1951_v6 = vmul.f32 %v1950_v11, %v4953_v9  ;;  %v1953_v26 = vmul.f32 %v1952_v28, %v4973_v63 }
 0x19b   :  { %v5177_v41 = vsub.f32 %v1941_v50, %v1943_v38  ;;  %v1955_v35 = vmul.f32 %v1950_v11, %v4973_v63  ;;  %v1956_v0 = vmul.f32 %v1952_v28, %v4953_v9  ;;  %v1960_v19 = vstv %s5131_s11 }
 0x19c   :  { %v5182_v51 = vadd.f32 %v1946_v61, %v1945_v47  ;;  %v1962_v32 = vstv %s5133_s2  ;;  %v5191_v10 = vsub.f32 %v1951_v6, %v1953_v26  ;;  %v1961_v2 = vmul.f32 %v1960_v19, %v4975_v4 }
 0x19d   :  { %v1963_v46 = vmul.f32 %v1962_v32, %v4993_v62  ;;  %v1965_v63 = vmul.f32 %v1960_v19, %v4993_v62  ;;  %v5196_v12 = vadd.f32 %v1956_v0, %v1955_v35  ;;  %v1966_v9 = vmul.f32 %v1962_v32, %v4975_v4 }
 0x19e   :  { %v1970_v7 = vstv %s5145_s28  ;;  %v1972_v43 = vstv %s5147_s29  ;;  %v1980_v8 = vstv %s5159_s12  ;;  %v1982_v37 = vstv %s5161_s13 }
 0x19f   :  { %v5201_v5 = vsub.f32 %v1961_v2, %v1963_v46  ;;  %v1971_v25 = vmul.f32 %v1970_v7, %v4985_v45  ;;  %v1973_v60 = vmul.f32 %v1972_v43, %v5005_v14  ;;  %v1975_v16 = vmul.f32 %v1970_v7, %v5005_v14 }
 0x1a0   :  { %v5206_v20 = vadd.f32 %v1966_v9, %v1965_v63  ;;  %v1976_v62 = vmul.f32 %v1972_v43, %v4985_v45  ;;  %v1981_v1 = vmul.f32 %v1980_v8, %v5007_v56  ;;  %v1983_v54 = vmul.f32 %v1982_v37, %v5023_v18 }
 0x1a1   :  { %v5211_v4 = vsub.f32 %v1971_v25, %v1973_v60  ;;  %v1985_v22 = vmul.f32 %v1980_v8, %v5023_v18  ;;  %v1986_v14 = vmul.f32 %v1982_v37, %v5007_v56  ;;  %v1990_v17 = vstv %s5173_s15 }
 0x1a2   :  { %v5216_v23 = vadd.f32 %v1976_v62, %v1975_v16  ;;  %v1992_v57 = vstv %s5175_s17  ;;  %v5221_v48 = vsub.f32 %v1981_v1, %v1983_v54  ;;  %v1991_v45 = vmul.f32 %v1990_v17, %v5013_v58 }
 0x1a3   :  { %v1993_v50 = vmul.f32 %v1992_v57, %v5028_v59  ;;  %v1995_v38 = vmul.f32 %v1990_v17, %v5028_v59  ;;  %v5226_v47 = vadd.f32 %v1986_v14, %v1985_v22  ;;  %v1996_v61 = vmul.f32 %v1992_v57, %v5013_v58 }
 0x1a4   :  { %v5230_v11 = vstv %s5187_s18  ;;  %v5233_v18 = vstv %s5189_s19 }
 0x1a5   :  { %v5235_v28 = vsub.f32 %v1991_v45, %v1993_v50  ;;  %v2001_v56 = vmul.f32 %v5230_v11, %v5037_v3  ;;  %v2003_v6 = vmul.f32 %v5233_v18, %v5149_v34  ;;  %v2005_v26 = vmul.f32 %v5233_v18, %v5037_v3 }
 0x1a6   :  { %v5243_v59 = vadd.f32 %v1996_v61, %v1995_v38  ;;  %v2006_v58 = vmul.f32 %v5230_v11, %v5149_v34  ;;  %v2008_v35 = vmul.f32 %v5230_v11, %v5042_v31  ;;  %v2009_v0 = vmul.f32 %v5233_v18, %v5154_v44 }
 0x1a7   :  { %v5251_v19 = vsub.f32 %v2001_v56, %v2003_v6  ;;  %v2011_v32 = vmul.f32 %v5233_v18, %v5042_v31  ;;  %v2012_v2 = vmul.f32 %v5230_v11, %v5154_v44  ;;  %v2014_v3 = vmul.f32 %v5230_v11, %v5051_v13 }
 0x1a8   :  { %v5259_v46 = vadd.f32 %v2006_v58, %v2005_v26  ;;  %v5261_v34 = vsub.f32 %v2008_v35, %v2009_v0  ;;  %v2015_v63 = vmul.f32 %v5233_v18, %v5163_v42  ;;  %v2017_v9 = vmul.f32 %v5233_v18, %v5051_v13 }
 0x1a9   :  { %v5267_v7 = vadd.f32 %v2012_v2, %v2011_v32  ;;  %v2018_v31 = vmul.f32 %v5230_v11, %v5163_v42  ;;  %v2020_v44 = vmul.f32 %v5230_v11, %v5056_v21  ;;  %v2021_v43 = vmul.f32 %v5233_v18, %v5168_v52 }
 0x1aa   :  { %v5275_v25 = vsub.f32 %v2014_v3, %v2015_v63  ;;  %v2023_v60 = vmul.f32 %v5233_v18, %v5056_v21  ;;  %v2024_v16 = vmul.f32 %v5230_v11, %v5168_v52  ;;  %v2026_v13 = vmul.f32 %v5230_v11, %v5065_v27 }
 0x1ab   :  { %v5283_v62 = vadd.f32 %v2018_v31, %v2017_v9  ;;  %v5285_v42 = vsub.f32 %v2020_v44, %v2021_v43  ;;  %v2027_v8 = vmul.f32 %v5233_v18, %v5177_v41  ;;  %v2029_v37 = vmul.f32 %v5233_v18, %v5065_v27 }
 0x1ac   :  { %v5291_v1 = vadd.f32 %v2024_v16, %v2023_v60  ;;  %v2030_v21 = vmul.f32 %v5230_v11, %v5177_v41  ;;  %v2032_v52 = vmul.f32 %v5230_v11, %v5070_v15  ;;  %v2033_v54 = vmul.f32 %v5233_v18, %v5182_v51 }
 0x1ad   :  { %v5299_v22 = vsub.f32 %v2026_v13, %v2027_v8  ;;  %v2035_v14 = vmul.f32 %v5233_v18, %v5070_v15  ;;  %v2036_v17 = vmul.f32 %v5230_v11, %v5182_v51  ;;  %v2038_v27 = vmul.f32 %v5230_v11, %v5079_v29 }
 0x1ae   :  { %v5307_v57 = vadd.f32 %v2030_v21, %v2029_v37  ;;  %v5309_v41 = vsub.f32 %v2032_v52, %v2033_v54  ;;  %v2039_v45 = vmul.f32 %v5233_v18, %v5191_v10  ;;  %v2041_v50 = vmul.f32 %v5233_v18, %v5079_v29 }
 0x1af   :  { %v5315_v38 = vadd.f32 %v2036_v17, %v2035_v14  ;;  %v2042_v15 = vmul.f32 %v5230_v11, %v5191_v10  ;;  %v2044_v51 = vmul.f32 %v5230_v11, %v5084_v55  ;;  %v2045_v61 = vmul.f32 %v5233_v18, %v5196_v12 }
 0x1b0   :  { %v5323_v56 = vsub.f32 %v2038_v27, %v2039_v45  ;;  %v2047_v6 = vmul.f32 %v5233_v18, %v5084_v55  ;;  %v2048_v26 = vmul.f32 %v5230_v11, %v5196_v12  ;;  %v2050_v29 = vmul.f32 %v5230_v11, %v5093_v36 }
 0x1b1   :  { %v5331_v58 = vadd.f32 %v2042_v15, %v2041_v50  ;;  %v5333_v10 = vsub.f32 %v2044_v51, %v2045_v61  ;;  %v2051_v35 = vmul.f32 %v5233_v18, %v5201_v5  ;;  %v2053_v0 = vmul.f32 %v5233_v18, %v5093_v36 }
 0x1b2   :  { %v5339_v32 = vadd.f32 %v2048_v26, %v2047_v6  ;;  %v2054_v55 = vmul.f32 %v5230_v11, %v5201_v5  ;;  %v2056_v12 = vmul.f32 %v5230_v11, %v5098_v30  ;;  %v2057_v2 = vmul.f32 %v5233_v18, %v5206_v20 }
 0x1b3   :  { %v2052_v3 = vsub.f32 %v2050_v29, %v2051_v35  ;;  %v2059_v63 = vmul.f32 %v5233_v18, %v5098_v30  ;;  %v2060_v9 = vmul.f32 %v5230_v11, %v5206_v20  ;;  %v2062_v36 = vmul.f32 %v5230_v11, %v5107_v40 }
 0x1b4   :  { %v5353_v31 = vadd.f32 %v2054_v55, %v2053_v0  ;;  %v2058_v44 = vsub.f32 %v2056_v12, %v2057_v2  ;;  %v2063_v5 = vmul.f32 %v5233_v18, %v5211_v4  ;;  %v2065_v43 = vmul.f32 %v5233_v18, %v5107_v40 }
 0x1b5   :  { %v5361_v60 = vadd.f32 %v2060_v9, %v2059_v63  ;;  %v2066_v30 = vmul.f32 %v5230_v11, %v5211_v4  ;;  %v2068_v20 = vmul.f32 %v5230_v11, %v5112_v33  ;;  %v2069_v16 = vmul.f32 %v5233_v18, %v5216_v23 }
 0x1b6   :  { %v2064_v13 = vsub.f32 %v2062_v36, %v2063_v5  ;;  %v2071_v8 = vmul.f32 %v5233_v18, %v5112_v33  ;;  %v2072_v40 = vmul.f32 %v5230_v11, %v5216_v23  ;;  %v2074_v37 = vmul.f32 %v5230_v11, %v5121_v49 }
 0x1b7   :  { %v5377_v21 = vadd.f32 %v2066_v30, %v2065_v43  ;;  %v2070_v4 = vsub.f32 %v2068_v20, %v2069_v16  ;;  %v2075_v52 = vmul.f32 %v5233_v18, %v5221_v48  ;;  %v2077_v54 = vmul.f32 %v5233_v18, %v5121_v49 }
 0x1b8   :  { %v5383_v14 = vadd.f32 %v2072_v40, %v2071_v8  ;;  %v2078_v33 = vmul.f32 %v5230_v11, %v5221_v48  ;;  %v2080_v23 = vmul.f32 %v5230_v11, %v5126_v53  ;;  %v2081_v17 = vmul.f32 %v5233_v18, %v5226_v47 }
 0x1b9   :  { %v2076_v27 = vsub.f32 %v2074_v37, %v2075_v52  ;;  %v2083_v45 = vmul.f32 %v5233_v18, %v5126_v53  ;;  %v2084_v50 = vmul.f32 %v5230_v11, %v5226_v47  ;;  %v2086_v49 = vmul.f32 %v5230_v11, %v5135_v39 }
 0x1ba   :  { %v5397_v15 = vadd.f32 %v2078_v33, %v2077_v54  ;;  %v2082_v48 = vsub.f32 %v2080_v23, %v2081_v17  ;;  %v2087_v51 = vmul.f32 %v5233_v18, %v5235_v28  ;;  %v2089_v61 = vmul.f32 %v5233_v18, %v5135_v39 }
 0x1bb   :  { %v5403_v6 = vadd.f32 %v2084_v50, %v2083_v45  ;;  %v2090_v53 = vmul.f32 %v5230_v11, %v5235_v28  ;;  %v2092_v47 = vmul.f32 %v5230_v11, %v5140_v24  ;;  %v2093_v26 = vmul.f32 %v5233_v18, %v5243_v59 }
 0x1bc   :  { %v2088_v29 = vsub.f32 %v2086_v49, %v2087_v51  ;;  %v2095_v35 = vmul.f32 %v5233_v18, %v5140_v24  ;;  %v2096_v0 = vmul.f32 %v5230_v11, %v5243_v59  ;;  %v5416_v55 = vstv %s5359_s20 }
 0x1bd   :  { %v5418_v39 = vadd.f32 %v2090_v53, %v2089_v61  ;;  %v2094_v12 = vsub.f32 %v2092_v47, %v2093_v26  ;;  %v2101_v28 = vmul.f32 %v5416_v55, %v5251_v19  ;;  %v5423_v2 = vstv %s5369_s21 }
 0x1be   :  { %v5425_v63 = vadd.f32 %v2096_v0, %v2095_v35  ;;  %v2103_v9 = vmul.f32 %v5423_v2, %v2052_v3  ;;  %v2105_v24 = vmul.f32 %v5423_v2, %v5251_v19  ;;  %v2106_v18 = vmul.f32 %v5416_v55, %v2052_v3 }
 0x1bf   :  { %v2108_v11 = vmul.f32 %v5416_v55, %v5261_v34  ;;  %v2109_v59 = vmul.f32 %v5423_v2, %v2058_v44  ;;  %v2111_v36 = vmul.f32 %v5423_v2, %v5261_v34  ;;  %v2112_v5 = vmul.f32 %v5416_v55, %v2058_v44 }
 0x1c0   :  { %v5437_v43 = vsub.f32 %v2101_v28, %v2103_v9  ;;  %v5439_v30 = vadd.f32 %v2106_v18, %v2105_v24  ;;  %v2114_v20 = vmul.f32 %v5416_v55, %v5275_v25  ;;  %v2115_v19 = vmul.f32 %v5423_v2, %v2064_v13 }
 0x1c1   :  { %v5444_v3 = vsub.f32 %v2108_v11, %v2109_v59  ;;  %v5446_v16 = vadd.f32 %v2112_v5, %v2111_v36  ;;  %v2117_v8 = vmul.f32 %v5423_v2, %v5275_v25  ;;  %v2118_v34 = vmul.f32 %v5416_v55, %v2064_v13 }
 0x1c2   :  { %v5451_v40 = vsub.f32 %v2114_v20, %v2115_v19  ;;  %v2120_v44 = vmul.f32 %v5416_v55, %v5285_v42  ;;  %v2121_v37 = vmul.f32 %v5423_v2, %v2070_v4  ;;  %v2123_v52 = vmul.f32 %v5423_v2, %v5285_v42 }
 0x1c3   :  { %v5458_v54 = vadd.f32 %v2118_v34, %v2117_v8  ;;  %v2124_v33 = vmul.f32 %v5416_v55, %v2070_v4  ;;  %v2126_v23 = vmul.f32 %v5416_v55, %v5299_v22  ;;  %v2127_v25 = vmul.f32 %v5423_v2, %v2076_v27 }
 0x1c4   :  { %v5464_v13 = vsub.f32 %v2120_v44, %v2121_v37  ;;  %v2129_v17 = vmul.f32 %v5423_v2, %v5299_v22  ;;  %v2130_v45 = vmul.f32 %v5416_v55, %v2076_v27  ;;  %v2132_v50 = vmul.f32 %v5416_v55, %v5309_v41 }
 0x1c5   :  { %v5471_v42 = vadd.f32 %v2124_v33, %v2123_v52  ;;  %v5473_v49 = vsub.f32 %v2126_v23, %v2127_v25  ;;  %v2133_v4 = vmul.f32 %v5423_v2, %v2082_v48  ;;  %v2135_v51 = vmul.f32 %v5423_v2, %v5309_v41 }
 0x1c6   :  { %v5478_v61 = vadd.f32 %v2130_v45, %v2129_v17  ;;  %v2136_v53 = vmul.f32 %v5416_v55, %v2082_v48  ;;  %v2138_v22 = vmul.f32 %v5416_v55, %v5323_v56  ;;  %v2139_v27 = vmul.f32 %v5423_v2, %v2088_v29 }
 0x1c7   :  { %v5484_v47 = vsub.f32 %v2132_v50, %v2133_v4  ;;  %v2141_v26 = vmul.f32 %v5423_v2, %v5323_v56  ;;  %v2142_v35 = vmul.f32 %v5416_v55, %v2088_v29  ;;  %v2144_v0 = vmul.f32 %v5416_v55, %v5333_v10 }
 0x1c8   :  { %v5491_v41 = vadd.f32 %v2136_v53, %v2135_v51  ;;  %v5493_v28 = vsub.f32 %v2138_v22, %v2139_v27  ;;  %v2145_v48 = vmul.f32 %v5423_v2, %v2094_v12  ;;  %v2147_v9 = vmul.f32 %v5423_v2, %v5333_v10 }
 0x1c9   :  { %v5498_v24 = vadd.f32 %v2142_v35, %v2141_v26  ;;  %v2148_v18 = vmul.f32 %v5416_v55, %v2094_v12  ;;  %v2150_v56 = vmul.f32 %v5416_v55, %v5259_v46  ;;  %v2151_v29 = vmul.f32 %v5423_v2, %v5353_v31 }
 0x1ca   :  { %v5505_v11 = vsub.f32 %v2144_v0, %v2145_v48  ;;  %v2153_v59 = vmul.f32 %v5423_v2, %v5259_v46  ;;  %v2154_v36 = vmul.f32 %v5416_v55, %v5353_v31  ;;  %v2156_v10 = vmul.f32 %v5416_v55, %v5267_v7 }
 0x1cb   :  { %v5513_v5 = vadd.f32 %v2148_v18, %v2147_v9  ;;  %v5515_v12 = vsub.f32 %v2150_v56, %v2151_v29  ;;  %v2157_v20 = vmul.f32 %v5423_v2, %v5361_v60  ;;  %v2159_v19 = vmul.f32 %v5423_v2, %v5267_v7 }
 0x1cc   :  { %v5521_v8 = vadd.f32 %v2154_v36, %v2153_v59  ;;  %v2160_v46 = vmul.f32 %v5416_v55, %v5361_v60  ;;  %v2162_v31 = vmul.f32 %v5416_v55, %v5283_v62  ;;  %v2163_v34 = vmul.f32 %v5423_v2, %v5377_v21 }
 0x1cd   :  { %v5529_v44 = vsub.f32 %v2156_v10, %v2157_v20  ;;  %v2165_v37 = vmul.f32 %v5423_v2, %v5283_v62  ;;  %v2166_v52 = vmul.f32 %v5416_v55, %v5377_v21  ;;  %v2168_v7 = vmul.f32 %v5416_v55, %v5291_v1 }
 0x1ce   :  { %v5541_v60 = vadd.f32 %v2160_v46, %v2159_v19  ;;  %v5543_v33 = vsub.f32 %v2162_v31, %v2163_v34  ;;  %v2169_v23 = vmul.f32 %v5423_v2, %v5383_v14  ;;  %v2171_v62 = vmul.f32 %v5423_v2, %v5291_v1 }
 0x1cf   :  { %v5549_v25 = vadd.f32 %v2166_v52, %v2165_v37  ;;  %v2172_v21 = vmul.f32 %v5416_v55, %v5383_v14  ;;  %v2174_v17 = vmul.f32 %v5416_v55, %v5307_v57  ;;  %v2175_v45 = vmul.f32 %v5423_v2, %v5397_v15 }
 0x1d0   :  { %v5557_v50 = vsub.f32 %v2168_v7, %v2169_v23  ;;  %v2177_v4 = vmul.f32 %v5423_v2, %v5307_v57  ;;  %v2178_v51 = vmul.f32 %v5416_v55, %v5397_v15  ;;  %v2180_v1 = vmul.f32 %v5416_v55, %v5315_v38 }
 0x1d1   :  { %v5565_v53 = vadd.f32 %v2172_v21, %v2171_v62  ;;  %v5567_v14 = vsub.f32 %v2174_v17, %v2175_v45  ;;  %v2181_v22 = vmul.f32 %v5423_v2, %v5403_v6  ;;  %v2183_v27 = vmul.f32 %v5423_v2, %v5315_v38 }
 0x1d2   :  { %v5573_v26 = vadd.f32 %v2178_v51, %v2177_v4  ;;  %v2184_v57 = vmul.f32 %v5416_v55, %v5403_v6  ;;  %v2186_v15 = vmul.f32 %v5416_v55, %v5331_v58  ;;  %v2187_v35 = vmul.f32 %v5423_v2, %v5418_v39 }
 0x1d3   :  { %v5581_v0 = vsub.f32 %v2180_v1, %v2181_v22  ;;  %v2189_v48 = vmul.f32 %v5423_v2, %v5331_v58  ;;  %v2190_v38 = vmul.f32 %v5416_v55, %v5418_v39  ;;  %v2192_v9 = vmul.f32 %v5416_v55, %v5339_v32 }
 0x1d4   :  { %v5589_v18 = vadd.f32 %v2184_v57, %v2183_v27  ;;  %v5591_v6 = vsub.f32 %v2186_v15, %v2187_v35  ;;  %v2193_v56 = vmul.f32 %v5423_v2, %v5425_v63  ;;  %v2195_v29 = vmul.f32 %v5423_v2, %v5339_v32 }
 0x1d5   :  { %v5597_v59 = vadd.f32 %v2190_v38, %v2189_v48  ;;  %v2196_v58 = vmul.f32 %v5416_v55, %v5425_v63  ;;  %v5602_v36 = vstv %s5537_s22  ;;  %v5605_v39 = vstv %s5539_s23 }
 0x1d6   :  { %v5607_v10 = vsub.f32 %v2192_v9, %v2193_v56  ;;  %v2201_v20 = vmul.f32 %v5602_v36, %v5437_v43  ;;  %v2203_v19 = vmul.f32 %v5605_v39, %v5473_v49  ;;  %v2205_v32 = vmul.f32 %v5605_v39, %v5437_v43 }
 0x1d7   :  { %v5615_v2 = vadd.f32 %v2196_v58, %v2195_v29  ;;  %v2206_v55 = vmul.f32 %v5602_v36, %v5473_v49  ;;  %v2208_v63 = vmul.f32 %v5602_v36, %v5444_v3  ;;  %v2209_v46 = vmul.f32 %v5605_v39, %v5484_v47 }
 0x1d8   :  { %v5623_v31 = vsub.f32 %v2201_v20, %v2203_v19  ;;  %v2211_v34 = vmul.f32 %v5605_v39, %v5444_v3  ;;  %v2212_v37 = vmul.f32 %v5602_v36, %v5484_v47  ;;  %v2214_v43 = vmul.f32 %v5602_v36, %v5451_v40 }
 0x1d9   :  { %v5631_v52 = vadd.f32 %v2206_v55, %v2205_v32  ;;  %v5633_v49 = vsub.f32 %v2208_v63, %v2209_v46  ;;  %v2215_v7 = vmul.f32 %v5605_v39, %v5493_v28  ;;  %v2217_v23 = vmul.f32 %v5605_v39, %v5451_v40 }
 0x1da   :  { %v5639_v62 = vadd.f32 %v2212_v37, %v2211_v34  ;;  %v2218_v3 = vmul.f32 %v5602_v36, %v5493_v28  ;;  %v2220_v47 = vmul.f32 %v5602_v36, %v5464_v13  ;;  %v2221_v21 = vmul.f32 %v5605_v39, %v5505_v11 }
 0x1db   :  { %v5647_v17 = vsub.f32 %v2214_v43, %v2215_v7  ;;  %v2223_v45 = vmul.f32 %v5605_v39, %v5464_v13  ;;  %v2224_v4 = vmul.f32 %v5602_v36, %v5505_v11  ;;  %v2226_v40 = vmul.f32 %v5602_v36, %v5439_v30 }
 0x1dc   :  { %v5655_v51 = vadd.f32 %v2218_v3, %v2217_v23  ;;  %v5657_v28 = vsub.f32 %v2220_v47, %v2221_v21  ;;  %v2227_v1 = vmul.f32 %v5605_v39, %v5478_v61  ;;  %v2229_v22 = vmul.f32 %v5605_v39, %v5439_v30 }
 0x1dd   :  { %v5663_v27 = vadd.f32 %v2224_v4, %v2223_v45  ;;  %v2230_v13 = vmul.f32 %v5602_v36, %v5478_v61  ;;  %v2232_v11 = vmul.f32 %v5602_v36, %v5446_v16  ;;  %v2233_v57 = vmul.f32 %v5605_v39, %v5491_v41 }
 0x1de   :  { %v5671_v15 = vsub.f32 %v2226_v40, %v2227_v1  ;;  %v2235_v35 = vmul.f32 %v5605_v39, %v5446_v16  ;;  %v2236_v48 = vmul.f32 %v5602_v36, %v5491_v41  ;;  %v2238_v30 = vmul.f32 %v5602_v36, %v5458_v54 }
 0x1df   :  { %v5679_v38 = vadd.f32 %v2230_v13, %v2229_v22  ;;  %v5681_v61 = vsub.f32 %v2232_v11, %v2233_v57  ;;  %v2239_v9 = vmul.f32 %v5605_v39, %v5498_v24  ;;  %v2241_v56 = vmul.f32 %v5605_v39, %v5458_v54 }
 0x1e0   :  { %v5687_v29 = vadd.f32 %v2236_v48, %v2235_v35  ;;  %v2242_v16 = vmul.f32 %v5602_v36, %v5498_v24  ;;  %v2244_v41 = vmul.f32 %v5602_v36, %v5471_v42  ;;  %v2245_v58 = vmul.f32 %v5605_v39, %v5513_v5 }
 0x1e1   :  { %v5695_v20 = vsub.f32 %v2238_v30, %v2239_v9  ;;  %v2247_v19 = vmul.f32 %v5605_v39, %v5471_v42  ;;  %v2248_v32 = vmul.f32 %v5602_v36, %v5513_v5  ;;  %v2250_v54 = vmul.f32 %v5602_v36, %v5515_v12 }
 0x1e2   :  { %v5703_v55 = vadd.f32 %v2242_v16, %v2241_v56  ;;  %v5705_v24 = vsub.f32 %v2244_v41, %v2245_v58  ;;  %v2251_v63 = vmul.f32 %v5605_v39, %v5567_v14  ;;  %v2253_v46 = vmul.f32 %v5605_v39, %v5515_v12 }
 0x1e3   :  { %v5711_v34 = vadd.f32 %v2248_v32, %v2247_v19  ;;  %v2254_v42 = vmul.f32 %v5602_v36, %v5567_v14  ;;  %v2256_v5 = vmul.f32 %v5602_v36, %v5529_v44  ;;  %v2257_v37 = vmul.f32 %v5605_v39, %v5581_v0 }
 0x1e4   :  { %v5719_v43 = vsub.f32 %v2250_v54, %v2251_v63  ;;  %v2259_v7 = vmul.f32 %v5605_v39, %v5529_v44  ;;  %v2260_v23 = vmul.f32 %v5602_v36, %v5581_v0  ;;  %v2262_v12 = vmul.f32 %v5602_v36, %v5543_v33 }
 0x1e5   :  { %v5727_v3 = vadd.f32 %v2254_v42, %v2253_v46  ;;  %v5729_v14 = vsub.f32 %v2256_v5, %v2257_v37  ;;  %v2263_v47 = vmul.f32 %v5605_v39, %v5591_v6  ;;  %v2265_v21 = vmul.f32 %v5605_v39, %v5543_v33 }
 0x1e6   :  { %v5737_v45 = vadd.f32 %v2260_v23, %v2259_v7  ;;  %v2266_v44 = vmul.f32 %v5602_v36, %v5591_v6  ;;  %v2268_v0 = vmul.f32 %v5602_v36, %v5557_v50  ;;  %v2269_v4 = vmul.f32 %v5605_v39, %v5607_v10 }
 0x1e7   :  { %v5747_v40 = vsub.f32 %v2262_v12, %v2263_v47  ;;  %v2271_v33 = vmul.f32 %v5605_v39, %v5557_v50  ;;  %v2272_v1 = vmul.f32 %v5602_v36, %v5607_v10  ;;  %v2274_v22 = vmul.f32 %v5602_v36, %v5521_v8 }
 0x1e8   :  { %v5755_v6 = vadd.f32 %v2266_v44, %v2265_v21  ;;  %v5757_v13 = vsub.f32 %v2268_v0, %v2269_v4  ;;  %v2275_v11 = vmul.f32 %v5605_v39, %v5573_v26  ;;  %v2277_v57 = vmul.f32 %v5605_v39, %v5521_v8 }
 0x1e9   :  { %v5763_v35 = vadd.f32 %v2272_v1, %v2271_v33  ;;  %v2278_v50 = vmul.f32 %v5602_v36, %v5573_v26  ;;  %v2280_v10 = vmul.f32 %v5602_v36, %v5541_v60  ;;  %v2281_v48 = vmul.f32 %v5605_v39, %v5589_v18 }
 0x1ea   :  { %v5771_v30 = vsub.f32 %v2274_v22, %v2275_v11  ;;  %v2283_v9 = vmul.f32 %v5605_v39, %v5541_v60  ;;  %v2284_v8 = vmul.f32 %v5602_v36, %v5589_v18  ;;  %v2286_v56 = vmul.f32 %v5602_v36, %v5549_v25 }
 0x1eb   :  { %v5779_v26 = vadd.f32 %v2278_v50, %v2277_v57  ;;  %v5781_v16 = vsub.f32 %v2280_v10, %v2281_v48  ;;  %v2287_v41 = vmul.f32 %v5605_v39, %v5597_v59  ;;  %v2289_v58 = vmul.f32 %v5605_v39, %v5549_v25 }
 0x1ec   :  { %v5787_v19 = vadd.f32 %v2284_v8, %v2283_v9  ;;  %v2290_v60 = vmul.f32 %v5602_v36, %v5597_v59  ;;  %v2292_v18 = vmul.f32 %v5602_v36, %v5565_v53  ;;  %v2293_v32 = vmul.f32 %v5605_v39, %v5615_v2 }
 0x1ed   :  { %v5795_v54 = vsub.f32 %v2286_v56, %v2287_v41  ;;  %v2295_v63 = vmul.f32 %v5605_v39, %v5565_v53  ;;  %v2296_v46 = vmul.f32 %v5602_v36, %v5615_v2  ;;  %v5802_v25 = vstv %s5735_s24 }
 0x1ee   :  { %v5804_v42 = vadd.f32 %v2290_v60, %v2289_v58  ;;  %v5806_v5 = vsub.f32 %v2292_v18, %v2293_v32  ;;  %v2301_v59 = vmul.f32 %v5802_v25, %v5623_v31  ;;  %v5811_v37 = vstv %s5745_s25 }
 0x1ef   :  { %v5813_v7 = vadd.f32 %v2296_v46, %v2295_v63  ;;  %v2303_v23 = vmul.f32 %v5811_v37, %v5647_v17  ;;  %v2305_v53 = vmul.f32 %v5811_v37, %v5623_v31  ;;  %v2306_v36 = vmul.f32 %v5802_v25, %v5647_v17 }
 0x1f0   :  { %v2308_v39 = vmul.f32 %v5802_v25, %v5633_v49  ;;  %v2309_v2 = vmul.f32 %v5811_v37, %v5657_v28  ;;  %v2311_v12 = vmul.f32 %v5811_v37, %v5633_v49  ;;  %v2312_v47 = vmul.f32 %v5802_v25, %v5657_v28 }
 0x1f1   :  { %v5829_v21 = vsub.f32 %v2301_v59, %v2303_v23  ;;  %v5831_v44 = vadd.f32 %v2306_v36, %v2305_v53  ;;  %v2314_v31 = vmul.f32 %v5802_v25, %v5631_v52  ;;  %v2315_v17 = vmul.f32 %v5811_v37, %v5655_v51 }
 0x1f2   :  { %v5837_v0 = vsub.f32 %v2308_v39, %v2309_v2  ;;  %v5839_v4 = vadd.f32 %v2312_v47, %v2311_v12  ;;  %v2317_v49 = vmul.f32 %v5811_v37, %v5631_v52  ;;  %v2318_v28 = vmul.f32 %v5802_v25, %v5655_v51 }
 0x1f3   :  { %v5845_v33 = vsub.f32 %v2314_v31, %v2315_v17  ;;  %v2320_v1 = vmul.f32 %v5802_v25, %v5639_v62  ;;  %v2321_v22 = vmul.f32 %v5811_v37, %v5663_v27  ;;  %v2323_v11 = vmul.f32 %v5811_v37, %v5639_v62 }
 0x1f4   :  { %v5853_v57 = vadd.f32 %v2318_v28, %v2317_v49  ;;  %v2324_v50 = vmul.f32 %v5802_v25, %v5663_v27  ;;  %v2326_v52 = vmul.f32 %v5802_v25, %v5671_v15  ;;  %v2327_v51 = vmul.f32 %v5811_v37, %v5695_v20 }
 0x1f5   :  { %v5861_v10 = vsub.f32 %v2320_v1, %v2321_v22  ;;  %v2329_v48 = vmul.f32 %v5811_v37, %v5671_v15  ;;  %v2330_v9 = vmul.f32 %v5802_v25, %v5695_v20  ;;  %v2332_v62 = vmul.f32 %v5802_v25, %v5681_v61 }
 0x1f6   :  { %v5869_v8 = vadd.f32 %v2324_v50, %v2323_v11  ;;  %v5871_v27 = vsub.f32 %v2326_v52, %v2327_v51  ;;  %v2333_v56 = vmul.f32 %v5811_v37, %v5705_v24  ;;  %v2335_v41 = vmul.f32 %v5811_v37, %v5681_v61 }
 0x1f7   :  { %v5877_v58 = vadd.f32 %v2330_v9, %v2329_v48  ;;  %v2336_v15 = vmul.f32 %v5802_v25, %v5705_v24  ;;  %v2338_v20 = vmul.f32 %v5802_v25, %v5679_v38  ;;  %v2339_v60 = vmul.f32 %v5811_v37, %v5703_v55 }
 0x1f8   :  { %v5885_v18 = vsub.f32 %v2332_v62, %v2333_v56  ;;  %v2341_v32 = vmul.f32 %v5811_v37, %v5679_v38  ;;  %v2342_v63 = vmul.f32 %v5802_v25, %v5703_v55  ;;  %v2344_v61 = vmul.f32 %v5802_v25, %v5687_v29 }
 0x1f9   :  { %v5893_v46 = vadd.f32 %v2336_v15, %v2335_v41  ;;  %v5895_v24 = vsub.f32 %v2338_v20, %v2339_v60  ;;  %v2345_v59 = vmul.f32 %v5811_v37, %v5711_v34  ;;  %v2347_v23 = vmul.f32 %v5811_v37, %v5687_v29 }
 0x1fa   :  { %v5901_v53 = vadd.f32 %v2342_v63, %v2341_v32  ;;  %v2348_v38 = vmul.f32 %v5802_v25, %v5711_v34  ;;  %v2350_v55 = vmul.f32 %v5802_v25, %v5719_v43  ;;  %v2351_v36 = vmul.f32 %v5811_v37, %v5747_v40 }
 0x1fb   :  { %v5909_v39 = vsub.f32 %v2344_v61, %v2345_v59  ;;  %v2353_v2 = vmul.f32 %v5811_v37, %v5719_v43  ;;  %v2354_v12 = vmul.f32 %v5802_v25, %v5747_v40  ;;  %v2356_v29 = vmul.f32 %v5802_v25, %v5729_v14 }
 0x1fc   :  { %v5917_v47 = vadd.f32 %v2348_v38, %v2347_v23  ;;  %v5919_v34 = vsub.f32 %v2350_v55, %v2351_v36  ;;  %v2357_v31 = vmul.f32 %v5811_v37, %v5757_v13  ;;  %v2359_v17 = vmul.f32 %v5811_v37, %v5729_v14 }
 0x1fd   :  { %v5925_v49 = vadd.f32 %v2354_v12, %v2353_v2  ;;  %v2360_v43 = vmul.f32 %v5802_v25, %v5757_v13  ;;  %v2362_v40 = vmul.f32 %v5802_v25, %v5727_v3  ;;  %v2363_v28 = vmul.f32 %v5811_v37, %v5755_v6 }
 0x1fe   :  { %v2358_v1 = vsub.f32 %v2356_v29, %v2357_v31  ;;  %v2365_v22 = vmul.f32 %v5811_v37, %v5727_v3  ;;  %v2366_v11 = vmul.f32 %v5802_v25, %v5755_v6  ;;  %v2368_v14 = vmul.f32 %v5802_v25, %v5737_v45 }
 0x1ff   :  { %v2361_v50 = vadd.f32 %v2360_v43, %v2359_v17  ;;  %v2364_v52 = vsub.f32 %v2362_v40, %v2363_v28  ;;  %v2369_v13 = vmul.f32 %v5811_v37, %v5763_v35  ;;  %v2371_v51 = vmul.f32 %v5811_v37, %v5737_v45 }
 0x200   :  { %v2367_v48 = vadd.f32 %v2366_v11, %v2365_v22  ;;  %v2372_v9 = vmul.f32 %v5802_v25, %v5763_v35  ;;  %v2374_v3 = vmul.f32 %v5802_v25, %v5771_v30  ;;  %v2375_v6 = vmul.f32 %v5811_v37, %v5795_v54 }
 0x201   :  { %v2370_v62 = vsub.f32 %v2368_v14, %v2369_v13  ;;  %v2377_v56 = vmul.f32 %v5811_v37, %v5771_v30  ;;  %v2378_v41 = vmul.f32 %v5802_v25, %v5795_v54  ;;  %v2380_v45 = vmul.f32 %v5802_v25, %v5781_v16 }
 0x202   :  { %v2373_v15 = vadd.f32 %v2372_v9, %v2371_v51  ;;  %v2376_v20 = vsub.f32 %v2374_v3, %v2375_v6  ;;  %v2381_v35 = vmul.f32 %v5811_v37, %v5806_v5  ;;  %v2383_v60 = vmul.f32 %v5811_v37, %v5781_v16 }
 0x203   :  { %v2379_v32 = vadd.f32 %v2378_v41, %v2377_v56  ;;  %v2384_v63 = vmul.f32 %v5802_v25, %v5806_v5  ;;  %v2386_v30 = vmul.f32 %v5802_v25, %v5779_v26  ;;  %v2387_v54 = vmul.f32 %v5811_v37, %v5804_v42 }
 0x204   :  { %v2382_v61 = vsub.f32 %v2380_v45, %v2381_v35  ;;  %v2389_v59 = vmul.f32 %v5811_v37, %v5779_v26  ;;  %v2390_v23 = vmul.f32 %v5802_v25, %v5804_v42  ;;  %v2392_v16 = vmul.f32 %v5802_v25, %v5787_v19 }
 0x205   :  { %v2385_v38 = vadd.f32 %v2384_v63, %v2383_v60  ;;  %v2388_v55 = vsub.f32 %v2386_v30, %v2387_v54  ;;  %v2393_v5 = vmul.f32 %v5811_v37, %v5813_v7  ;;  %v2395_v36 = vmul.f32 %v5811_v37, %v5787_v19 }
 0x206   :  { %v2391_v2 = vadd.f32 %v2390_v23, %v2389_v59  ;;  %v2396_v12 = vmul.f32 %v5802_v25, %v5813_v7  ;;  %v2398_v26 = vmul.f32 %v5829_v21, %v5829_v21  ;;  %v2399_v42 = vmul.f32 %v5837_v0, %v5837_v0 }
 0x207   :  { %v2394_v29 = vsub.f32 %v2392_v16, %v2393_v5  ;;  %v2401_v31 = vmul.f32 %v5831_v44, %v5831_v44  ;;  %v2402_v17 = vmul.f32 %v5839_v4, %v5839_v4  ;;  %v2404_v19 = vmul.f32 %v5845_v33, %v5845_v33 }
 0x208   :  { %v2397_v37 = vadd.f32 %v2396_v12, %v2395_v36  ;;  %v2400_v43 = vadd.f32 %v2399_v42, %v2398_v26  ;;  %v2405_v25 = vmul.f32 %v5861_v10, %v5861_v10  ;;  %v2407_v7 = vmul.f32 %v5853_v57, %v5853_v57 }
 0x209   :  { %v2403_v21 = vadd.f32 %v2402_v17, %v2401_v31  ;;  %v2408_v0 = vmul.f32 %v5869_v8, %v5869_v8  ;;  %v2410_v44 = vmul.f32 %v5871_v27, %v5871_v27  ;;  %v2411_v4 = vmul.f32 %v5885_v18, %v5885_v18 }
 0x20a   :  { %v2406_v40 = vadd.f32 %v2405_v25, %v2404_v19  ;;  %v2413_v33 = vmul.f32 %v5877_v58, %v5877_v58  ;;  %v2414_v10 = vmul.f32 %v5893_v46, %v5893_v46  ;;  %v2416_v57 = vmul.f32 %v5895_v24, %v5895_v24 }
 0x20b   :  { %v2409_v28 = vadd.f32 %v2408_v0, %v2407_v7  ;;  %v2412_v22 = vadd.f32 %v2411_v4, %v2410_v44  ;;  %v2417_v8 = vmul.f32 %v5909_v39, %v5909_v39  ;;  %v2419_v27 = vmul.f32 %v5901_v53, %v5901_v53 }
 0x20c   :  { %v2415_v11 = vadd.f32 %v2414_v10, %v2413_v33  ;;  %v2420_v18 = vmul.f32 %v5917_v47, %v5917_v47  ;;  %v2422_v58 = vmul.f32 %v5919_v34, %v5919_v34  ;;  %v2423_v14 = vmul.f32 %v2358_v1, %v2358_v1 }
 0x20d   :  { %v2418_v46 = vadd.f32 %v2417_v8, %v2416_v57  ;;  %v2425_v24 = vmul.f32 %v5925_v49, %v5925_v49  ;;  %v2426_v13 = vmul.f32 %v2361_v50, %v2361_v50  ;;  %v2428_v51 = vmul.f32 %v2364_v52, %v2364_v52 }
 0x20e   :  { %v2421_v9 = vadd.f32 %v2420_v18, %v2419_v27  ;;  %v2424_v3 = vadd.f32 %v2423_v14, %v2422_v58  ;;  %v2429_v39 = vmul.f32 %v2370_v62, %v2370_v62  ;;  %v2431_v6 = vmul.f32 %v2367_v48, %v2367_v48 }
 0x20f   :  { %v2427_v56 = vadd.f32 %v2426_v13, %v2425_v24  ;;  %v2432_v53 = vmul.f32 %v2373_v15, %v2373_v15  ;;  %v2434_v41 = vmul.f32 %v2376_v20, %v2376_v20  ;;  %v2435_v45 = vmul.f32 %v2382_v61, %v2382_v61 }
 0x210   :  { %v2430_v35 = vadd.f32 %v2429_v39, %v2428_v51  ;;  %v2437_v47 = vmul.f32 %v2379_v32, %v2379_v32  ;;  %v2438_v60 = vmul.f32 %v2385_v38, %v2385_v38  ;;  %v2440_v63 = vmul.f32 %v2388_v55, %v2388_v55 }
 0x211   :  { %v2433_v34 = vadd.f32 %v2432_v53, %v2431_v6  ;;  %v2436_v1 = vadd.f32 %v2435_v45, %v2434_v41  ;;  %v2441_v30 = vmul.f32 %v2394_v29, %v2394_v29  ;;  %v2443_v54 = vmul.f32 %v2391_v2, %v2391_v2 }
 0x212   :  { %v2439_v59 = vadd.f32 %v2438_v60, %v2437_v47  ;;  %v2444_v49 = vmul.f32 %v2397_v37, %v2397_v37  ;;  %v2446_v50 = vadd.f32 %v2403_v21, %v2400_v43  ;;  %v2447_v52 = vadd.f32 %v2409_v28, %v2406_v40 }
 0x213   :  { %v2442_v23 = vadd.f32 %v2441_v30, %v2440_v63  ;;  %v2448_v16 = vadd.f32 %v2415_v11, %v2412_v22  ;;  %v2449_v62 = vadd.f32 %v2421_v9, %v2418_v46  ;;  %v2450_v48 = vadd.f32 %v2427_v56, %v2424_v3 }
 0x214   :  { %v2445_v5 = vadd.f32 %v2444_v49, %v2443_v54  ;;  %v2451_v15 = vadd.f32 %v2433_v34, %v2430_v35  ;;  %v2452_v20 = vadd.f32 %v2439_v59, %v2436_v1  ;;  %v2454_v61 = vadd.f32 %v2447_v52, %v2446_v50 }
 0x215   :  { %v2455_v36 = vadd.f32 %v2449_v62, %v2448_v16  ;;  %v2465_v32 = vadd.f32 %v2406_v40, %v2400_v43  ;;  %v2466_v12 = vadd.f32 %v2418_v46, %v2412_v22  ;;  %v2468_v26 = vadd.f32 %v2430_v35, %v2424_v3 }
 0x216   :  { %v2453_v38 = vadd.f32 %v2445_v5, %v2442_v23  ;;  %v2456_v55 = vadd.f32 %v2451_v15, %v2450_v48  ;;  %v2469_v42 = vadd.f32 %v2442_v23, %v2436_v1  ;;  %v2462_v31 = vadd.f32 %v2448_v16, %v2446_v50 }
 0x217   :  { %v2458_v29 = vadd.f32 %v2455_v36, %v2454_v61  ;;  %v2463_v19 = vadd.f32 %v2452_v20, %v2450_v48  ;;  %v2467_v37 = vadd.f32 %v2466_v12, %v2465_v32 }
 0x218   :  { %v2457_v2 = vadd.f32 %v2453_v38, %v2452_v20  ;;  %v2470_v25 = vadd.f32 %v2469_v42, %v2468_v26  ;;  %v2461_v21 = vadd.f32 %v2456_v55, %v2454_v61 }
 0x219   :  { %v2464_v0 = vadd.f32 %v2463_v19, %v2462_v31 }
 0x21a   :  { %v2459_v17 = vadd.f32 %v2457_v2, %v2456_v55  ;;  %v2471_v44 = vadd.f32 %v2470_v25, %v2467_v37 }
 0x21c   :  { %v2460_v7 = vadd.f32 %v2459_v17, %v2458_v29 }
 0x21e   :  { %v2472_v4 = vsub.f32 1.0, %v2460_v7 }
 0x220   :  { %v2473_v43 = vmul.f32 0.5, %v2472_v4 }
 0x222   :  { %v2474_v40 = vadd.f32 %v2473_v43, %v2458_v29  ;;  %v2476_v33 = vadd.f32 %v2473_v43, %v2461_v21  ;;  %v2479_v10 = vadd.f32 %v2473_v43, %v2464_v0  ;;  %v2482_v57 = vadd.f32 %v2473_v43, %v2471_v44 }
 0x224   :  { %2475 = vst [vmem:[#allocation7] sm:$0xff] %v2474_v40  ;;  %2478 = vst [vmem:[#allocation7 + $0x8] sm:$0xff] %v2476_v33 }
 0x225   :  { %2481 = vst [vmem:[#allocation7 + $0x10] sm:$0xff] %v2479_v10  ;;  %2484 = vst [vmem:[#allocation7 + $0x18] sm:$0xff] %v2482_v57 }
 0x226   :  { %2713 = shalt.err (!%p2710_p1)
}
 0x227   :  { %s6100_s1 = sld [smem:[#allocation15_spill]] }
 0x22d   :  { %s2714_s4 = scalar_lea.hbm %s6100_s1, 512 }
 0x22e   :  { %p2715_p2 = scmp.ne.s32.totalorder %s6100_s1, %s2714_s4  ;;  %p2718_p3 = scmp.lt.u32.totalorder %s2714_s4, %s6100_s1 }
 0x230   :  { %p2720_p4 = pnand %p2718_p3, %p2715_p2 }
 0x232   :  { %2723 = shalt.err (!%p2720_p4)
}
 0x233   :  { %s6101_s9 = smov 8   ;;  %s6102_s10 = smov 128  }
 0x234   :  { %2496 = dma.vmem_to_hbm [thread:$0]  %s2491_s27, 512, %s6100_s1, [#allocation6], %s6102_s10, %s6102_s10, %s6101_s9  }
 0x235   :  { %2728 = dma.done.wait [#allocation6], 512  }
 0x236   :  { %2729 = vsyncadd [#allocation6], 4294966784 }
 0x237   :  { %2500 = vsyncpa [#allocation5], 1 }
 0x238   :  { %2501 = vsyncpa [#allocation6], 1 }

</bundles_post_ra>
